<compile_context>
chip_gen: v6e
topology: v6e:2x2x1
jax: 0.10.0
libtpu: 0.0.40
codegen_flags: <defaults>
</compile_context>

<pallas_src>
import jax
import jax.numpy as jnp
from jax.experimental import pallas as pl
from jax.experimental.pallas import tpu as pltpu

HIDDEN = 256
OUT = 256


def mlp_backbone_kernel(x_ref, w1_ref, b1_ref, w2_ref, b2_ref, w3_ref, b3_ref, o_ref):
    x = x_ref[...]
    _, din = x.shape

    # ---- layer 1: Linear(din -> 256) + ReLU --------------------------------
    if din <= 16:
        # Tiny-K contraction: keep it off the MXU (a K=3 systolic pass runs at
        # ~1-2% contraction utilization).  Do `din` broadcast FMAs on the
        # otherwise-idle VPU, accumulating in f32.
        h1 = x[:, 0:1].astype(jnp.float32) * w1_ref[0:1, :].astype(jnp.float32)
        for d in range(1, din):
            h1 = h1 + x[:, d:d + 1].astype(jnp.float32) * w1_ref[d:d + 1, :].astype(jnp.float32)
        h1 = h1 + b1_ref[...]
    else:
        h1 = jnp.dot(x, w1_ref[...], preferred_element_type=jnp.float32) + b1_ref[...]
    h1 = jnp.maximum(h1, 0.0)

    # ---- layer 2: Linear(256 -> 256) + ReLU (MXU, bf16 in / f32 acc) -------
    h2 = jnp.dot(h1.astype(w2_ref.dtype), w2_ref[...], preferred_element_type=jnp.float32)
    h2 = jnp.maximum(h2 + b2_ref[...], 0.0)

    # ---- layer 3: Linear(256 -> 256), no activation -------------------------
    h3 = jnp.dot(h2.astype(w3_ref.dtype), w3_ref[...], preferred_element_type=jnp.float32)
    o_ref[...] = (h3 + b3_ref[...]).astype(o_ref.dtype)


def backbone_forward(x, params, *, tile_m=512, use_bf16=True):
    """x: (B, N, D_in) float32.  Returns (B, N, 256) float32."""
    w1, b1, w2, b2, w3, b3 = params
    B, N, Din = x.shape
    M = B * N

    # Pad the row count up to a multiple of the tile (no divisibility assert).
    n_tiles = pl.cdiv(M, tile_m)
    Mp = n_tiles * tile_m
    x2d = x.reshape(M, Din)
    if Mp != M:
        x2d = jnp.pad(x2d, ((0, Mp - M), (0, 0)))

    # Cast matmul operands to bf16 (f32 accumulation inside the kernel).
    cdt = jnp.bfloat16 if use_bf16 else jnp.float32
    x2d = x2d.astype(cdt)
    w1c, w2c, w3c = w1.astype(cdt), w2.astype(cdt), w3.astype(cdt)

    grid = (n_tiles,)

    flops = 2 * Mp * (Din * HIDDEN + HIDDEN * HIDDEN + HIDDEN * OUT)
    bytes_accessed = (
        x2d.size * x2d.dtype.itemsize
        + w1c.size * w1c.dtype.itemsize
        + w2c.size * w2c.dtype.itemsize
        + w3c.size * w3c.dtype.itemsize
        + (b1.size + b2.size + b3.size) * 4
        + Mp * OUT * 4
    )

    out = pl.pallas_call(
        mlp_backbone_kernel,
        out_shape=jax.ShapeDtypeStruct((Mp, OUT), jnp.float32),
        grid_spec=pltpu.PrefetchScalarGridSpec(
            num_scalar_prefetch=0,
            grid=grid,
            in_specs=[
                pl.BlockSpec((tile_m, Din), lambda i: (i, 0)),     # x rows (streamed)
                # Constant index maps below: the auto-pipeliner DMAs these once
                # (block index never changes), so weights/biases stay resident.
                pl.BlockSpec((Din, HIDDEN), lambda i: (0, 0)),     # W1
                pl.BlockSpec((1, HIDDEN), lambda i: (0, 0)),       # b1 (f32)
                pl.BlockSpec((HIDDEN, HIDDEN), lambda i: (0, 0)),  # W2
                pl.BlockSpec((1, HIDDEN), lambda i: (0, 0)),       # b2 (f32)
                pl.BlockSpec((HIDDEN, OUT), lambda i: (0, 0)),     # W3
                pl.BlockSpec((1, OUT), lambda i: (0, 0)),          # b3 (f32)
            ],
            out_specs=pl.BlockSpec((tile_m, OUT), lambda i: (i, 0)),
        ),
        compiler_params=pltpu.CompilerParams(
            dimension_semantics=("parallel",),
        ),
        cost_estimate=pl.CostEstimate(
            flops=flops, transcendentals=0, bytes_accessed=bytes_accessed
        ),
    )(x2d, w1c, b1, w2c, b2, w3c, b3)

    return out[:M].reshape(B, N, OUT)


def init_params(key, input_dim):
    """Deterministic init matching nn.Linear shapes (stored transposed: (in, out))."""
    ks = jax.random.split(key, 6)

    def linear_init(kw, kb, fan_in, fan_out):
        bound = 1.0 / jnp.sqrt(fan_in)
        w = jax.random.uniform(kw, (fan_in, fan_out), jnp.float32, -bound, bound)
        b = jax.random.uniform(kb, (1, fan_out), jnp.float32, -bound, bound)
        return w, b

    w1, b1 = linear_init(ks[0], ks[1], input_dim, HIDDEN)
    w2, b2 = linear_init(ks[2], ks[3], HIDDEN, HIDDEN)
    w3, b3 = linear_init(ks[4], ks[5], HIDDEN, OUT)
    return (w1, b1, w2, b2, w3, b3)


def backbone_ref(x, params, *, use_bf16=True):
    """Pure-JAX reference mirroring the kernel's precision choices."""
    w1, b1, w2, b2, w3, b3 = params
    cdt = jnp.bfloat16 if use_bf16 else jnp.float32
    B, N, Din = x.shape
    xq = x.reshape(B * N, Din).astype(cdt)
    w1q, w2q, w3q = w1.astype(cdt), w2.astype(cdt), w3.astype(cdt)
    h = jnp.dot(xq.astype(jnp.float32), w1q.astype(jnp.float32)) + b1
    h = jnp.maximum(h, 0.0)
    h = jnp.dot(h.astype(cdt), w2q, preferred_element_type=jnp.float32) + b2
    h = jnp.maximum(h, 0.0)
    out = jnp.dot(h.astype(cdt), w3q, preferred_element_type=jnp.float32) + b3
    return out.reshape(B, N, OUT)


def backbone_ref_f32(x, params):
    """Full-precision reference of the original module semantics."""
    w1, b1, w2, b2, w3, b3 = params
    h = jnp.maximum(x @ w1 + b1[0], 0.0)
    h = jnp.maximum(h @ w2 + b2[0], 0.0)
    return h @ w3 + b3[0]


if __name__ == "__main__":
    key = jax.random.PRNGKey(0)
    k_x, k_p = jax.random.split(key)

    # Small shapes consistent with ModelNet40 point-cloud usage: (batch, points, xyz)
    B, N, Din = 2, 8, 3
    x = jax.random.normal(k_x, (B, N, Din), jnp.float32)
    params = init_params(k_p, Din)

    out = backbone_forward(x, params)
    out = jax.block_until_ready(out)
    assert out.shape == (B, N, OUT), out.shape

    # Compare against a precision-matched (bf16 operand / f32 accumulate) reference.
    ref = backbone_ref(x, params, use_bf16=True)
    assert jnp.allclose(out, ref, atol=1e-2, rtol=1e-2), float(jnp.max(jnp.abs(out - ref)))

    # Sanity check against the full-f32 module semantics (looser tolerance for bf16 cast).
    ref32 = backbone_ref_f32(x, params)
    assert jnp.allclose(out, ref32, atol=1e-1, rtol=1e-1), float(jnp.max(jnp.abs(out - ref32)))

    print("KERNEL_OK")
</pallas_src>

<mosaic_0001>
module attributes {stable_mosaic.version = 11 : i64} {
  func.func @mlp_backbone_kernel(%arg0: i32, %arg1: memref<512x3xbf16, #tpu.memory_space<vmem>>, %arg2: memref<3x256xbf16, #tpu.memory_space<vmem>>, %arg3: memref<1x256xf32, #tpu.memory_space<vmem>>, %arg4: memref<256x256xbf16, #tpu.memory_space<vmem>>, %arg5: memref<1x256xf32, #tpu.memory_space<vmem>>, %arg6: memref<256x256xbf16, #tpu.memory_space<vmem>>, %arg7: memref<1x256xf32, #tpu.memory_space<vmem>>, %arg8: memref<512x256xf32, #tpu.memory_space<vmem>>) attributes {dimension_semantics = [#tpu.dimension_semantics<parallel>], iteration_bounds = array<i64: 1>, scalar_prefetch = 0 : i64, scratch_operands = 0 : i64, tpu.core_type = #tpu.core_type<tc>, window_params = [{transform_indices = @transform_0, window_bounds = array<i64: 512, 3>}, {pipeline_mode = #tpu.pipeline_mode<synchronous>, transform_indices = @transform_1, window_bounds = array<i64: 3, 256>}, {pipeline_mode = #tpu.pipeline_mode<synchronous>, transform_indices = @transform_2, window_bounds = array<i64: 1, 256>}, {pipeline_mode = #tpu.pipeline_mode<synchronous>, transform_indices = @transform_3, window_bounds = array<i64: 256, 256>}, {pipeline_mode = #tpu.pipeline_mode<synchronous>, transform_indices = @transform_4, window_bounds = array<i64: 1, 256>}, {pipeline_mode = #tpu.pipeline_mode<synchronous>, transform_indices = @transform_5, window_bounds = array<i64: 256, 256>}, {pipeline_mode = #tpu.pipeline_mode<synchronous>, transform_indices = @transform_6, window_bounds = array<i64: 1, 256>}, {transform_indices = @transform_7, window_bounds = array<i64: 512, 256>}]} {
    %c0 = arith.constant 0 : index
    %c0_0 = arith.constant 0 : index
    %0 = vector.load %arg1[%c0, %c0_0] : memref<512x3xbf16, #tpu.memory_space<vmem>>, vector<512x3xbf16>
    %1 = vector.extract_strided_slice %0 {offsets = [0, 0], sizes = [512, 1], strides = [1, 1]} : vector<512x3xbf16> to vector<512x1xbf16>
    %2 = arith.extf %1 : vector<512x1xbf16> to vector<512x1xf32>
    %c0_1 = arith.constant 0 : index
    %c0_2 = arith.constant 0 : index
    %3 = vector.load %arg2[%c0_1, %c0_2] : memref<3x256xbf16, #tpu.memory_space<vmem>>, vector<1x256xbf16>
    %4 = arith.extf %3 : vector<1x256xbf16> to vector<1x256xf32>
    %5 = vector.broadcast %2 : vector<512x1xf32> to vector<512x256xf32>
    %6 = vector.broadcast %4 : vector<1x256xf32> to vector<512x256xf32>
    %7 = arith.mulf %5, %6 : vector<512x256xf32>
    %8 = vector.extract_strided_slice %0 {offsets = [0, 1], sizes = [512, 1], strides = [1, 1]} : vector<512x3xbf16> to vector<512x1xbf16>
    %9 = arith.extf %8 : vector<512x1xbf16> to vector<512x1xf32>
    %c1 = arith.constant 1 : index
    %c0_3 = arith.constant 0 : index
    %10 = vector.load %arg2[%c1, %c0_3] : memref<3x256xbf16, #tpu.memory_space<vmem>>, vector<1x256xbf16>
    %11 = arith.extf %10 : vector<1x256xbf16> to vector<1x256xf32>
    %12 = vector.broadcast %9 : vector<512x1xf32> to vector<512x256xf32>
    %13 = vector.broadcast %11 : vector<1x256xf32> to vector<512x256xf32>
    %14 = arith.mulf %12, %13 : vector<512x256xf32>
    %15 = arith.addf %7, %14 : vector<512x256xf32>
    %16 = vector.extract_strided_slice %0 {offsets = [0, 2], sizes = [512, 1], strides = [1, 1]} : vector<512x3xbf16> to vector<512x1xbf16>
    %17 = arith.extf %16 : vector<512x1xbf16> to vector<512x1xf32>
    %c2 = arith.constant 2 : index
    %c0_4 = arith.constant 0 : index
    %18 = vector.load %arg2[%c2, %c0_4] : memref<3x256xbf16, #tpu.memory_space<vmem>>, vector<1x256xbf16>
    %19 = arith.extf %18 : vector<1x256xbf16> to vector<1x256xf32>
    %20 = vector.broadcast %17 : vector<512x1xf32> to vector<512x256xf32>
    %21 = vector.broadcast %19 : vector<1x256xf32> to vector<512x256xf32>
    %22 = arith.mulf %20, %21 : vector<512x256xf32>
    %23 = arith.addf %15, %22 : vector<512x256xf32>
    %c0_5 = arith.constant 0 : index
    %c0_6 = arith.constant 0 : index
    %24 = vector.load %arg3[%c0_5, %c0_6] : memref<1x256xf32, #tpu.memory_space<vmem>>, vector<1x256xf32>
    %25 = vector.broadcast %24 : vector<1x256xf32> to vector<512x256xf32>
    %26 = arith.addf %23, %25 : vector<512x256xf32>
    %cst = arith.constant 0.000000e+00 : f32
    %27 = vector.broadcast %cst : f32 to vector<512x256xf32>
    %28 = arith.maximumf %26, %27 : vector<512x256xf32>
    %29 = arith.truncf %28 : vector<512x256xf32> to vector<512x256xbf16>
    %c0_7 = arith.constant 0 : index
    %c0_8 = arith.constant 0 : index
    %30 = vector.load %arg4[%c0_7, %c0_8] : memref<256x256xbf16, #tpu.memory_space<vmem>>, vector<256x256xbf16>
    %cst_9 = arith.constant dense<0.000000e+00> : vector<512x256xf32>
    %31 = tpu.matmul %29, %30, %cst_9 {dimension_numbers = #tpu.dot_dimension_numbers<[1], [0], [0], [1], [0, 0, 1, 1], [], []>} : vector<512x256xbf16>, vector<256x256xbf16>, vector<512x256xf32> -> vector<512x256xf32>
    %c0_10 = arith.constant 0 : index
    %c0_11 = arith.constant 0 : index
    %32 = vector.load %arg5[%c0_10, %c0_11] : memref<1x256xf32, #tpu.memory_space<vmem>>, vector<1x256xf32>
    %33 = vector.broadcast %32 : vector<1x256xf32> to vector<512x256xf32>
    %34 = arith.addf %31, %33 : vector<512x256xf32>
    %cst_12 = arith.constant 0.000000e+00 : f32
    %35 = vector.broadcast %cst_12 : f32 to vector<512x256xf32>
    %36 = arith.maximumf %34, %35 : vector<512x256xf32>
    %37 = arith.truncf %36 : vector<512x256xf32> to vector<512x256xbf16>
    %c0_13 = arith.constant 0 : index
    %c0_14 = arith.constant 0 : index
    %38 = vector.load %arg6[%c0_13, %c0_14] : memref<256x256xbf16, #tpu.memory_space<vmem>>, vector<256x256xbf16>
    %cst_15 = arith.constant dense<0.000000e+00> : vector<512x256xf32>
    %39 = tpu.matmul %37, %38, %cst_15 {dimension_numbers = #tpu.dot_dimension_numbers<[1], [0], [0], [1], [0, 0, 1, 1], [], []>} : vector<512x256xbf16>, vector<256x256xbf16>, vector<512x256xf32> -> vector<512x256xf32>
    %c0_16 = arith.constant 0 : index
    %c0_17 = arith.constant 0 : index
    %40 = vector.load %arg7[%c0_16, %c0_17] : memref<1x256xf32, #tpu.memory_space<vmem>>, vector<1x256xf32>
    %41 = vector.broadcast %40 : vector<1x256xf32> to vector<512x256xf32>
    %42 = arith.addf %39, %41 : vector<512x256xf32>
    %c0_18 = arith.constant 0 : index
    %c0_19 = arith.constant 0 : index
    %43 = vector.load %arg8[%c0_18, %c0_19] : memref<512x256xf32, #tpu.memory_space<vmem>>, vector<512x256xf32>
    tpu.vector_store %arg8[%c0_18, %c0_19], %42 {strides = array<i32>} : memref<512x256xf32, #tpu.memory_space<vmem>>, vector<512x256xf32>,
    return
  }
  func.func @transform_0(%arg0: i32) -> (i32, i32) {
    %c0_i32 = arith.constant 0 : i32
    %c0_i32_0 = arith.constant 0 : i32
    return %arg0, %c0_i32 : i32, i32
  }
  func.func @transform_1(%arg0: i32) -> (i32, i32) {
    %c0_i32 = arith.constant 0 : i32
    %c0_i32_0 = arith.constant 0 : i32
    %c0_i32_1 = arith.constant 0 : i32
    return %c0_i32, %c0_i32_0 : i32, i32
  }
  func.func @transform_2(%arg0: i32) -> (i32, i32) {
    %c0_i32 = arith.constant 0 : i32
    %c0_i32_0 = arith.constant 0 : i32
    %c0_i32_1 = arith.constant 0 : i32
    return %c0_i32, %c0_i32_0 : i32, i32
  }
  func.func @transform_3(%arg0: i32) -> (i32, i32) {
    %c0_i32 = arith.constant 0 : i32
    %c0_i32_0 = arith.constant 0 : i32
    %c0_i32_1 = arith.constant 0 : i32
    return %c0_i32, %c0_i32_0 : i32, i32
  }
  func.func @transform_4(%arg0: i32) -> (i32, i32) {
    %c0_i32 = arith.constant 0 : i32
    %c0_i32_0 = arith.constant 0 : i32
    %c0_i32_1 = arith.constant 0 : i32
    return %c0_i32, %c0_i32_0 : i32, i32
  }
  func.func @transform_5(%arg0: i32) -> (i32, i32) {
    %c0_i32 = arith.constant 0 : i32
    %c0_i32_0 = arith.constant 0 : i32
    %c0_i32_1 = arith.constant 0 : i32
    return %c0_i32, %c0_i32_0 : i32, i32
  }
  func.func @transform_6(%arg0: i32) -> (i32, i32) {
    %c0_i32 = arith.constant 0 : i32
    %c0_i32_0 = arith.constant 0 : i32
    %c0_i32_1 = arith.constant 0 : i32
    return %c0_i32, %c0_i32_0 : i32, i32
  }
  func.func @transform_7(%arg0: i32) -> (i32, i32) {
    %c0_i32 = arith.constant 0 : i32
    %c0_i32_0 = arith.constant 0 : i32
    return %arg0, %c0_i32 : i32, i32
  }
}

</mosaic_0001>

<bundles_post_ra>
// kernel: tpu_custom_call.1
= control target key start
LH: loop header
LB: loop body
LE: loop exit
PB: predicated region body
PF: predicated region fallthrough
CT: control target
= control target key end

     0   :  { %12 = vsyncpa [#allocation3], 0  ;;  %s5929_s0 = inlined_call_operand.vmem [shape: bf16[512,3], index: 0, kind: input, shape index: {}]   ;;  %s5930_s1 = inlined_call_operand.vmem [shape: bf16[3,256], index: 1, kind: input, shape index: {}]   ;;  %s5931_s2 = inlined_call_operand.vmem [shape: f32[1,256], index: 2, kind: input, shape index: {}]   ;;  %s5932_s3 = inlined_call_operand.vmem [shape: bf16[256,256], index: 3, kind: input, shape index: {}]   ;;  %s5933_s4 = inlined_call_operand.vmem [shape: f32[1,256], index: 4, kind: input, shape index: {}]   ;;  %s5934_s5 = inlined_call_operand.hbm [shape: bf16[256,256], index: 5, kind: input, shape index: {}]   ;;  %s5935_s6 = inlined_call_operand.vmem [shape: f32[1,256], index: 6, kind: input, shape index: {}]   ;;  %s5936_s7 = inlined_call_operand.hbm [shape: f32[512,256], index: 7, kind: output, shape index: {}]  }
   0x1   :  { %13 = vsyncpa [#allocation4], 0  ;;  %s4411_s24 = smov [#allocation2]  }
   0x2   :  { %s29_s25 = sshll.u32 %s4411_s24, 4  ;;  %s30_s25 = int_to_ptr.vmem [resolvable:$true] %s29_s25 }
   0x3   :  { %s4375_s26 = scalar_lea.vmem %s30_s25, 4096  ;;  %p4380_p1 = scmp.lt.s32.totalorder %s30_s25, %s30_s25 }
   0x4   :  { %p4376_p0 = scmp.ne.s32.totalorder %s30_s25, %s4375_s26  ;;  %p4381_p2 = scmp.lt.s32.totalorder %s4375_s26, %s4375_s26 }
   0x6   :  { %p4382_p3 = por %p4381_p2, %p4380_p1 }
   0x8   :  { %p4383_p4 = pnand %p4382_p3, %p4376_p0 }
   0xa   :  { %4386 = shalt.err (!%p4383_p4)
}
   0xb   :  { %s4412_s27 = smov 128   ;;  %s4413_s28 = smov 8  }
   0xc   :  { %35 = dma.hbm_to_vmem [thread:$0]  %s5934_s5, 4096, %s30_s25, [#allocation3], %s4412_s27, %s4412_s27, %s4413_s28  }
   0xd   :  { %4407 = dma.done.wait [#allocation3], 4096  }
   0xe   :  { %4408 = vsyncadd [#allocation3], 4294963200  ;;  %v5939_v0 = vmov 0   ;;  %v3677_v1 = vld [vmem:[%s5929_s0 + $0x10] sm:$0xff]   ;;  %v3549_v2 = vld [vmem:[%s5929_s0] sm:$0xff]   ;;  %v4415_v28 = vmov 1  }
   0xf   :  { %3727 = vset.pattern.permute.xlu1 %v5939_v0  ;;  %3716 = vset.pattern.permute.xlu0 %v5939_v0  ;;  %v3678_v3 = vld [vmem:[%s5929_s0 + $0x18] sm:$0xff]   ;;  %v3558_v4 = vunpack.c.l.bf16 %v3677_v1  ;;  %v3559_v5 = vunpack.c.h.bf16 %v3677_v1  ;;  %v3550_v6 = vunpack.c.l.bf16 %v3549_v2  ;;  %v3551_v7 = vunpack.c.h.bf16 %v3549_v2  ;;  %v3676_v8 = vld [vmem:[%s5929_s0 + $0x8] sm:$0xff]   ;;  %v3679_v13 = vld [vmem:[%s5929_s0 + $0x20] sm:$0xff]  }
  0x10   :  { %v3562_v9 = vunpack.c.l.bf16 %v3678_v3  ;;  %v3563_v10 = vunpack.c.h.bf16 %v3678_v3  ;;  %v3554_v11 = vunpack.c.l.bf16 %v3676_v8  ;;  %v3555_v12 = vunpack.c.h.bf16 %v3676_v8  ;;  %v4270_v16 = vld [vmem:[%s5932_s3 + $0x74] ss:$8 sps:$4 sm:$0xff]   ;;  %v4272_v17 = vld [vmem:[%s5932_s3 + $0x70] ss:$8 sps:$4 sm:$0xff]   ;;  %v4273_v22 = vld [vmem:[%s5932_s3 + $0x64] ss:$8 sps:$4 sm:$0xff]  }
  0x11   :  { %v3728_v14 = vpack.i.bf16 %v3559_v5, %v3558_v4  ;;  %v3717_v15 = vpack.i.bf16 %v3551_v7, %v3550_v6  ;;  %v3566_v20 = vunpack.c.l.bf16 %v3679_v13  ;;  %v3567_v21 = vunpack.c.h.bf16 %v3679_v13  ;;  %2237 = vmatprep.subr.bf16.mxu0 %v4270_v16  ;;  %v4275_v23 = vld [vmem:[%s5932_s3 + $0x60] ss:$8 sps:$4 sm:$0xff]   ;;  %v4276_v24 = vld [vmem:[%s5932_s3 + $0x54] ss:$8 sps:$4 sm:$0xff]   ;;  %v4278_v26 = vld [vmem:[%s5932_s3 + $0x50] ss:$8 sps:$4 sm:$0xff]  }
  0x12   :  { %v3733_v18 = vpack.i.bf16 %v3563_v10, %v3562_v9  ;;  %v3722_v19 = vpack.i.bf16 %v3555_v12, %v3554_v11  ;;  %2238 = vmatpush1.bf16.msra.mxu0 %v4272_v17  ;;  %v4279_v27 = vld [vmem:[%s5932_s3 + $0x44] ss:$8 sps:$4 sm:$0xff]   ;;  %v4281_v29 = vld [vmem:[%s5932_s3 + $0x40] ss:$8 sps:$4 sm:$0xff]   ;;  %v4282_v30 = vld [vmem:[%s5932_s3 + $0x34] ss:$8 sps:$4 sm:$0xff]  }
  0x13   :  { %3729 = vperm.xlu1 %3727, %v3728_v14   ;;  %3718 = vperm.xlu0 %3716, %v3717_v15   ;;  %v3738_v25 = vpack.i.bf16 %v3567_v21, %v3566_v20  ;;  %v5937_v31 = vmov 2   ;;  %v4284_v32 = vld [vmem:[%s5932_s3 + $0x30] ss:$8 sps:$4 sm:$0xff]   ;;  %v4285_v33 = vld [vmem:[%s5932_s3 + $0x24] ss:$8 sps:$4 sm:$0xff]  }
  0x14   :  { %2239 = vmatprep.subr.bf16.mxu0 %v4273_v22  ;;  %v3680_v34 = vld [vmem:[%s5929_s0 + $0x28] sm:$0xff]   ;;  %v4288_v38 = vld [vmem:[%s5932_s3 + $0x14] ss:$8 sps:$4 sm:$0xff]   ;;  %v4290_v40 = vld [vmem:[%s5932_s3 + $0x10] ss:$8 sps:$4 sm:$0xff]  }
  0x15   :  { %v4287_v35 = vld [vmem:[%s5932_s3 + $0x20] ss:$8 sps:$4 sm:$0xff]   ;;  %v3570_v36 = vunpack.c.l.bf16 %v3680_v34  ;;  %v3571_v37 = vunpack.c.h.bf16 %v3680_v34  ;;  %v3681_v39 = vld [vmem:[%s5929_s0 + $0x30] sm:$0xff]   ;;  %v4291_v41 = vld [vmem:[%s5932_s3 + $0x4] ss:$8 sps:$4 sm:$0xff]  }
  0x16   :  { %2240 = vmatpush1.bf16.msra.mxu0 %v4275_v23  ;;  %v3574_v43 = vunpack.c.l.bf16 %v3681_v39  ;;  %v3575_v44 = vunpack.c.h.bf16 %v3681_v39  ;;  %v4293_v45 = vld [vmem:[%s5932_s3] ss:$8 sps:$4 sm:$0xff]   ;;  %v4294_v46 = vld [vmem:[%s5932_s3 + $0xf4] ss:$8 sps:$4 sm:$0xff]   ;;  %v4296_v49 = vld [vmem:[%s5932_s3 + $0xf0] ss:$8 sps:$4 sm:$0xff]  }
  0x17   :  { %3734 = vperm.xlu1 %3727, %v3733_v18   ;;  %3723 = vperm.xlu0 %3716, %v3722_v19   ;;  %v3801_v42 = vpack.i.bf16 %v3571_v37, %v3570_v36  ;;  %v3682_v48 = vld [vmem:[%s5929_s0 + $0x38] sm:$0xff]   ;;  %v4297_v50 = vld [vmem:[%s5932_s3 + $0xe4] ss:$8 sps:$4 sm:$0xff]   ;;  %v4299_v57 = vld [vmem:[%s5932_s3 + $0xe0] ss:$8 sps:$4 sm:$0xff]  }
  0x18   :  { %2241 = vmatprep.subr.bf16.mxu0 %v4276_v24  ;;  %v3818_v47 = vpack.i.bf16 %v3575_v44, %v3574_v43  ;;  %v3578_v51 = vunpack.c.l.bf16 %v3682_v48  ;;  %v3579_v52 = vunpack.c.h.bf16 %v3682_v48  ;;  %v3683_v53 = vld [vmem:[%s5929_s0 + $0x40] sm:$0xff]   ;;  %v3684_v58 = vld [vmem:[%s5929_s0 + $0x48] sm:$0xff]   ;;  %v4300_v59 = vld [vmem:[%s5932_s3 + $0xd4] ss:$8 sps:$4 sm:$0xff]  }
  0x19   :  { %v3582_v55 = vunpack.c.l.bf16 %v3683_v53  ;;  %v3583_v56 = vunpack.c.h.bf16 %v3683_v53  ;;  %v3586_v61 = vunpack.c.l.bf16 %v3684_v58  ;;  %v3587_v62 = vunpack.c.h.bf16 %v3684_v58  ;;  %v4302_v63 = vld [vmem:[%s5932_s3 + $0xd0] ss:$8 sps:$4 sm:$0xff]   ;;  %v4303_v3 = vld [vmem:[%s5932_s3 + $0xc4] ss:$8 sps:$4 sm:$0xff]   ;;  %v4305_v10 = vld [vmem:[%s5932_s3 + $0xc0] ss:$8 sps:$4 sm:$0xff]  }
  0x1a   :  { %2242 = vmatpush1.bf16.msra.mxu0 %v4278_v26  ;;  %v4558_v54 = vpack.i.bf16 %v3579_v52, %v3578_v51  ;;  %v3694_v1 = vld [vmem:[%s5929_s0 + $0x98] sm:$0xff]   ;;  %v3685_v2 = vld [vmem:[%s5929_s0 + $0x50] sm:$0xff]   ;;  %v4309_v17 = vld [vmem:[%s5932_s3 + $0xa4] ss:$8 sps:$4 sm:$0xff]  }
  0x1b   :  { %3743 = vset.pattern.permute.xlu1 %v4415_v28  ;;  %3739 = vperm.xlu0 %3716, %v3738_v25   ;;  %v4571_v60 = vpack.i.bf16 %v3583_v56, %v3582_v55  ;;  %v3626_v4 = vunpack.c.l.bf16 %v3694_v1  ;;  %v3627_v5 = vunpack.c.h.bf16 %v3694_v1  ;;  %v4588_v6 = vpack.i.bf16 %v3587_v62, %v3586_v61  ;;  %v3686_v11 = vld [vmem:[%s5929_s0 + $0x58] sm:$0xff]   ;;  %v3695_v21 = vld [vmem:[%s5929_s0 + $0xa0] sm:$0xff]   ;;  %v3692_v61 = vld [vmem:[%s5929_s0 + $0x88] sm:$0xff]  }
  0x1c   :  { %3745 = vperm.xlu1 %3743, %v3717_v15   ;;  %2243 = vmatprep.subr.bf16.mxu0 %v4279_v27  ;;  %v3590_v8 = vunpack.c.l.bf16 %v3685_v2  ;;  %v3591_v9 = vunpack.c.h.bf16 %v3685_v2  ;;  %v4306_v12 = vld [vmem:[%s5932_s3 + $0xb4] ss:$8 sps:$4 sm:$0xff]   ;;  %v4308_v16 = vld [vmem:[%s5932_s3 + $0xb0] ss:$8 sps:$4 sm:$0xff]   ;;  %v3630_v22 = vunpack.c.l.bf16 %v3695_v21  ;;  %v3631_v23 = vunpack.c.h.bf16 %v3695_v21  ;;  %v3687_v24 = vld [vmem:[%s5929_s0 + $0x60] sm:$0xff]  }
  0x1d   :  { %v4590_v7 = vpack.i.bf16 %v3627_v5, %v3626_v4  ;;  %v4312_v20 = vld [vmem:[%s5932_s3 + $0x94] ss:$8 sps:$4 sm:$0xff]   ;;  %v4315_v27 = vld [vmem:[%s5932_s3 + $0x84] ss:$8 sps:$4 sm:$0xff]   ;;  %v4317_v34 = vld [vmem:[%s5932_s3 + $0x80] ss:$8 sps:$4 sm:$0xff]   ;;  %v3619_v1 = vunpack.c.h.bf16 %v3692_v61 }
  0x1e   :  { %2244 = vmatpush1.bf16.msra.mxu0 %v4281_v29  ;;  %v4603_v13 = vpack.i.bf16 %v3591_v9, %v3590_v8  ;;  %v4634_v26 = vpack.i.bf16 %v3631_v23, %v3630_v22  ;;  %v3598_v29 = vunpack.c.l.bf16 %v3687_v24  ;;  %v3698_v58 = vld [vmem:[%s5929_s0 + $0xb8] sm:$0xff]   ;;  %v3693_v2 = vld [vmem:[%s5929_s0 + $0x90] sm:$0xff]   ;;  %v1168_v21 = vld [vmem:[%s5930_s1] sm:$0xa] }
  0x1f   :  { %3749 = vset.pattern.permute.xlu0 %v5937_v31  ;;  %2245 = vmatprep.subr.bf16.mxu0 %v4282_v30  ;;  %v3599_v30 = vunpack.c.h.bf16 %v3687_v24  ;;  %v3622_v4 = vunpack.c.l.bf16 %v3693_v2  ;;  %v3623_v5 = vunpack.c.h.bf16 %v3693_v2 }
  0x20   :  { %3756 = vperm.xlu1 %3743, %v3722_v19   ;;  %3751 = vperm.xlu0 %3749, %v3717_v15   ;;  %v3595_v15 = vunpack.c.h.bf16 %v3686_v11 }
  0x22   :  { %2246 = vmatpush1.bf16.msra.mxu0 %v4284_v32  ;;  %v3688_v32 = vld [vmem:[%s5929_s0 + $0x68] sm:$0xff]  }
  0x23   :  { %2247 = vmatprep.subr.bf16.mxu0 %v4285_v33  ;;  %v4645_v33 = vpack.i.bf16 %v3599_v30, %v3598_v29  ;;  %v3602_v36 = vunpack.c.l.bf16 %v3688_v32  ;;  %v3603_v37 = vunpack.c.h.bf16 %v3688_v32  ;;  %v1169_v30 = vunpack.c.l.bf16 %v1168_v21 }
  0x24   :  { %3760 = vset.pattern.permute.xlu1 %v5937_v31  ;;  %3766 = vset.pattern.permute.xlu0 %v4415_v28 }
  0x25   :  { %3762 = vperm.xlu1 %3760, %v3722_v19   ;;  %3768 = vperm.xlu0 %3766, %v3728_v14   ;;  %v4311_v19 = vld [vmem:[%s5932_s3 + $0xa0] ss:$8 sps:$4 sm:$0xff]  }
  0x26   :  { %2248 = vmatpush1.bf16.msra.mxu0 %v4287_v35  ;;  %v3696_v35 = vld [vmem:[%s5929_s0 + $0xa8] sm:$0xff]  }
  0x27   :  { %2249 = vmatprep.subr.bf16.mxu0 %v4288_v38  ;;  %v3634_v38 = vunpack.c.l.bf16 %v3696_v35  ;;  %v3635_v39 = vunpack.c.h.bf16 %v3696_v35 }
  0x29   :  { %3773 = vperm.xlu1 %3760, %v3728_v14   ;;  %3783 = vset.pattern.permute.xlu0 %v5937_v31  ;;  %v3594_v14 = vunpack.c.l.bf16 %v3686_v11  ;;  %v4719_v11 = vpack.i.bf16 %v3623_v5, %v3622_v4 }
  0x2a   :  { %3785 = vperm.xlu0 %3783, %v3733_v18   ;;  %2250 = vmatpush1.bf16.msra.mxu0 %v4290_v40  ;;  %v3689_v40 = vld [vmem:[%s5929_s0 + $0x70] sm:$0xff]  }
  0x2b   :  { %2251 = vmatprep.subr.bf16.mxu0 %v4291_v41  ;;  %v4658_v41 = vpack.i.bf16 %v3635_v39, %v3634_v38  ;;  %v3606_v43 = vunpack.c.l.bf16 %v3689_v40  ;;  %v3607_v44 = vunpack.c.h.bf16 %v3689_v40 }
  0x2d   :  { %3777 = vset.pattern.permute.xlu1 %v4415_v28 }
  0x2e   :  { %3779 = vperm.xlu1 %3777, %v3733_v18   ;;  %3800 = vset.pattern.permute.xlu0 %v5939_v0  ;;  %v4614_v18 = vpack.i.bf16 %v3595_v15, %v3594_v14  ;;  %v492_v15 = vlaneseq }
  0x2f   :  { %3802 = vperm.xlu0 %3800, %v3801_v42   ;;  %2252 = vmatpush1.bf16.msra.mxu0 %v4293_v45  ;;  %v3690_v45 = vld [vmem:[%s5929_s0 + $0x78] sm:$0xff]  }
  0x30   :  { %2253 = vmatprep.subr.bf16.mxu0 %v4294_v46  ;;  %v4670_v46 = vpack.i.bf16 %v3607_v44, %v3606_v43  ;;  %v3611_v48 = vunpack.c.h.bf16 %v3690_v45 }
  0x32   :  { %3790 = vperm.xlu1 %3777, %v3738_v25  }
  0x33   :  { %3819 = vperm.xlu0 %3800, %v3818_v47   ;;  %2254 = vmatpush2.bf16.msra.mxu0 %v4296_v49  ;;  %v3691_v49 = vld [vmem:[%s5929_s0 + $0x80] sm:$0xff]  }
  0x34   :  { %2255 = vmatprep.subr.bf16.mxu0 %v4297_v50  ;;  %v3697_v50 = vld [vmem:[%s5929_s0 + $0xb0] sm:$0xff]   ;;  %v3615_v55 = vunpack.c.h.bf16 %v3691_v49 }
  0x35   :  { %v3638_v51 = vunpack.c.l.bf16 %v3697_v50  ;;  %v3639_v52 = vunpack.c.h.bf16 %v3697_v50 }
  0x36   :  { %3794 = vset.pattern.permute.xlu1 %v5937_v31 }
  0x37   :  { %3796 = vperm.xlu1 %3794, %v3738_v25   ;;  %3829 = vset.pattern.permute.xlu0 %v5937_v31  ;;  %v4314_v25 = vld [vmem:[%s5932_s3 + $0x90] ss:$8 sps:$4 sm:$0xff]   ;;  %v4683_v56 = vpack.i.bf16 %v3639_v52, %v3638_v51 }
  0x38   :  { %3831 = vperm.xlu0 %3829, %v3818_v47   ;;  %2256 = vmatpush2.bf16.msra.mxu0 %v4299_v57 }
  0x39   :  { %2257 = vmatprep.subr.bf16.mxu0 %v4300_v59  ;;  %v3642_v59 = vunpack.c.l.bf16 %v3698_v58 }
  0x3b   :  { %3806 = vset.pattern.permute.xlu1 %v4415_v28 }
  0x3c   :  { %3808 = vperm.xlu1 %3806, %v3801_v42   ;;  %3848 = vperm.xlu0 %3829, %v4558_v54  }
  0x3d   :  { %2258 = vmatpush2.bf16.msra.mxu0 %v4302_v63  ;;  %v3618_v63 = vunpack.c.l.bf16 %v3692_v61 }
  0x3e   :  { %2259 = vmatprep.subr.bf16.mxu0 %v4303_v3 }
  0x3f   :  { %v4709_v3 = vpack.i.bf16 %v3619_v1, %v3618_v63 }
  0x40   :  { %3812 = vset.pattern.permute.xlu1 %v5937_v31  ;;  %3858 = vset.pattern.permute.xlu0 %v4415_v28 }
  0x41   :  { %3814 = vperm.xlu1 %3812, %v3801_v42   ;;  %3860 = vperm.xlu0 %3858, %v4571_v60   ;;  %v4661_v42 = vpack.i.bf16 %v3603_v37, %v3602_v36 }
  0x42   :  { %2260 = vmatpush2.bf16.msra.mxu0 %v4305_v10 }
  0x43   :  { %2261 = vmatprep.subr.bf16.mxu0 %v4306_v12  ;;  %v3700_v12 = vld [vmem:[%s5929_s0 + $0xc8] sm:$0xff]  }
  0x44   :  { %v3651_v14 = vunpack.c.h.bf16 %v3700_v12 }
  0x45   :  { %3823 = vset.pattern.permute.xlu1 %v4415_v28  ;;  %3877 = vperm.xlu0 %3858, %v4588_v6  }
  0x46   :  { %3825 = vperm.xlu1 %3823, %v3818_v47   ;;  %2262 = vmatpush2.bf16.msra.mxu0 %v4308_v16  ;;  %v3610_v47 = vunpack.c.l.bf16 %v3690_v45  ;;  %v1701_v45 = vld [vmem:[%s5931_s2] sm:$0x3] }
  0x47   :  { %2263 = vmatprep.subr.bf16.mxu0 %v4309_v17  ;;  %v493_v17 = vshrl.u32 %v492_v15, 7 }
  0x48   :  { %v4681_v53 = vpack.i.bf16 %v3611_v48, %v3610_v47  ;;  %v3702_v47 = vld [vmem:[%s5929_s0 + $0xd8] sm:$0xff]  }
  0x49   :  { %3887 = vset.pattern.permute.xlu0 %v5939_v0  ;;  %v498_v23 = vsub.s32 4, %v493_v17  ;;  %v4748_v24 = vsub.s32 1, %v493_v17  ;;  %v1429_v32 = vsub.s32 2, %v493_v17  ;;  %v3659_v50 = vunpack.c.h.bf16 %v3702_v47 }
  0x4a   :  { %3835 = vset.pattern.permute.xlu1 %v5939_v0  ;;  %3889 = vperm.xlu0 %3887, %v4603_v13  }
  0x4b   :  { %3837 = vperm.xlu1 %3835, %v4558_v54   ;;  %2264 = vmatpush2.bf16.msra.mxu0 %v4311_v19  ;;  %v3701_v19 = vld [vmem:[%s5929_s0 + $0xd0] sm:$0xff]   ;;  %5946 = vst [vmem:[#allocation9_spill] sm:$0xff] %v4748_v24  ;;  %v1430_v39 = vrot.slane %v1169_v30, %v1429_v32 }
  0x4c   :  { %2265 = vmatprep.subr.bf16.mxu0 %v4312_v20  ;;  %v4743_v20 = vsub.s32 0, %v493_v17  ;;  %v3655_v29 = vunpack.c.h.bf16 %v3701_v19 }
  0x4d   :  { %v4779_v51 = vrot.slane %v1430_v39, %v1429_v32 }
  0x4e   :  { %3906 = vperm.xlu0 %3887, %v4614_v18   ;;  %5945 = vst [vmem:[#allocation8_spill] sm:$0xff] %v4743_v20 }
  0x4f   :  { %3841 = vset.pattern.permute.xlu1 %v4415_v28  ;;  %2266 = vmatpush2.bf16.msra.mxu0 %v4314_v25  ;;  %v900_v25 = vsub.s32 5, %v493_v17 }
  0x50   :  { %3843 = vperm.xlu1 %3841, %v4558_v54   ;;  %2267 = vmatprep.subr.bf16.mxu0 %v4315_v27  ;;  %v3614_v54 = vunpack.c.l.bf16 %v3691_v49  ;;  %v3654_v27 = vunpack.c.l.bf16 %v3701_v19  ;;  %v3658_v49 = vunpack.c.l.bf16 %v3702_v47 }
  0x52   :  { %3916 = vset.pattern.permute.xlu0 %v5937_v31  ;;  %v4689_v57 = vpack.i.bf16 %v3615_v55, %v3614_v54 }
  0x53   :  { %3918 = vperm.xlu0 %3916, %v4614_v18   ;;  %2268 = vmatpush2.bf16.msra.mxu0 %v4317_v34  ;;  %v4752_v34 = vpack.i.bf16 %v3655_v29, %v3654_v27 }
  0x54   :  { %3852 = vset.pattern.permute.xlu1 %v5939_v0 }
  0x55   :  { %3854 = vperm.xlu1 %3852, %v4571_v60  }
  0x57   :  { %3935 = vperm.xlu0 %3916, %v4645_v33  }
  0x59   :  { %3864 = vset.pattern.permute.xlu1 %v5937_v31 }
  0x5a   :  { %3866 = vperm.xlu1 %3864, %v4571_v60   ;;  %v3643_v60 = vunpack.c.h.bf16 %v3698_v58  ;;  %v4785_v58 = vrot.slane %v1701_v45, %v4743_v20 }
  0x5b   :  { %3945 = vset.pattern.permute.xlu0 %v4415_v28 }
  0x5c   :  { %3947 = vperm.xlu0 %3945, %v4661_v42   ;;  %v4700_v62 = vpack.i.bf16 %v3643_v60, %v3642_v59  ;;  %v4788_v59 = vrot.slane %v1701_v45, %v4748_v24  ;;  %v4790_v60 = vpack.i.bf16 %v3659_v50, %v3658_v49 }
  0x5e   :  { %3870 = vset.pattern.permute.xlu1 %v5939_v0 }
  0x5f   :  { %3872 = vperm.xlu1 %3870, %v4588_v6  }
  0x60   :  { %3964 = vperm.xlu0 %3945, %v4670_v46  }
  0x63   :  { %3881 = vset.pattern.permute.xlu1 %v5937_v31 }
  0x64   :  { %3883 = vperm.xlu1 %3881, %v4588_v6   ;;  %3974 = vset.pattern.permute.xlu0 %v5939_v0  ;;  %v3699_v6 = vld [vmem:[%s5929_s0 + $0xc0] sm:$0xff]  }
  0x65   :  { %3976 = vperm.xlu0 %3974, %v4681_v53   ;;  %v3646_v8 = vunpack.c.l.bf16 %v3699_v6  ;;  %v3647_v9 = vunpack.c.h.bf16 %v3699_v6 }
  0x67   :  { %v4716_v10 = vpack.i.bf16 %v3647_v9, %v3646_v8 }
  0x68   :  { %3893 = vset.pattern.permute.xlu1 %v4415_v28 }
  0x69   :  { %3895 = vperm.xlu1 %3893, %v4603_v13   ;;  %3993 = vperm.xlu0 %3974, %v4689_v57  }
  0x6d   :  { %3899 = vset.pattern.permute.xlu1 %v5937_v31  ;;  %4003 = vset.pattern.permute.xlu0 %v5937_v31 }
  0x6e   :  { %3901 = vperm.xlu1 %3899, %v4603_v13   ;;  %4005 = vperm.xlu0 %4003, %v4689_v57   ;;  %v3650_v13 = vunpack.c.l.bf16 %v3700_v12 }
  0x70   :  { %v4729_v16 = vpack.i.bf16 %v3651_v14, %v3650_v13 }
  0x72   :  { %3910 = vset.pattern.permute.xlu1 %v4415_v28  ;;  %4022 = vperm.xlu0 %4003, %v4709_v3  }
  0x73   :  { %3912 = vperm.xlu1 %3910, %v4614_v18   ;;  %v169_v18 = vld [vmem:[%s5930_s1] sm:$0x5] }
  0x74   :  { %v170_v22 = vunpack.c.l.bf16 %v169_v18 }
  0x76   :  { %4032 = vset.pattern.permute.xlu0 %v4415_v28  ;;  %v495_v35 = vrot.slane %v170_v22, %v4743_v20  ;;  %v499_v36 = vrot.slane %v170_v22, %v498_v23  ;;  %v897_v37 = vrot.slane %v170_v22, %v4748_v24  ;;  %v901_v38 = vrot.slane %v170_v22, %v900_v25  ;;  %v3703_v25 = vld [vmem:[%s5929_s0 + $0xe0] sm:$0xff]  }
  0x77   :  { %3922 = vset.pattern.permute.xlu1 %v5939_v0  ;;  %4034 = vperm.xlu0 %4032, %v4719_v11   ;;  %v3663_v39 = vunpack.c.h.bf16 %v3703_v25 }
  0x78   :  { %3924 = vperm.xlu1 %3922, %v4645_v33   ;;  %v4761_v43 = vrot.slane %v495_v35, %v4743_v20  ;;  %v4764_v44 = vrot.slane %v499_v36, %v4743_v20  ;;  %v4777_v48 = vrot.slane %v901_v38, %v4748_v24  ;;  %v3662_v38 = vunpack.c.l.bf16 %v3703_v25 }
  0x7b   :  { %4051 = vperm.xlu0 %4032, %v4590_v7  }
  0x7c   :  { %3928 = vset.pattern.permute.xlu1 %v4415_v28 }
  0x7d   :  { %3930 = vperm.xlu1 %3928, %v4645_v33   ;;  %v1433_v33 = vsub.s32 6, %v493_v17 }
  0x7f   :  { %4061 = vset.pattern.permute.xlu0 %v5939_v0  ;;  %v1434_v40 = vrot.slane %v1169_v30, %v1433_v33 }
  0x80   :  { %4063 = vperm.xlu0 %4061, %v4634_v26  }
  0x81   :  { %3939 = vset.pattern.permute.xlu1 %v5939_v0  ;;  %v4781_v52 = vrot.slane %v1434_v40, %v1429_v32 }
  0x82   :  { %3941 = vperm.xlu1 %3939, %v4661_v42  }
  0x84   :  { %4080 = vperm.xlu0 %4061, %v4658_v41  }
  0x86   :  { %3951 = vset.pattern.permute.xlu1 %v5937_v31 }
  0x87   :  { %3953 = vperm.xlu1 %3951, %v4661_v42   ;;  %v4767_v42 = vrot.slane %v897_v37, %v4748_v24 }
  0x88   :  { %4090 = vset.pattern.permute.xlu0 %v5937_v31 }
  0x89   :  { %4092 = vperm.xlu0 %4090, %v4658_v41  }
  0x8b   :  { %3957 = vset.pattern.permute.xlu1 %v5939_v0 }
  0x8c   :  { %3959 = vperm.xlu1 %3957, %v4670_v46  }
  0x8d   :  { %4109 = vperm.xlu0 %4090, %v4683_v56  }
  0x8e   :  { %v3730_v54 = vpop.permute.xlu1 %3729  ;;  %v3719_v55 = vpop.permute.xlu0 %3718 }
  0x8f   :  { %v3732_v61 = vunpack.i.h.bf16 %v3730_v54  ;;  %v3731_v63 = vunpack.i.l.bf16 %v3730_v54  ;;  %v3721_v1 = vunpack.i.h.bf16 %v3719_v55  ;;  %v3720_v2 = vunpack.i.l.bf16 %v3719_v55 }
  0x90   :  { %3968 = vset.pattern.permute.xlu1 %v5937_v31 }
  0x91   :  { %3970 = vperm.xlu1 %3968, %v4670_v46   ;;  %v4795_v4 = vmul.f32 %v3732_v61, %v4761_v43  ;;  %v4798_v5 = vmul.f32 %v3732_v61, %v4764_v44  ;;  %4119 = vset.pattern.permute.xlu0 %v4415_v28  ;;  %v4802_v9 = vmul.f32 %v3731_v63, %v4761_v43 }
  0x92   :  { %v3735_v6 = vpop.permute.xlu1 %3734  ;;  %v3724_v8 = vpop.permute.xlu0 %3723  ;;  %4121 = vperm.xlu0 %4119, %v4700_v62   ;;  %v4806_v46 = vmul.f32 %v3731_v63, %v4764_v44  ;;  %v512_v15 = vmul.f32 %v3721_v1, %v4761_v43  ;;  %v513_v17 = vmul.f32 %v3721_v1, %v4764_v44  ;;  %v510_v19 = vmul.f32 %v3720_v2, %v4761_v43 }
  0x93   :  { %v3737_v12 = vunpack.i.h.bf16 %v3735_v6  ;;  %v3736_v13 = vunpack.i.l.bf16 %v3735_v6  ;;  %v3726_v14 = vunpack.i.h.bf16 %v3724_v8  ;;  %v3725_v18 = vunpack.i.l.bf16 %v3724_v8 }
  0x94   :  { %v511_v21 = vmul.f32 %v3720_v2, %v4764_v44 }
  0x95   :  { %v4813_v22 = vmul.f32 %v3737_v12, %v4761_v43  ;;  %v4816_v23 = vmul.f32 %v3737_v12, %v4764_v44  ;;  %3980 = vset.pattern.permute.xlu1 %v4415_v28  ;;  %v4823_v27 = vmul.f32 %v3736_v13, %v4761_v43  ;;  %v4826_v29 = vmul.f32 %v3736_v13, %v4764_v44 }
  0x96   :  { %v516_v30 = vmul.f32 %v3726_v14, %v4761_v43  ;;  %v517_v32 = vmul.f32 %v3726_v14, %v4764_v44  ;;  %3982 = vperm.xlu1 %3980, %v4681_v53   ;;  %v3740_v33 = vpop.permute.xlu0 %3739  ;;  %4138 = vperm.xlu0 %4119, %v4716_v10   ;;  %v514_v40 = vmul.f32 %v3725_v18, %v4761_v43 }
  0x97   :  { %v3746_v35 = vpop.permute.xlu1 %3745  ;;  %v3742_v36 = vunpack.i.h.bf16 %v3740_v33  ;;  %v3741_v37 = vunpack.i.l.bf16 %v3740_v33  ;;  %v515_v45 = vmul.f32 %v3725_v18, %v4764_v44  ;;  %v4853_v13 = vpack.i.bf16 %v3663_v39, %v3662_v38 }
  0x98   :  { %v3748_v47 = vunpack.i.h.bf16 %v3746_v35  ;;  %v3747_v49 = vunpack.i.l.bf16 %v3746_v35 }
  0x99   :  { %v4835_v50 = vmul.f32 %v3742_v36, %v4761_v43  ;;  %v4838_v54 = vmul.f32 %v3742_v36, %v4764_v44  ;;  %v4841_v55 = vmul.f32 %v3741_v37, %v4761_v43  ;;  %v4844_v61 = vmul.f32 %v3741_v37, %v4764_v44 }
  0x9a   :  { %v914_v63 = vmul.f32 %v3748_v47, %v4767_v42  ;;  %v915_v1 = vmul.f32 %v3748_v47, %v4777_v48  ;;  %v912_v2 = vmul.f32 %v3747_v49, %v4767_v42  ;;  %v913_v6 = vmul.f32 %v3747_v49, %v4777_v48  ;;  %3986 = vset.pattern.permute.xlu1 %v5937_v31 }
  0x9b   :  { %3988 = vperm.xlu1 %3986, %v4681_v53   ;;  %v3757_v8 = vpop.permute.xlu1 %3756  ;;  %v3752_v12 = vpop.permute.xlu0 %3751  ;;  %4148 = vset.pattern.permute.xlu0 %v5939_v0 }
  0x9c   :  { %v1040_v14 = vadd.f32 %v912_v2, %v510_v19  ;;  %v1042_v18 = vadd.f32 %v914_v63, %v512_v15  ;;  %v3759_v25 = vunpack.i.h.bf16 %v3757_v8  ;;  %v3758_v33 = vunpack.i.l.bf16 %v3757_v8  ;;  %4150 = vperm.xlu0 %4148, %v4729_v16  }
  0x9d   :  { %v3754_v35 = vunpack.i.h.bf16 %v3752_v12  ;;  %v3753_v36 = vunpack.i.l.bf16 %v3752_v12  ;;  %v1041_v37 = vadd.f32 %v913_v6, %v511_v21  ;;  %v1043_v47 = vadd.f32 %v915_v1, %v513_v17 }
  0x9e   :  { %v918_v49 = vmul.f32 %v3759_v25, %v4767_v42  ;;  %v919_v53 = vmul.f32 %v3759_v25, %v4777_v48  ;;  %v916_v31 = vmul.f32 %v3758_v33, %v4767_v42  ;;  %v917_v0 = vmul.f32 %v3758_v33, %v4777_v48 }
  0x9f   :  { %v1447_v38 = vmul.f32 %v3754_v35, %v4779_v51  ;;  %v1448_v15 = vmul.f32 %v3754_v35, %v4781_v52  ;;  %v1445_v19 = vmul.f32 %v3753_v36, %v4779_v51  ;;  %v1446_v39 = vmul.f32 %v3753_v36, %v4781_v52  ;;  %3997 = vset.pattern.permute.xlu1 %v4415_v28 }
  0xa0   :  { %v1044_v21 = vadd.f32 %v916_v31, %v514_v40  ;;  %v1045_v17 = vadd.f32 %v917_v0, %v515_v45  ;;  %v1046_v63 = vadd.f32 %v918_v49, %v516_v30  ;;  %v1047_v1 = vadd.f32 %v919_v53, %v517_v32  ;;  %3999 = vperm.xlu1 %3997, %v4689_v57   ;;  %v3763_v2 = vpop.permute.xlu1 %3762  ;;  %v3769_v6 = vpop.permute.xlu0 %3768  ;;  %v4870_v0 = vld [vmem:[%s5929_s0 + $0xe8] sm:$0xff]  }
  0xa1   :  { %v1573_v8 = vadd.f32 %v1445_v19, %v1040_v14  ;;  %v1575_v12 = vadd.f32 %v1447_v38, %v1042_v18  ;;  %v3765_v25 = vunpack.i.h.bf16 %v3763_v2  ;;  %v3764_v33 = vunpack.i.l.bf16 %v3763_v2  ;;  %4167 = vperm.xlu0 %4148, %v4752_v34  }
  0xa2   :  { %v3771_v35 = vunpack.i.h.bf16 %v3769_v6  ;;  %v3770_v24 = vunpack.i.l.bf16 %v3769_v6  ;;  %v1574_v20 = vadd.f32 %v1446_v39, %v1041_v37  ;;  %v1576_v36 = vadd.f32 %v1448_v15, %v1043_v47 }
  0xa3   :  { %v1451_v31 = vmul.f32 %v3765_v25, %v4779_v51  ;;  %v1452_v57 = vmul.f32 %v3765_v25, %v4781_v52  ;;  %v1449_v30 = vmul.f32 %v3764_v33, %v4779_v51  ;;  %v1450_v32 = vmul.f32 %v3764_v33, %v4781_v52 }
  0xa4   :  { %v922_v40 = vmul.f32 %v3771_v35, %v4767_v42  ;;  %v923_v45 = vmul.f32 %v3771_v35, %v4777_v48  ;;  %v920_v14 = vmul.f32 %v3770_v24, %v4767_v42  ;;  %v921_v18 = vmul.f32 %v3770_v24, %v4777_v48  ;;  %v3774_v47 = vpop.permute.xlu1 %3773 }
  0xa5   :  { %v5947_v37 = vmov 0   ;;  %v4881_v49 = vadd.f32 %v1449_v30, %v1044_v21  ;;  %v4883_v53 = vadd.f32 %v1450_v32, %v1045_v17  ;;  %v4885_v38 = vadd.f32 %v1451_v31, %v1046_v63  ;;  %v3786_v15 = vpop.permute.xlu0 %3785 }
  0xa6   :  { %4009 = vset.pattern.permute.xlu1 %v5947_v37  ;;  %v3666_v19 = vunpack.c.l.bf16 %v4870_v0  ;;  %v1580_v39 = vadd.f32 %v1452_v57, %v1047_v1  ;;  %v1050_v2 = vadd.f32 %v922_v40, %v4795_v4  ;;  %v1051_v6 = vadd.f32 %v923_v45, %v4798_v5 }
  0xa7   :  { %4011 = vperm.xlu1 %4009, %v4709_v3   ;;  %v1048_v24 = vadd.f32 %v920_v14, %v4802_v9  ;;  %v5948_v25 = vmov 2   ;;  %v3776_v21 = vunpack.i.h.bf16 %v3774_v47  ;;  %v3775_v33 = vunpack.i.l.bf16 %v3774_v47 }
  0xa8   :  { %4177 = vset.pattern.permute.xlu0 %v5948_v25  ;;  %v1714_v17 = vadd.f32 %v4788_v59, %v1574_v20  ;;  %v1716_v63 = vadd.f32 %v4788_v59, %v1576_v36  ;;  %v1049_v35 = vadd.f32 %v921_v18, %v4806_v46  ;;  %v1713_v1 = vadd.f32 %v4785_v58, %v1573_v8 }
  0xa9   :  { %4179 = vperm.xlu0 %4177, %v4752_v34   ;;  %v1715_v4 = vadd.f32 %v4785_v58, %v1575_v12  ;;  %v3788_v31 = vunpack.i.h.bf16 %v3786_v15  ;;  %v1455_v5 = vmul.f32 %v3776_v21, %v4779_v51  ;;  %v1453_v9 = vmul.f32 %v3775_v33, %v4779_v51  ;;  %v3780_v20 = vpop.permute.xlu1 %3779 }
  0xaa   :  { %v1454_v57 = vmul.f32 %v3775_v33, %v4781_v52  ;;  %v3787_v30 = vunpack.i.l.bf16 %v3786_v15  ;;  %v1842_v36 = vmax.f32 %v1714_v17, 0.0  ;;  %v1844_v32 = vmax.f32 %v1716_v63, 0.0 }
  0xab   :  { %4015 = vset.pattern.permute.xlu1 %v4415_v28  ;;  %v3782_v40 = vunpack.i.h.bf16 %v3780_v20  ;;  %v3781_v45 = vunpack.i.l.bf16 %v3780_v20  ;;  %v1456_v46 = vmul.f32 %v3776_v21, %v4781_v52  ;;  %v4905_v8 = vadd.f32 %v1453_v9, %v1048_v24 }
  0xac   :  { %4017 = vperm.xlu1 %4015, %v4709_v3   ;;  %v1582_v12 = vadd.f32 %v1454_v57, %v1049_v35  ;;  %v4907_v14 = vadd.f32 %v1455_v5, %v1050_v2  ;;  %v1970_v18 = vpack.c.bf16 %v1844_v32, %v1842_v36  ;;  %v1841_v63 = vmax.f32 %v1713_v1, 0.0 }
  0xad   :  { %4196 = vperm.xlu0 %4177, %v4790_v60   ;;  %v926_v47 = vmul.f32 %v3782_v40, %v4767_v42  ;;  %v927_v15 = vmul.f32 %v3782_v40, %v4777_v48  ;;  %v924_v33 = vmul.f32 %v3781_v45, %v4767_v42  ;;  %v925_v17 = vmul.f32 %v3781_v45, %v4777_v48  ;;  %v3791_v24 = vpop.permute.xlu1 %3790 }
  0xae   :  { %v1843_v3 = vmax.f32 %v1715_v4, 0.0  ;;  %v1459_v21 = vmul.f32 %v3788_v31, %v4779_v51  ;;  %2269 = vmatprep.mubr.bf16.mxu0 %v1970_v18  ;;  %v1460_v9 = vmul.f32 %v3788_v31, %v4781_v52  ;;  %v1584_v57 = vadd.f32 %v1456_v46, %v1051_v6 }
  0xaf   :  { %v1054_v2 = vadd.f32 %v926_v47, %v4813_v22  ;;  %v1055_v35 = vadd.f32 %v927_v15, %v4816_v23  ;;  %v1052_v5 = vadd.f32 %v924_v33, %v4823_v27  ;;  %v1053_v20 = vadd.f32 %v925_v17, %v4826_v29 }
  0xb0   :  { %v1969_v36 = vpack.c.bf16 %v1843_v3, %v1841_v63  ;;  %v1457_v32 = vmul.f32 %v3787_v30, %v4779_v51  ;;  %4026 = vset.pattern.permute.xlu1 %v5947_v37  ;;  %v1458_v4 = vmul.f32 %v3787_v30, %v4781_v52  ;;  %v3793_v40 = vunpack.i.h.bf16 %v3791_v24 }
  0xb1   :  { %v4922_v1 = vadd.f32 %v1459_v21, %v1054_v2  ;;  %v3792_v22 = vunpack.i.l.bf16 %v3791_v24  ;;  %4028 = vperm.xlu1 %4026, %v4719_v11   ;;  %4206 = vset.pattern.permute.xlu0 %v4415_v28  ;;  %v4927_v23 = vadd.f32 %v1460_v9, %v1055_v35  ;;  %v1718_v29 = vadd.f32 %v4788_v59, %v4883_v53 }
  0xb2   :  { %2270 = vmatmul.mubr.bf16.vlgmr.msra.gmra.mxu0 %v1969_v36  ;;  %v4929_v27 = vadd.f32 %v1457_v32, %v1052_v5  ;;  %v1720_v6 = vadd.f32 %v4788_v59, %v1580_v39  ;;  %v930_v31 = vmul.f32 %v3793_v40, %v4767_v42  ;;  %v931_v30 = vmul.f32 %v3793_v40, %v4777_v48  ;;  %v3797_v18 = vpop.permute.xlu1 %3796  ;;  %v3803_v39 = vpop.permute.xlu0 %3802 }
  0xb3   :  { %v928_v45 = vmul.f32 %v3792_v22, %v4767_v42  ;;  %v929_v46 = vmul.f32 %v3792_v22, %v4777_v48  ;;  %4208 = vperm.xlu0 %4206, %v4853_v13   ;;  %v1846_v47 = vmax.f32 %v1718_v29, 0.0  ;;  %v1717_v33 = vadd.f32 %v4785_v58, %v4881_v49 }
  0xb4   :  { %v1848_v15 = vmax.f32 %v1720_v6, 0.0  ;;  %v1719_v53 = vadd.f32 %v4785_v58, %v4885_v38  ;;  %v1586_v17 = vadd.f32 %v1458_v4, %v1053_v20  ;;  %v1058_v21 = vadd.f32 %v930_v31, %v4835_v50 }
  0xb5   :  { %v1056_v63 = vadd.f32 %v928_v45, %v4841_v55  ;;  %v1057_v3 = vadd.f32 %v929_v46, %v4844_v61  ;;  %4038 = vset.pattern.permute.xlu1 %v5948_v25  ;;  %v1845_v2 = vmax.f32 %v1717_v33, 0.0  ;;  %v3799_v5 = vunpack.i.h.bf16 %v3797_v18 }
  0xb6   :  { %v1972_v24 = vpack.c.bf16 %v1848_v15, %v1846_v47  ;;  %v1847_v35 = vmax.f32 %v1719_v53, 0.0  ;;  %4040 = vperm.xlu1 %4038, %v4719_v11   ;;  %v3798_v49 = vunpack.i.l.bf16 %v3797_v18  ;;  %v1722_v9 = vadd.f32 %v4788_v59, %v1582_v12 }
  0xb7   :  { %v1724_v38 = vadd.f32 %v4788_v59, %v1584_v57  ;;  %v3805_v20 = vunpack.i.h.bf16 %v3803_v39  ;;  %v1059_v55 = vadd.f32 %v931_v30, %v4838_v54  ;;  %v1463_v50 = vmul.f32 %v3799_v5, %v4779_v51  ;;  %v3809_v32 = vpop.permute.xlu1 %3808 }
  0xb8   :  { %2279 = vmatprep.mubr.bf16.mxu0 %v1972_v24  ;;  %v1971_v61 = vpack.c.bf16 %v1847_v35, %v1845_v2  ;;  %v1464_v36 = vmul.f32 %v3799_v5, %v4781_v52  ;;  %v1461_v4 = vmul.f32 %v3798_v49, %v4779_v51  ;;  %v1850_v40 = vmax.f32 %v1722_v9, 0.0 }
  0xb9   :  { %v1852_v22 = vmax.f32 %v1724_v38, 0.0  ;;  %v3804_v11 = vunpack.i.l.bf16 %v3803_v39  ;;  %v1462_v12 = vmul.f32 %v3798_v49, %v4781_v52  ;;  %v4955_v29 = vadd.f32 %v1463_v50, %v1058_v21  ;;  %v3820_v49 = vpop.permute.xlu0 %3819 }
  0xba   :  { %2280 = vmatmul.mubr.bf16.gmra.mxu0 %v1971_v61  ;;  %v3811_v57 = vunpack.i.h.bf16 %v3809_v32  ;;  %v3810_v6 = vunpack.i.l.bf16 %v3809_v32  ;;  %4044 = vset.pattern.permute.xlu1 %v5947_v37  ;;  %v4958_v54 = vadd.f32 %v1461_v4, %v1056_v63  ;;  %v1592_v31 = vadd.f32 %v1464_v36, %v1059_v55 }
  0xbb   :  { %v1974_v30 = vpack.c.bf16 %v1852_v22, %v1850_v40  ;;  %v532_v45 = vmul.f32 %v3805_v20, %v4761_v43  ;;  %4046 = vperm.xlu1 %4044, %v4590_v7   ;;  %v533_v33 = vmul.f32 %v3805_v20, %v4764_v44  ;;  %v530_v53 = vmul.f32 %v3804_v11, %v4761_v43 }
  0xbc   :  { %v934_v46 = vmul.f32 %v3811_v57, %v4767_v42  ;;  %v935_v18 = vmul.f32 %v3811_v57, %v4777_v48  ;;  %v932_v47 = vmul.f32 %v3810_v6, %v4767_v42  ;;  %v933_v15 = vmul.f32 %v3810_v6, %v4777_v48  ;;  %v3815_v21 = vpop.permute.xlu1 %3814 }
  0xbd   :  { %2289 = vmatprep.mubr.bf16.mxu0 %v1974_v30  ;;  %v531_v39 = vmul.f32 %v3804_v11, %v4764_v44  ;;  %v1721_v63 = vadd.f32 %v4785_v58, %v4905_v8  ;;  %v1590_v24 = vadd.f32 %v1462_v12, %v1057_v3  ;;  %v1723_v2 = vadd.f32 %v4785_v58, %v4907_v14 }
  0xbe   :  { %v1726_v35 = vadd.f32 %v4788_v59, %v1586_v17  ;;  %v1728_v5 = vadd.f32 %v4788_v59, %v4927_v23  ;;  %v1062_v9 = vadd.f32 %v934_v46, %v532_v45  ;;  %v1063_v38 = vadd.f32 %v935_v18, %v533_v33 }
  0xbf   :  { %v1060_v20 = vadd.f32 %v932_v47, %v530_v53  ;;  %v1849_v55 = vmax.f32 %v1721_v63, 0.0  ;;  %4055 = vset.pattern.permute.xlu1 %v5948_v25  ;;  %v1851_v61 = vmax.f32 %v1723_v2, 0.0  ;;  %v3817_v36 = vunpack.i.h.bf16 %v3815_v21  ;;  %v3832_v47 = vpop.permute.xlu0 %3831 }
  0xc0   :  { %v1854_v50 = vmax.f32 %v1726_v35, 0.0  ;;  %v1856_v8 = vmax.f32 %v1728_v5, 0.0  ;;  %4057 = vperm.xlu1 %4055, %v4590_v7   ;;  %v1061_v3 = vadd.f32 %v933_v15, %v531_v39  ;;  %v3816_v14 = vunpack.i.l.bf16 %v3815_v21 }
  0xc1   :  { %v3822_v32 = vunpack.i.h.bf16 %v3820_v49  ;;  %v3821_v17 = vunpack.i.l.bf16 %v3820_v49  ;;  %v1973_v4 = vpack.c.bf16 %v1851_v61, %v1849_v55  ;;  %v1467_v23 = vmul.f32 %v3817_v36, %v4779_v51  ;;  %v3826_v22 = vpop.permute.xlu1 %3825  ;;  %v4318_v55 = vld [vmem:[#allocation2 + $0x74] ss:$8 sps:$4 sm:$0xff]   ;;  %v4320_v61 = vld [vmem:[#allocation2 + $0x70] ss:$8 sps:$4 sm:$0xff]  }
  0xc2   :  { %v1468_v40 = vmul.f32 %v3817_v36, %v4781_v52  ;;  %v1725_v11 = vadd.f32 %v4785_v58, %v4929_v27  ;;  %v1976_v12 = vpack.c.bf16 %v1856_v8, %v1854_v50  ;;  %v1465_v57 = vmul.f32 %v3816_v14, %v4779_v51  ;;  %2986 = vmatprep.subr.bf16.mxu1 %v4318_v55 }
  0xc3   :  { %v1466_v6 = vmul.f32 %v3816_v14, %v4781_v52  ;;  %v536_v7 = vmul.f32 %v3822_v32, %v4761_v43  ;;  %2290 = vmatmul.mubr.bf16.gmra.mxu0 %v1973_v4  ;;  %v4985_v30 = vadd.f32 %v1467_v23, %v1062_v9  ;;  %v537_v46 = vmul.f32 %v3822_v32, %v4764_v44 }
  0xc4   :  { %v4987_v45 = vadd.f32 %v1468_v40, %v1063_v38  ;;  %v534_v18 = vmul.f32 %v3821_v17, %v4761_v43  ;;  %2299 = vmatprep.mubr.bf16.mxu0 %v1976_v12  ;;  %v535_v27 = vmul.f32 %v3821_v17, %v4764_v44  ;;  %v3828_v33 = vunpack.i.h.bf16 %v3826_v22  ;;  %4067 = vset.pattern.permute.xlu1 %v4415_v28 }
  0xc5   :  { %v1594_v15 = vadd.f32 %v1466_v6, %v1061_v3  ;;  %v3827_v53 = vunpack.i.l.bf16 %v3826_v22  ;;  %v1727_v39 = vadd.f32 %v4785_v58, %v4922_v1  ;;  %v1853_v63 = vmax.f32 %v1725_v11, 0.0  ;;  %4069 = vperm.xlu1 %4067, %v4634_v26   ;;  %v4321_v22 = vld [vmem:[#allocation2 + $0x64] ss:$8 sps:$4 sm:$0xff]   ;;  %2987 = vmatpush1.bf16.msra.mxu1 %v4320_v61 }
  0xc6   :  { %v1730_v21 = vadd.f32 %v4788_v59, %v1590_v24  ;;  %v1732_v2 = vadd.f32 %v4788_v59, %v1592_v31  ;;  %v938_v35 = vmul.f32 %v3828_v33, %v4767_v42  ;;  %v939_v5 = vmul.f32 %v3828_v33, %v4777_v48  ;;  %v3838_v38 = vpop.permute.xlu1 %3837  ;;  %v5002_v24 = vpop.permute.xlu0 %3848  ;;  %2988 = vmatprep.subr.bf16.mxu1 %v4321_v22 }
  0xc7   :  { %v936_v49 = vmul.f32 %v3827_v53, %v4767_v42  ;;  %v937_v9 = vmul.f32 %v3827_v53, %v4777_v48  ;;  %v1855_v50 = vmax.f32 %v1727_v39, 0.0  ;;  %v3834_v36 = vunpack.i.h.bf16 %v3832_v47 }
  0xc8   :  { %v1858_v1 = vmax.f32 %v1730_v21, 0.0  ;;  %v1860_v8 = vmax.f32 %v1732_v2, 0.0  ;;  %v5004_v31 = vadd.f32 %v1465_v57, %v1060_v20  ;;  %v1066_v14 = vadd.f32 %v938_v35, %v536_v7  ;;  %v4323_v57 = vld [vmem:[#allocation2 + $0x60] ss:$8 sps:$4 sm:$0xff]  }
  0xc9   :  { %v1065_v3 = vadd.f32 %v937_v9, %v535_v27  ;;  %v1067_v32 = vadd.f32 %v939_v5, %v537_v46  ;;  %v1975_v17 = vpack.c.bf16 %v1855_v50, %v1853_v63  ;;  %v1471_v23 = vmul.f32 %v3834_v36, %v4779_v51  ;;  %4073 = vset.pattern.permute.xlu1 %v5948_v25  ;;  %v4324_v9 = vld [vmem:[#allocation2 + $0x54] ss:$8 sps:$4 sm:$0xff]  }
  0xca   :  { %v1978_v4 = vpack.c.bf16 %v1860_v8, %v1858_v1  ;;  %v1472_v40 = vmul.f32 %v3834_v36, %v4781_v52  ;;  %v3833_v11 = vunpack.i.l.bf16 %v3832_v47  ;;  %v3840_v12 = vunpack.i.h.bf16 %v3838_v38  ;;  %4075 = vperm.xlu1 %4073, %v4634_v26   ;;  %v5024_v35 = vpop.permute.xlu0 %3860  ;;  %2989 = vmatpush1.bf16.msra.mxu1 %v4323_v57 }
  0xcb   :  { %v3839_v6 = vunpack.i.l.bf16 %v3838_v38  ;;  %v1729_v20 = vadd.f32 %v4785_v58, %v4958_v54  ;;  %v1064_v7 = vadd.f32 %v936_v49, %v534_v18  ;;  %2300 = vmatmul.mubr.bf16.gmra.mxu0 %v1975_v17  ;;  %v5012_v46 = vadd.f32 %v1471_v23, %v1066_v14  ;;  %v3844_v53 = vpop.permute.xlu1 %3843  ;;  %v4326_v38 = vld [vmem:[#allocation2 + $0x50] ss:$8 sps:$4 sm:$0xff]   ;;  %2990 = vmatprep.subr.bf16.mxu1 %v4324_v9 }
  0xcc   :  { %v1731_v27 = vadd.f32 %v4785_v58, %v4955_v29  ;;  %v1734_v33 = vadd.f32 %v4788_v59, %v1594_v15  ;;  %2309 = vmatprep.mubr.bf16.mxu0 %v1978_v4  ;;  %v1469_v47 = vmul.f32 %v3833_v11, %v4779_v51  ;;  %v1470_v26 = vmul.f32 %v3833_v11, %v4781_v52  ;;  %v4327_v11 = vld [vmem:[#allocation2 + $0x44] ss:$8 sps:$4 sm:$0xff]  }
  0xcd   :  { %v5019_v39 = vadd.f32 %v1472_v40, %v1067_v32  ;;  %v540_v54 = vmul.f32 %v3840_v12, %v4761_v43  ;;  %v541_v18 = vmul.f32 %v3840_v12, %v4764_v44  ;;  %v538_v63 = vmul.f32 %v3839_v6, %v4761_v43 }
  0xce   :  { %v1857_v21 = vmax.f32 %v1729_v20, 0.0  ;;  %v1859_v2 = vmax.f32 %v1731_v27, 0.0  ;;  %v1598_v29 = vadd.f32 %v1470_v26, %v1065_v3  ;;  %v539_v15 = vmul.f32 %v3839_v6, %v4764_v44  ;;  %4084 = vset.pattern.permute.xlu1 %v4415_v28  ;;  %2991 = vmatpush1.bf16.msra.mxu1 %v4326_v38  ;;  %v4329_v27 = vld [vmem:[#allocation2 + $0x40] ss:$8 sps:$4 sm:$0xff]  }
  0xcf   :  { %v1736_v5 = vadd.f32 %v4788_v59, %v4987_v45  ;;  %v1862_v49 = vmax.f32 %v1734_v33, 0.0  ;;  %v3846_v61 = vunpack.i.h.bf16 %v3844_v53  ;;  %v3845_v50 = vunpack.i.l.bf16 %v3844_v53  ;;  %4086 = vperm.xlu1 %4084, %v4658_v41   ;;  %2992 = vmatprep.subr.bf16.mxu1 %v4327_v11 }
  0xd0   :  { %v1977_v55 = vpack.c.bf16 %v1859_v2, %v1857_v21  ;;  %v3851_v1 = vunpack.i.h.bf16 %v5002_v24  ;;  %v3850_v36 = vunpack.i.l.bf16 %v5002_v24  ;;  %v3855_v3 = vpop.permute.xlu1 %3854  ;;  %v3863_v14 = vunpack.i.h.bf16 %v5024_v35 }
  0xd1   :  { %v1864_v8 = vmax.f32 %v1736_v5, 0.0  ;;  %v3862_v45 = vunpack.i.l.bf16 %v5024_v35  ;;  %v942_v32 = vmul.f32 %v3846_v61, %v4767_v42  ;;  %v943_v17 = vmul.f32 %v3846_v61, %v4777_v48  ;;  %v4330_v61 = vld [vmem:[#allocation2 + $0x34] ss:$8 sps:$4 sm:$0xff]  }
  0xd2   :  { %v940_v4 = vmul.f32 %v3845_v50, %v4767_v42  ;;  %v941_v23 = vmul.f32 %v3845_v50, %v4777_v48  ;;  %v1475_v41 = vmul.f32 %v3851_v1, %v4779_v51  ;;  %v1476_v22 = vmul.f32 %v3851_v1, %v4781_v52  ;;  %2993 = vmatpush1.bf16.msra.mxu1 %v4329_v27  ;;  %v4332_v50 = vld [vmem:[#allocation2 + $0x30] ss:$8 sps:$4 sm:$0xff]  }
  0xd3   :  { %v1980_v40 = vpack.c.bf16 %v1864_v8, %v1862_v49  ;;  %v1473_v24 = vmul.f32 %v3850_v36, %v4779_v51  ;;  %2310 = vmatmul.mubr.bf16.gmra.mxu0 %v1977_v55  ;;  %v1070_v20 = vadd.f32 %v942_v32, %v540_v54  ;;  %v1071_v57 = vadd.f32 %v943_v17, %v541_v18 }
  0xd4   :  { %v1068_v12 = vadd.f32 %v940_v4, %v538_v63  ;;  %v1069_v6 = vadd.f32 %v941_v23, %v539_v15  ;;  %v1474_v33 = vmul.f32 %v3850_v36, %v4781_v52  ;;  %v3857_v53 = vunpack.i.h.bf16 %v3855_v3  ;;  %4096 = vset.pattern.permute.xlu1 %v5947_v37  ;;  %2994 = vmatprep.subr.bf16.mxu1 %v4330_v61 }
  0xd5   :  { %2319 = vmatprep.mubr.bf16.mxu0 %v1980_v40  ;;  %v3856_v26 = vunpack.i.l.bf16 %v3855_v3  ;;  %v946_v21 = vmul.f32 %v3863_v14, %v4767_v42  ;;  %v1597_v2 = vadd.f32 %v1469_v47, %v1064_v7  ;;  %v5045_v35 = vadd.f32 %v1475_v41, %v1070_v20  ;;  %4098 = vperm.xlu1 %4096, %v4683_v56   ;;  %v3867_v54 = vpop.permute.xlu1 %3866 }
  0xd6   :  { %v5047_v5 = vadd.f32 %v1476_v22, %v1071_v57  ;;  %v947_v63 = vmul.f32 %v3863_v14, %v4777_v48  ;;  %v5051_v18 = vadd.f32 %v1473_v24, %v1068_v12  ;;  %v544_v15 = vmul.f32 %v3857_v53, %v4761_v43  ;;  %v4333_v14 = vld [vmem:[#allocation2 + $0x24] ss:$8 sps:$4 sm:$0xff]   ;;  %2995 = vmatpush1.bf16.msra.mxu1 %v4332_v50  ;;  %v4335_v57 = vld [vmem:[#allocation2 + $0x20] ss:$8 sps:$4 sm:$0xff]  }
  0xd7   :  { %v545_v49 = vmul.f32 %v3857_v53, %v4764_v44  ;;  %v542_v9 = vmul.f32 %v3856_v26, %v4761_v43  ;;  %v1602_v38 = vadd.f32 %v1474_v33, %v1069_v6  ;;  %v543_v7 = vmul.f32 %v3856_v26, %v4764_v44  ;;  %2996 = vmatprep.subr.bf16.mxu1 %v4333_v14  ;;  %v3878_v26 = vpop.permute.xlu0 %3877 }
  0xd8   :  { %v944_v47 = vmul.f32 %v3862_v45, %v4767_v42  ;;  %v1733_v55 = vadd.f32 %v4785_v58, %v5004_v31  ;;  %v1074_v1 = vadd.f32 %v946_v21, %v544_v15  ;;  %v945_v8 = vmul.f32 %v3862_v45, %v4777_v48  ;;  %v4336_v21 = vld [vmem:[#allocation2 + $0x14] ss:$8 sps:$4 sm:$0xff]  }
  0xd9   :  { %v1735_v36 = vadd.f32 %v4785_v58, %v4985_v30  ;;  %v1738_v3 = vadd.f32 %v4788_v59, %v1598_v29  ;;  %v1075_v32 = vadd.f32 %v947_v63, %v545_v49  ;;  %v1740_v23 = vadd.f32 %v4788_v59, %v5019_v39  ;;  %4102 = vset.pattern.permute.xlu1 %v4415_v28 }
  0xda   :  { %v1072_v17 = vadd.f32 %v944_v47, %v542_v9  ;;  %v1861_v4 = vmax.f32 %v1733_v55, 0.0  ;;  %v3869_v41 = vunpack.i.h.bf16 %v3867_v54  ;;  %v3868_v22 = vunpack.i.l.bf16 %v3867_v54  ;;  %4104 = vperm.xlu1 %4102, %v4683_v56   ;;  %v3873_v45 = vpop.permute.xlu1 %3872  ;;  %2997 = vmatpush1.bf16.msra.mxu1 %v4335_v57 }
  0xdb   :  { %v1863_v31 = vmax.f32 %v1735_v36, 0.0  ;;  %v1866_v40 = vmax.f32 %v1738_v3, 0.0  ;;  %v1868_v30 = vmax.f32 %v1740_v23, 0.0  ;;  %v1737_v29 = vadd.f32 %v4785_v58, %v1597_v2  ;;  %2998 = vmatprep.subr.bf16.mxu1 %v4336_v21 }
  0xdc   :  { %v1739_v24 = vadd.f32 %v4785_v58, %v5012_v46  ;;  %v3875_v11 = vunpack.i.h.bf16 %v3873_v45  ;;  %v1479_v39 = vmul.f32 %v3869_v41, %v4779_v51  ;;  %v1480_v6 = vmul.f32 %v3869_v41, %v4781_v52  ;;  %v4338_v41 = vld [vmem:[#allocation2 + $0x10] ss:$8 sps:$4 sm:$0xff]  }
  0xdd   :  { %v1979_v12 = vpack.c.bf16 %v1863_v31, %v1861_v4  ;;  %v1477_v20 = vmul.f32 %v3868_v22, %v4779_v51  ;;  %v1073_v27 = vadd.f32 %v945_v8, %v543_v7  ;;  %v1982_v56 = vpack.c.bf16 %v1868_v30, %v1866_v40 }
  0xde   :  { %v1478_v33 = vmul.f32 %v3868_v22, %v4781_v52  ;;  %v1865_v53 = vmax.f32 %v1737_v29, 0.0  ;;  %v5077_v2 = vadd.f32 %v1479_v39, %v1074_v1  ;;  %v1608_v63 = vadd.f32 %v1480_v6, %v1075_v32  ;;  %4113 = vset.pattern.permute.xlu1 %v5947_v37  ;;  %2999 = vmatpush1.bf16.msra.mxu1 %v4338_v41 }
  0xdf   :  { %2320 = vmatmul.mubr.bf16.gmra.mxu0 %v1979_v12  ;;  %v5075_v46 = vadd.f32 %v1477_v20, %v1072_v17  ;;  %v1867_v54 = vmax.f32 %v1739_v24, 0.0  ;;  %v548_v49 = vmul.f32 %v3875_v11, %v4761_v43  ;;  %v549_v9 = vmul.f32 %v3875_v11, %v4764_v44  ;;  %v3884_v47 = vpop.permute.xlu1 %3883  ;;  %4115 = vperm.xlu1 %4113, %v4700_v62   ;;  %v4339_v11 = vld [vmem:[#allocation2 + $0x4] ss:$8 sps:$4 sm:$0xff]  }
  0xe0   :  { %2329 = vmatprep.mubr.bf16.mxu0 %v1982_v56  ;;  %v1606_v15 = vadd.f32 %v1478_v33, %v1073_v27  ;;  %v3874_v7 = vunpack.i.l.bf16 %v3873_v45  ;;  %v3880_v55 = vunpack.i.h.bf16 %v3878_v26  ;;  %v3879_v61 = vunpack.i.l.bf16 %v3878_v26  ;;  %3000 = vmatprep.subr.bf16.mxu1 %v4339_v11 }
  0xe1   :  { %v1742_v50 = vadd.f32 %v4788_v59, %v1602_v38  ;;  %v1744_v1 = vadd.f32 %v4788_v59, %v5047_v5  ;;  %v3886_v3 = vunpack.i.h.bf16 %v3884_v47  ;;  %v3885_v14 = vunpack.i.l.bf16 %v3884_v47 }
  0xe2   :  { %v546_v8 = vmul.f32 %v3874_v7, %v4761_v43  ;;  %v547_v36 = vmul.f32 %v3874_v7, %v4764_v44  ;;  %v950_v32 = vmul.f32 %v3880_v55, %v4767_v42  ;;  %v951_v17 = vmul.f32 %v3880_v55, %v4777_v48  ;;  %v4342_v55 = vld [vmem:[#allocation2 + $0xf4] ss:$8 sps:$4 sm:$0xff]  }
  0xe3   :  { %v948_v4 = vmul.f32 %v3879_v61, %v4767_v42  ;;  %v949_v38 = vmul.f32 %v3879_v61, %v4777_v48  ;;  %v1870_v23 = vmax.f32 %v1742_v50, 0.0  ;;  %v1872_v5 = vmax.f32 %v1744_v1, 0.0  ;;  %4125 = vset.pattern.permute.xlu1 %v5948_v25 }
  0xe4   :  { %v1483_v31 = vmul.f32 %v3886_v3, %v4779_v51  ;;  %v1484_v40 = vmul.f32 %v3886_v3, %v4781_v52  ;;  %v1981_v22 = vpack.c.bf16 %v1867_v54, %v1865_v53  ;;  %v1078_v45 = vadd.f32 %v950_v32, %v548_v49  ;;  %v3896_v24 = vpop.permute.xlu1 %3895  ;;  %4127 = vperm.xlu1 %4125, %v4700_v62   ;;  %v3890_v53 = vpop.permute.xlu0 %3889 }
  0xe5   :  { %v1079_v30 = vadd.f32 %v951_v17, %v549_v9  ;;  %v1076_v29 = vadd.f32 %v948_v4, %v546_v8  ;;  %v1077_v12 = vadd.f32 %v949_v38, %v547_v36  ;;  %v1984_v39 = vpack.c.bf16 %v1872_v5, %v1870_v23 }
  0xe6   :  { %v1482_v6 = vmul.f32 %v3885_v14, %v4781_v52  ;;  %v1741_v20 = vadd.f32 %v4785_v58, %v5051_v18  ;;  %v1481_v57 = vmul.f32 %v3885_v14, %v4779_v51  ;;  %v5100_v27 = vadd.f32 %v1483_v31, %v1078_v45  ;;  %v4341_v18 = vld [vmem:[#allocation2] ss:$8 sps:$4 sm:$0xff]  }
  0xe7   :  { %2330 = vmatmul.mubr.bf16.gmra.mxu0 %v1981_v22  ;;  %v1743_v56 = vadd.f32 %v4785_v58, %v5045_v35  ;;  %v1746_v33 = vadd.f32 %v4788_v59, %v1606_v15  ;;  %v5105_v21 = vadd.f32 %v1484_v40, %v1079_v30  ;;  %v1748_v62 = vadd.f32 %v4788_v59, %v1608_v63  ;;  %v4344_v40 = vld [vmem:[#allocation2 + $0xf0] ss:$8 sps:$4 sm:$0xff]  }
  0xe8   :  { %2339 = vmatprep.mubr.bf16.mxu0 %v1984_v39  ;;  %v1610_v26 = vadd.f32 %v1482_v6, %v1077_v12  ;;  %v1869_v54 = vmax.f32 %v1741_v20, 0.0  ;;  %v3898_v7 = vunpack.i.h.bf16 %v3896_v24  ;;  %v3897_v47 = vunpack.i.l.bf16 %v3896_v24  ;;  %4131 = vset.pattern.permute.xlu1 %v5947_v37  ;;  %v3907_v14 = vpop.permute.xlu0 %3906  ;;  %v4345_v24 = vld [vmem:[#allocation2 + $0xe4] ss:$8 sps:$4 sm:$0xff]  }
  0xe9   :  { %v1871_v49 = vmax.f32 %v1743_v56, 0.0  ;;  %v1874_v9 = vmax.f32 %v1746_v33, 0.0  ;;  %v1876_v61 = vmax.f32 %v1748_v62, 0.0  ;;  %v3892_v35 = vunpack.i.h.bf16 %v3890_v53  ;;  %v3902_v15 = vpop.permute.xlu1 %3901  ;;  %4133 = vperm.xlu1 %4131, %v4716_v10   ;;  %3001 = vmatpush1.bf16.msra.mxu1 %v4341_v18 }
  0xea   :  { %v3891_v50 = vunpack.i.l.bf16 %v3890_v53  ;;  %v1745_v1 = vadd.f32 %v4785_v58, %v5075_v46  ;;  %v954_v63 = vmul.f32 %v3898_v7, %v4767_v42  ;;  %v955_v36 = vmul.f32 %v3898_v7, %v4777_v48  ;;  %3002 = vmatprep.subr.bf16.mxu1 %v4342_v55 }
  0xeb   :  { %v1983_v8 = vpack.c.bf16 %v1871_v49, %v1869_v54  ;;  %v952_v3 = vmul.f32 %v3897_v47, %v4767_v42  ;;  %v1986_v32 = vpack.c.bf16 %v1876_v61, %v1874_v9  ;;  %v953_v17 = vmul.f32 %v3897_v47, %v4777_v48  ;;  %v4347_v49 = vld [vmem:[#allocation2 + $0xe0] ss:$8 sps:$4 sm:$0xff]  }
  0xec   :  { %v552_v4 = vmul.f32 %v3892_v35, %v4761_v43  ;;  %v553_v38 = vmul.f32 %v3892_v35, %v4764_v44  ;;  %v550_v46 = vmul.f32 %v3891_v50, %v4761_v43  ;;  %v551_v23 = vmul.f32 %v3891_v50, %v4764_v44  ;;  %v3919_v18 = vpop.permute.xlu0 %3918 }
  0xed   :  { %v3904_v5 = vunpack.i.h.bf16 %v3902_v15  ;;  %v3903_v31 = vunpack.i.l.bf16 %v3902_v15  ;;  %v1609_v41 = vadd.f32 %v1481_v57, %v1076_v29  ;;  %v1747_v45 = vadd.f32 %v4785_v58, %v5077_v2  ;;  %4142 = vset.pattern.permute.xlu1 %v5948_v25  ;;  %3003 = vmatpush2.bf16.msra.mxu1 %v4344_v40 }
  0xee   :  { %v1082_v22 = vadd.f32 %v954_v63, %v552_v4  ;;  %v1873_v30 = vmax.f32 %v1745_v1, 0.0  ;;  %v1083_v11 = vadd.f32 %v955_v36, %v553_v38  ;;  %v1080_v12 = vadd.f32 %v952_v3, %v550_v46  ;;  %v3913_v20 = vpop.permute.xlu1 %3912  ;;  %4144 = vperm.xlu1 %4142, %v4716_v10   ;;  %3004 = vmatprep.subr.bf16.mxu1 %v4345_v24  ;;  %v4348_v36 = vld [vmem:[#allocation2 + $0xd4] ss:$8 sps:$4 sm:$0xff]   ;;  %v4350_v4 = vld [vmem:[#allocation2 + $0xd0] ss:$8 sps:$4 sm:$0xff]  }
  0xef   :  { %2340 = vmatmul.mubr.bf16.gmra.mxu0 %v1983_v8  ;;  %v1487_v39 = vmul.f32 %v3904_v5, %v4779_v51  ;;  %v1488_v6 = vmul.f32 %v3904_v5, %v4781_v52  ;;  %v1081_v56 = vadd.f32 %v953_v17, %v551_v23  ;;  %v1485_v33 = vmul.f32 %v3903_v31, %v4779_v51  ;;  %v4351_v5 = vld [vmem:[#allocation2 + $0xc4] ss:$8 sps:$4 sm:$0xff]  }
  0xf0   :  { %2349 = vmatprep.mubr.bf16.mxu0 %v1986_v32  ;;  %v1875_v53 = vmax.f32 %v1747_v45, 0.0  ;;  %v3909_v29 = vunpack.i.h.bf16 %v3907_v14  ;;  %v1486_v2 = vmul.f32 %v3903_v31, %v4781_v52  ;;  %v3908_v54 = vunpack.i.l.bf16 %v3907_v14 }
  0xf1   :  { %v5127_v57 = vadd.f32 %v1487_v39, %v1082_v22  ;;  %v1750_v62 = vadd.f32 %v4788_v59, %v1610_v26  ;;  %v5131_v9 = vadd.f32 %v1485_v33, %v1080_v12  ;;  %v1616_v7 = vadd.f32 %v1488_v6, %v1083_v11  ;;  %3005 = vmatpush2.bf16.msra.mxu1 %v4347_v49  ;;  %v4353_v33 = vld [vmem:[#allocation2 + $0xc0] ss:$8 sps:$4 sm:$0xff]  }
  0xf2   :  { %v1985_v47 = vpack.c.bf16 %v1875_v53, %v1873_v30  ;;  %v556_v55 = vmul.f32 %v3909_v29, %v4761_v43  ;;  %v557_v61 = vmul.f32 %v3909_v29, %v4764_v44  ;;  %v554_v35 = vmul.f32 %v3908_v54, %v4761_v43  ;;  %4154 = vset.pattern.permute.xlu1 %v4415_v28 }
  0xf3   :  { %v555_v50 = vmul.f32 %v3908_v54, %v4764_v44  ;;  %v1752_v10 = vadd.f32 %v4788_v59, %v5105_v21  ;;  %v1878_v26 = vmax.f32 %v1750_v62, 0.0  ;;  %v3915_v15 = vunpack.i.h.bf16 %v3913_v20  ;;  %v3925_v63 = vpop.permute.xlu1 %3924  ;;  %4156 = vperm.xlu1 %4154, %v4729_v16   ;;  %3006 = vmatprep.subr.bf16.mxu1 %v4348_v36 }
  0xf4   :  { %v3914_v1 = vunpack.i.l.bf16 %v3913_v20  ;;  %v3921_v8 = vunpack.i.h.bf16 %v3919_v18  ;;  %v3920_v14 = vunpack.i.l.bf16 %v3919_v18  ;;  %v1749_v32 = vadd.f32 %v4785_v58, %v1609_v41 }
  0xf5   :  { %v1880_v3 = vmax.f32 %v1752_v10, 0.0  ;;  %v1751_v17 = vadd.f32 %v4785_v58, %v5100_v27  ;;  %v958_v38 = vmul.f32 %v3915_v15, %v4767_v42  ;;  %v959_v21 = vmul.f32 %v3915_v15, %v4777_v48  ;;  %3007 = vmatpush2.bf16.msra.mxu1 %v4350_v4 }
  0xf6   :  { %v956_v46 = vmul.f32 %v3914_v1, %v4767_v42  ;;  %v957_v23 = vmul.f32 %v3914_v1, %v4777_v48  ;;  %v1491_v40 = vmul.f32 %v3921_v8, %v4779_v51  ;;  %v1492_v41 = vmul.f32 %v3921_v8, %v4781_v52  ;;  %3008 = vmatprep.subr.bf16.mxu1 %v4351_v5 }
  0xf7   :  { %2350 = vmatmul.mubr.bf16.gmra.mxu0 %v1985_v47  ;;  %v1988_v31 = vpack.c.bf16 %v1880_v3, %v1878_v26  ;;  %v1489_v27 = vmul.f32 %v3920_v14, %v4779_v51  ;;  %v1614_v22 = vadd.f32 %v1486_v2, %v1081_v56  ;;  %v1086_v30 = vadd.f32 %v958_v38, %v556_v55  ;;  %v3936_v56 = vpop.permute.xlu0 %3935  ;;  %v4354_v2 = vld [vmem:[#allocation2 + $0xb4] ss:$8 sps:$4 sm:$0xff]  }
  0xf8   :  { %v1084_v45 = vadd.f32 %v956_v46, %v554_v35  ;;  %v1087_v24 = vadd.f32 %v959_v21, %v557_v61  ;;  %v1085_v11 = vadd.f32 %v957_v23, %v555_v50  ;;  %v1877_v12 = vmax.f32 %v1749_v32, 0.0  ;;  %v3931_v20 = vpop.permute.xlu1 %3930  ;;  %4160 = vset.pattern.permute.xlu1 %v5948_v25  ;;  %v4356_v32 = vld [vmem:[#allocation2 + $0xb0] ss:$8 sps:$4 sm:$0xff]   ;;  %v4357_v21 = vld [vmem:[#allocation2 + $0xa4] ss:$8 sps:$4 sm:$0xff]  }
  0xf9   :  { %2359 = vmatprep.mubr.bf16.mxu0 %v1988_v31  ;;  %v1879_v39 = vmax.f32 %v1751_v17, 0.0  ;;  %v3927_v6 = vunpack.i.h.bf16 %v3925_v63  ;;  %v1490_v53 = vmul.f32 %v3920_v14, %v4781_v52  ;;  %v5154_v54 = vadd.f32 %v1491_v40, %v1086_v30  ;;  %4162 = vperm.xlu1 %4160, %v4729_v16  }
  0xfa   :  { %v5152_v29 = vadd.f32 %v1489_v27, %v1084_v45  ;;  %v3926_v62 = vunpack.i.l.bf16 %v3925_v63  ;;  %v1620_v18 = vadd.f32 %v1492_v41, %v1087_v24  ;;  %v1754_v50 = vadd.f32 %v4788_v59, %v1614_v22  ;;  %3009 = vmatpush2.bf16.msra.mxu1 %v4353_v33 }
  0xfb   :  { %v1987_v49 = vpack.c.bf16 %v1879_v39, %v1877_v12  ;;  %v560_v47 = vmul.f32 %v3927_v6, %v4761_v43  ;;  %v561_v55 = vmul.f32 %v3927_v6, %v4764_v44  ;;  %v1756_v10 = vadd.f32 %v4788_v59, %v1616_v7  ;;  %3010 = vmatprep.subr.bf16.mxu1 %v4354_v2  ;;  %v3948_v24 = vpop.permute.xlu0 %3947 }
  0xfc   :  { %v558_v61 = vmul.f32 %v3926_v62, %v4761_v43  ;;  %v559_v35 = vmul.f32 %v3926_v62, %v4764_v44  ;;  %v3933_v26 = vunpack.i.h.bf16 %v3931_v20  ;;  %v3932_v15 = vunpack.i.l.bf16 %v3931_v20 }
  0xfd   :  { %v3938_v1 = vunpack.i.h.bf16 %v3936_v56  ;;  %v3937_v8 = vunpack.i.l.bf16 %v3936_v56  ;;  %v1882_v63 = vmax.f32 %v1754_v50, 0.0  ;;  %v1884_v36 = vmax.f32 %v1756_v10, 0.0  ;;  %v3942_v14 = vpop.permute.xlu1 %3941  ;;  %4171 = vset.pattern.permute.xlu1 %v4415_v28  ;;  %v4359_v56 = vld [vmem:[#allocation2 + $0xa0] ss:$8 sps:$4 sm:$0xff]  }
  0xfe   :  { %v1753_v3 = vadd.f32 %v4785_v58, %v5131_v9  ;;  %v1755_v16 = vadd.f32 %v4785_v58, %v5127_v57  ;;  %v962_v17 = vmul.f32 %v3933_v26, %v4767_v42  ;;  %v963_v7 = vmul.f32 %v3933_v26, %v4777_v48  ;;  %4173 = vperm.xlu1 %4171, %v4752_v34  }
  0xff   :  { %2360 = vmatmul.mubr.bf16.gmra.mxu0 %v1987_v49  ;;  %v960_v4 = vmul.f32 %v3932_v15, %v4767_v42  ;;  %v961_v38 = vmul.f32 %v3932_v15, %v4777_v48  ;;  %v1990_v46 = vpack.c.bf16 %v1884_v36, %v1882_v63  ;;  %v1495_v9 = vmul.f32 %v3938_v1, %v4779_v51 }
 0x100   :  { %v1496_v57 = vmul.f32 %v3938_v1, %v4781_v52  ;;  %v1493_v23 = vmul.f32 %v3937_v8, %v4779_v51  ;;  %v1618_v5 = vadd.f32 %v1490_v53, %v1085_v11  ;;  %v1090_v40 = vadd.f32 %v962_v17, %v560_v47  ;;  %3011 = vmatpush2.bf16.msra.mxu1 %v4356_v32  ;;  %v3965_v32 = vpop.permute.xlu0 %3964 }
 0x101   :  { %v1088_v31 = vadd.f32 %v960_v4, %v558_v61  ;;  %v1091_v41 = vadd.f32 %v963_v7, %v561_v55  ;;  %2369 = vmatprep.mubr.bf16.mxu0 %v1990_v46  ;;  %v1089_v27 = vadd.f32 %v961_v38, %v559_v35  ;;  %v1881_v22 = vmax.f32 %v1753_v3, 0.0  ;;  %3012 = vmatprep.subr.bf16.mxu1 %v4357_v21  ;;  %v4360_v61 = vld [vmem:[#allocation2 + $0x94] ss:$8 sps:$4 sm:$0xff]   ;;  %v4362_v4 = vld [vmem:[#allocation2 + $0x90] ss:$8 sps:$4 sm:$0xff]  }
 0x102   :  { %v1883_v45 = vmax.f32 %v1755_v16, 0.0  ;;  %v3944_v30 = vunpack.i.h.bf16 %v3942_v14  ;;  %v5177_v12 = vadd.f32 %v1495_v9, %v1090_v40  ;;  %v1494_v6 = vmul.f32 %v3937_v8, %v4781_v52  ;;  %v3954_v11 = vpop.permute.xlu1 %3953  ;;  %4183 = vset.pattern.permute.xlu1 %v5947_v37 }
 0x103   :  { %v5179_v39 = vadd.f32 %v1496_v57, %v1091_v41  ;;  %v3943_v20 = vunpack.i.l.bf16 %v3942_v14  ;;  %v5182_v33 = vadd.f32 %v1493_v23, %v1088_v31  ;;  %v3950_v47 = vunpack.i.h.bf16 %v3948_v24  ;;  %4185 = vperm.xlu1 %4183, %v4790_v60   ;;  %v4363_v57 = vld [vmem:[#allocation2 + $0x84] ss:$8 sps:$4 sm:$0xff]  }
 0x104   :  { %v1989_v53 = vpack.c.bf16 %v1883_v45, %v1881_v22  ;;  %v564_v34 = vmul.f32 %v3944_v30, %v4761_v43  ;;  %v565_v62 = vmul.f32 %v3944_v30, %v4764_v44  ;;  %v3949_v55 = vunpack.i.l.bf16 %v3948_v24  ;;  %3013 = vmatpush2.bf16.msra.mxu1 %v4359_v56  ;;  %v4365_v56 = vld [vmem:[#allocation2 + $0x80] ss:$8 sps:$4 sm:$0xff]  }
 0x105   :  { %v562_v2 = vmul.f32 %v3943_v20, %v4761_v43  ;;  %v563_v49 = vmul.f32 %v3943_v20, %v4764_v44  ;;  %v1758_v35 = vadd.f32 %v4788_v59, %v1618_v5  ;;  %v1760_v50 = vadd.f32 %v4788_v59, %v1620_v18  ;;  %3014 = vmatprep.subr.bf16.mxu1 %v4360_v61 }
 0x106   :  { %v1757_v10 = vadd.f32 %v4785_v58, %v5152_v29  ;;  %v1759_v26 = vadd.f32 %v4785_v58, %v5154_v54  ;;  %v966_v15 = vmul.f32 %v3950_v47, %v4767_v42  ;;  %v967_v1 = vmul.f32 %v3950_v47, %v4777_v48 }
 0x107   :  { %2370 = vmatmul.mubr.bf16.gmra.mxu0 %v1989_v53  ;;  %v964_v8 = vmul.f32 %v3949_v55, %v4767_v42  ;;  %v965_v63 = vmul.f32 %v3949_v55, %v4777_v48  ;;  %v1886_v36 = vmax.f32 %v1758_v35, 0.0  ;;  %v1888_v3 = vmax.f32 %v1760_v50, 0.0  ;;  %v3960_v14 = vpop.permute.xlu1 %3959  ;;  %4189 = vset.pattern.permute.xlu1 %v4415_v28 }
 0x108   :  { %v1885_v18 = vmax.f32 %v1757_v10, 0.0  ;;  %v1887_v16 = vmax.f32 %v1759_v26, 0.0  ;;  %v1622_v29 = vadd.f32 %v1494_v6, %v1089_v27  ;;  %v1094_v17 = vadd.f32 %v966_v15, %v564_v34  ;;  %4191 = vperm.xlu1 %4189, %v4790_v60   ;;  %3015 = vmatpush2.bf16.msra.mxu1 %v4362_v4 }
 0x109   :  { %v1095_v7 = vadd.f32 %v967_v1, %v565_v62  ;;  %v1092_v54 = vadd.f32 %v964_v8, %v562_v2  ;;  %v1093_v38 = vadd.f32 %v965_v63, %v563_v49  ;;  %v1992_v21 = vpack.c.bf16 %v1888_v3, %v1886_v36  ;;  %3016 = vmatprep.subr.bf16.mxu1 %v4363_v57 }
 0x10a   :  { %v3956_v46 = vunpack.i.h.bf16 %v3954_v11  ;;  %v3955_v9 = vunpack.i.l.bf16 %v3954_v11  ;;  %v3962_v23 = vunpack.i.h.bf16 %v3960_v14  ;;  %v3961_v5 = vunpack.i.l.bf16 %v3960_v14 }
 0x10b   :  { %v3967_v31 = vunpack.i.h.bf16 %v3965_v32  ;;  %v3966_v40 = vunpack.i.l.bf16 %v3965_v32  ;;  %2379 = vmatprep.mubr.bf16.mxu0 %v1992_v21  ;;  %v1991_v41 = vpack.c.bf16 %v1887_v16, %v1885_v18  ;;  %v1762_v61 = vadd.f32 %v4788_v59, %v1622_v29 }
 0x10c   :  { %v1500_v27 = vmul.f32 %v3956_v46, %v4781_v52  ;;  %v1497_v22 = vmul.f32 %v3955_v9, %v4779_v51  ;;  %v1498_v45 = vmul.f32 %v3955_v9, %v4781_v52  ;;  %v1499_v30 = vmul.f32 %v3956_v46, %v4779_v51  ;;  %v3971_v20 = vpop.permute.xlu1 %3970  ;;  %4200 = vset.pattern.permute.xlu1 %v5947_v37  ;;  %v3977_v9 = vpop.permute.xlu0 %3976 }
 0x10d   :  { %v568_v24 = vmul.f32 %v3962_v23, %v4761_v43  ;;  %v569_v6 = vmul.f32 %v3962_v23, %v4764_v44  ;;  %v566_v60 = vmul.f32 %v3961_v5, %v4761_v43  ;;  %v567_v62 = vmul.f32 %v3961_v5, %v4764_v44  ;;  %4202 = vperm.xlu1 %4200, %v4853_v13  }
 0x10e   :  { %v1625_v11 = vadd.f32 %v1497_v22, %v1092_v54  ;;  %v1626_v53 = vadd.f32 %v1498_v45, %v1093_v38  ;;  %v1628_v34 = vadd.f32 %v1500_v27, %v1095_v7  ;;  %v970_v2 = vmul.f32 %v3967_v31, %v4767_v42  ;;  %3017 = vmatpush2.bf16.msra.mxu1 %v4365_v56 }
 0x10f   :  { %2380 = vmatmul.mubr.bf16.gmra.mxu0 %v1991_v41  ;;  %v971_v49 = vmul.f32 %v3967_v31, %v4777_v48  ;;  %v968_v47 = vmul.f32 %v3966_v40, %v4767_v42  ;;  %v969_v55 = vmul.f32 %v3966_v40, %v4777_v48  ;;  %v1764_v35 = vadd.f32 %v4788_v59, %v5179_v39 }
 0x110   :  { %v1761_v50 = vadd.f32 %v4785_v58, %v5182_v33  ;;  %v1763_v10 = vadd.f32 %v4785_v58, %v5177_v12  ;;  %v1627_v26 = vadd.f32 %v1499_v30, %v1094_v17  ;;  %v1098_v15 = vadd.f32 %v970_v2, %v568_v24  ;;  %v4366_v17 = vld [vmem:[%s5929_s0 + $0xe8] sm:$0xff]  }
 0x111   :  { %v1099_v1 = vadd.f32 %v971_v49, %v569_v6  ;;  %v1096_v8 = vadd.f32 %v968_v47, %v566_v60  ;;  %v1890_v63 = vmax.f32 %v1762_v61, 0.0  ;;  %v1892_v36 = vmax.f32 %v1764_v35, 0.0  ;;  %v3983_v16 = vpop.permute.xlu1 %3982  ;;  %4212 = vset.pattern.permute.xlu1 %v5948_v25 }
 0x112   :  { %v1889_v3 = vmax.f32 %v1761_v50, 0.0  ;;  %v1891_v18 = vmax.f32 %v1763_v10, 0.0  ;;  %v3973_v39 = vunpack.i.h.bf16 %v3971_v20  ;;  %v3972_v14 = vunpack.i.l.bf16 %v3971_v20  ;;  %4214 = vperm.xlu1 %4212, %v4853_v13  }
 0x113   :  { %v1766_v32 = vadd.f32 %v4788_v59, %v1626_v53  ;;  %v1768_v33 = vadd.f32 %v4788_v59, %v1628_v34  ;;  %v1097_v29 = vadd.f32 %v969_v55, %v567_v62  ;;  %v1994_v12 = vpack.c.bf16 %v1892_v36, %v1890_v63 }
 0x114   :  { %v3667_v7 = vunpack.c.h.bf16 %v4366_v17  ;;  %v3985_v54 = vunpack.i.h.bf16 %v3983_v16  ;;  %v1993_v4 = vpack.c.bf16 %v1891_v18, %v1889_v3  ;;  %v1504_v38 = vmul.f32 %v3973_v39, %v4781_v52 }
 0x115   :  { %v1501_v21 = vmul.f32 %v3972_v14, %v4779_v51  ;;  %v1502_v46 = vmul.f32 %v3972_v14, %v4781_v52  ;;  %2389 = vmatprep.mubr.bf16.mxu0 %v1994_v12  ;;  %v1503_v57 = vmul.f32 %v3973_v39, %v4779_v51  ;;  %v1894_v23 = vmax.f32 %v1766_v32, 0.0  ;;  %v3705_v12 = vld [vmem:[%s5929_s0 + $0xf0] sm:$0xff]  }
 0x116   :  { %v1896_v5 = vmax.f32 %v1768_v33, 0.0  ;;  %v4224_v31 = vpack.i.bf16 %v3667_v7, %v3666_v19  ;;  %v1632_v27 = vadd.f32 %v1504_v38, %v1099_v1  ;;  %v974_v22 = vmul.f32 %v3985_v54, %v4767_v42  ;;  %v3989_v45 = vpop.permute.xlu1 %3988  ;;  %4218 = vset.pattern.permute.xlu1 %v5947_v37 }
 0x117   :  { %2390 = vmatmul.mubr.bf16.gmra.mxu0 %v1993_v4  ;;  %v1629_v40 = vadd.f32 %v1501_v21, %v1096_v8  ;;  %v1630_v41 = vadd.f32 %v1502_v46, %v1097_v29  ;;  %v975_v24 = vmul.f32 %v3985_v54, %v4777_v48  ;;  %v3984_v6 = vunpack.i.l.bf16 %v3983_v16 }
 0x118   :  { %v1996_v30 = vpack.c.bf16 %v1896_v5, %v1894_v23  ;;  %4225 = vperm.xlu0 %4206, %v4224_v31   ;;  %v3979_v60 = vunpack.i.h.bf16 %v3977_v9  ;;  %v3978_v20 = vunpack.i.l.bf16 %v3977_v9  ;;  %v1765_v13 = vadd.f32 %v4785_v58, %v1625_v11  ;;  %v3994_v11 = vpop.permute.xlu0 %3993  ;;  %4220 = vperm.xlu1 %4218, %v4224_v31  }
 0x119   :  { %v1767_v53 = vadd.f32 %v4785_v58, %v1627_v26  ;;  %v972_v0 = vmul.f32 %v3984_v6, %v4767_v42  ;;  %v973_v19 = vmul.f32 %v3984_v6, %v4777_v48  ;;  %v1631_v55 = vadd.f32 %v1503_v57, %v1098_v15 }
 0x11a   :  { %2399 = vmatprep.mubr.bf16.mxu0 %v1996_v30  ;;  %v572_v34 = vmul.f32 %v3979_v60, %v4761_v43  ;;  %v573_v62 = vmul.f32 %v3979_v60, %v4764_v44  ;;  %v570_v56 = vmul.f32 %v3978_v20, %v4761_v43  ;;  %v571_v2 = vmul.f32 %v3978_v20, %v4764_v44 }
 0x11b   :  { %v1893_v49 = vmax.f32 %v1765_v13, 0.0  ;;  %v1895_v47 = vmax.f32 %v1767_v53, 0.0  ;;  %v3991_v35 = vunpack.i.h.bf16 %v3989_v45  ;;  %v3990_v50 = vunpack.i.l.bf16 %v3989_v45  ;;  %v4000_v10 = vpop.permute.xlu1 %3999 }
 0x11c   :  { %v1102_v61 = vadd.f32 %v974_v22, %v572_v34  ;;  %4235 = vset.pattern.permute.xlu0 %v5947_v37  ;;  %v1103_v26 = vadd.f32 %v975_v24, %v573_v62  ;;  %v1100_v1 = vadd.f32 %v972_v0, %v570_v56  ;;  %v1101_v63 = vadd.f32 %v973_v19, %v571_v2  ;;  %v4006_v38 = vpop.permute.xlu0 %4005  ;;  %v3706_v19 = vld [vmem:[%s5929_s0 + $0xf8] sm:$0xff]  }
 0x11d   :  { %v1995_v8 = vpack.c.bf16 %v1895_v47, %v1893_v49  ;;  %v1507_v36 = vmul.f32 %v3991_v35, %v4779_v51  ;;  %v1505_v3 = vmul.f32 %v3990_v50, %v4779_v51  ;;  %v1506_v18 = vmul.f32 %v3990_v50, %v4781_v52  ;;  %4229 = vset.pattern.permute.xlu1 %v5948_v25 }
 0x11e   :  { %v3996_v16 = vunpack.i.h.bf16 %v3994_v11  ;;  %v3995_v15 = vunpack.i.l.bf16 %v3994_v11  ;;  %v1770_v39 = vadd.f32 %v4788_v59, %v1630_v41  ;;  %v1772_v14 = vadd.f32 %v4788_v59, %v1632_v27  ;;  %4231 = vperm.xlu1 %4229, %v4224_v31  }
 0x11f   :  { %2400 = vmatmul.mubr.bf16.gmra.mxu0 %v1995_v8  ;;  %v1508_v32 = vmul.f32 %v3991_v35, %v4781_v52  ;;  %v5254_v37 = vadd.f32 %v1505_v3, %v1100_v1  ;;  %v1634_v33 = vadd.f32 %v1506_v18, %v1101_v63  ;;  %v5256_v29 = vadd.f32 %v1507_v36, %v1102_v61 }
 0x120   :  { %v576_v17 = vmul.f32 %v3996_v16, %v4761_v43  ;;  %v577_v7 = vmul.f32 %v3996_v16, %v4764_v44  ;;  %v574_v54 = vmul.f32 %v3995_v15, %v4761_v43  ;;  %v575_v4 = vmul.f32 %v3995_v15, %v4764_v44  ;;  %v4023_v15 = vpop.permute.xlu0 %4022 }
 0x121   :  { %v1898_v46 = vmax.f32 %v1770_v39, 0.0  ;;  %v1900_v9 = vmax.f32 %v1772_v14, 0.0  ;;  %v1769_v57 = vadd.f32 %v4785_v58, %v1629_v40  ;;  %v1771_v23 = vadd.f32 %v4785_v58, %v1631_v55 }
 0x122   :  { %v4012_v21 = vpop.permute.xlu1 %4011  ;;  %v4002_v5 = vunpack.i.h.bf16 %v4000_v10  ;;  %v4001_v41 = vunpack.i.l.bf16 %v4000_v10  ;;  %v3670_v27 = vunpack.c.l.bf16 %v3705_v12  ;;  %v3671_v31 = vunpack.c.h.bf16 %v3705_v12  ;;  %4241 = vset.pattern.permute.xlu1 %v4415_v28 }
 0x123   :  { %v1998_v22 = vpack.c.bf16 %v1900_v9, %v1898_v46  ;;  %v1897_v45 = vmax.f32 %v1769_v57, 0.0  ;;  %v1899_v30 = vmax.f32 %v1771_v23, 0.0  ;;  %v4008_v24 = vunpack.i.h.bf16 %v4006_v38 }
 0x124   :  { %v978_v6 = vmul.f32 %v4002_v5, %v4767_v42  ;;  %v979_v60 = vmul.f32 %v4002_v5, %v4777_v48  ;;  %v976_v20 = vmul.f32 %v4001_v41, %v4767_v42  ;;  %v977_v13 = vmul.f32 %v4001_v41, %v4777_v48 }
 0x125   :  { %2409 = vmatprep.mubr.bf16.mxu0 %v1998_v22  ;;  %v1997_v40 = vpack.c.bf16 %v1899_v30, %v1897_v45  ;;  %v4236_v53 = vpack.i.bf16 %v3671_v31, %v3670_v27  ;;  %v1511_v0 = vmul.f32 %v4008_v24, %v4779_v51  ;;  %v1636_v62 = vadd.f32 %v1508_v32, %v1103_v26 }
 0x126   :  { %v1104_v56 = vadd.f32 %v976_v20, %v574_v54  ;;  %v1106_v2 = vadd.f32 %v978_v6, %v576_v17  ;;  %v1107_v49 = vadd.f32 %v979_v60, %v577_v7  ;;  %v1512_v47 = vmul.f32 %v4008_v24, %v4781_v52 }
 0x127   :  { %v4018_v34 = vpop.permute.xlu1 %4017  ;;  %2410 = vmatmul.mubr.bf16.gmra.mxu0 %v1997_v40  ;;  %4237 = vperm.xlu0 %4235, %v4236_v53   ;;  %v4007_v11 = vunpack.i.l.bf16 %v4006_v38  ;;  %v4014_v55 = vunpack.i.h.bf16 %v4012_v21  ;;  %v4013_v61 = vunpack.i.l.bf16 %v4012_v21  ;;  %v1105_v35 = vadd.f32 %v977_v13, %v575_v4 }
 0x128   :  { %4243 = vperm.xlu1 %4241, %v4236_v53   ;;  %v5278_v50 = vadd.f32 %v1511_v0, %v1106_v2  ;;  %v3674_v10 = vunpack.c.l.bf16 %v3706_v19  ;;  %v3675_v1 = vunpack.c.h.bf16 %v3706_v19  ;;  %v1640_v63 = vadd.f32 %v1512_v47, %v1107_v49 }
 0x129   :  { %v1509_v8 = vmul.f32 %v4007_v11, %v4779_v51  ;;  %v1510_v26 = vmul.f32 %v4007_v11, %v4781_v52  ;;  %v580_v36 = vmul.f32 %v4014_v55, %v4761_v43  ;;  %v581_v3 = vmul.f32 %v4014_v55, %v4764_v44 }
 0x12a   :  { %v578_v18 = vmul.f32 %v4013_v61, %v4761_v43  ;;  %v4253_v16 = vpack.i.bf16 %v3675_v1, %v3674_v10  ;;  %v579_v14 = vmul.f32 %v4013_v61, %v4764_v44  ;;  %v1774_v32 = vadd.f32 %v4788_v59, %v1634_v33 }
 0x12b   :  { %v1637_v39 = vadd.f32 %v1509_v8, %v1104_v56  ;;  %v1776_v12 = vadd.f32 %v4788_v59, %v1636_v62  ;;  %v1773_v7 = vadd.f32 %v4785_v58, %v5254_v37  ;;  %v1775_v54 = vadd.f32 %v4785_v58, %v5256_v29 }
 0x12c   :  { %v4029_v17 = vpop.permute.xlu1 %4028  ;;  %4254 = vperm.xlu0 %4235, %v4253_v16   ;;  %4247 = vset.pattern.permute.xlu1 %v5948_v25  ;;  %v4020_v4 = vunpack.i.h.bf16 %v4018_v34  ;;  %v4019_v38 = vunpack.i.l.bf16 %v4018_v34  ;;  %v1902_v21 = vmax.f32 %v1774_v32, 0.0  ;;  %v4025_v9 = vunpack.i.h.bf16 %v4023_v15 }
 0x12d   :  { %4249 = vperm.xlu1 %4247, %v4236_v53   ;;  %v1904_v46 = vmax.f32 %v1776_v12, 0.0  ;;  %v4024_v57 = vunpack.i.l.bf16 %v4023_v15  ;;  %v1901_v33 = vmax.f32 %v1773_v7, 0.0  ;;  %v1903_v23 = vmax.f32 %v1775_v54, 0.0  ;;  %v4035_v53 = vpop.permute.xlu0 %4034 }
 0x12e   :  { %v982_v5 = vmul.f32 %v4020_v4, %v4767_v42  ;;  %v983_v41 = vmul.f32 %v4020_v4, %v4777_v48  ;;  %v980_v31 = vmul.f32 %v4019_v38, %v4767_v42  ;;  %v981_v37 = vmul.f32 %v4019_v38, %v4777_v48 }
 0x12f   :  { %v2000_v27 = vpack.c.bf16 %v1904_v46, %v1902_v21  ;;  %v1515_v29 = vmul.f32 %v4025_v9, %v4779_v51  ;;  %v1999_v22 = vpack.c.bf16 %v1903_v23, %v1901_v33  ;;  %v1516_v24 = vmul.f32 %v4025_v9, %v4781_v52 }
 0x130   :  { %v1110_v45 = vadd.f32 %v982_v5, %v580_v36  ;;  %v1111_v30 = vadd.f32 %v983_v41, %v581_v3  ;;  %4264 = vset.pattern.permute.xlu0 %v5948_v25  ;;  %v1638_v60 = vadd.f32 %v1510_v26, %v1105_v35  ;;  %v1108_v20 = vadd.f32 %v980_v31, %v578_v18 }
 0x131   :  { %v4041_v6 = vpop.permute.xlu1 %4040  ;;  %2419 = vmatprep.mubr.bf16.mxu0 %v2000_v27  ;;  %4258 = vset.pattern.permute.xlu1 %v4415_v28  ;;  %v1513_v13 = vmul.f32 %v4024_v57, %v4779_v51  ;;  %v4031_v40 = vunpack.i.h.bf16 %v4029_v17  ;;  %v1109_v0 = vadd.f32 %v981_v37, %v579_v14  ;;  %v1514_v34 = vmul.f32 %v4024_v57, %v4781_v52 }
 0x132   :  { %2420 = vmatmul.mubr.bf16.gmra.mxu0 %v1999_v22  ;;  %v5302_v19 = vadd.f32 %v1515_v29, %v1110_v45  ;;  %v1644_v62 = vadd.f32 %v1516_v24, %v1111_v30  ;;  %4260 = vperm.xlu1 %4258, %v4253_v16   ;;  %v4030_v49 = vunpack.i.l.bf16 %v4029_v17  ;;  %v4037_v47 = vunpack.i.h.bf16 %v4035_v53 }
 0x133   :  { %v1641_v56 = vadd.f32 %v1513_v13, %v1108_v20  ;;  %v584_v25 = vmul.f32 %v4031_v40, %v4761_v43  ;;  %v585_v2 = vmul.f32 %v4031_v40, %v4764_v44  ;;  %v4036_v28 = vunpack.i.l.bf16 %v4035_v53  ;;  %4266 = vperm.xlu0 %4264, %v4253_v16  }
 0x134   :  { %v1778_v11 = vadd.f32 %v4788_v59, %v1638_v60  ;;  %v1780_v55 = vadd.f32 %v4788_v59, %v1640_v63  ;;  %v1777_v61 = vadd.f32 %v4785_v58, %v1637_v39  ;;  %v1779_v35 = vadd.f32 %v4785_v58, %v5278_v50  ;;  %v4052_v50 = vpop.permute.xlu0 %4051 }
 0x135   :  { %v1642_v1 = vadd.f32 %v1514_v34, %v1109_v0  ;;  %v582_v8 = vmul.f32 %v4030_v49, %v4761_v43  ;;  %v986_v26 = vmul.f32 %v4037_v47, %v4767_v42  ;;  %v987_v36 = vmul.f32 %v4037_v47, %v4777_v48 }
 0x136   :  { %v4047_v10 = vpop.permute.xlu1 %4046  ;;  %v583_v3 = vmul.f32 %v4030_v49, %v4764_v44  ;;  %v984_v18 = vmul.f32 %v4036_v28, %v4767_v42  ;;  %v1906_v16 = vmax.f32 %v1778_v11, 0.0  ;;  %v1908_v15 = vmax.f32 %v1780_v55, 0.0 }
 0x137   :  { %v1114_v63 = vadd.f32 %v986_v26, %v584_v25  ;;  %v985_v39 = vmul.f32 %v4036_v28, %v4777_v48  ;;  %v1905_v14 = vmax.f32 %v1777_v61, 0.0  ;;  %v1907_v32 = vmax.f32 %v1779_v35, 0.0 }
 0x138   :  { %v1115_v12 = vadd.f32 %v987_v36, %v585_v2  ;;  %v1112_v17 = vadd.f32 %v984_v18, %v582_v8  ;;  %v2002_v7 = vpack.c.bf16 %v1908_v15, %v1906_v16  ;;  %v4043_v54 = vunpack.i.h.bf16 %v4041_v6 }
 0x139   :  { %v2001_v4 = vpack.c.bf16 %v1907_v32, %v1905_v14  ;;  %v4042_v38 = vunpack.i.l.bf16 %v4041_v6  ;;  %v4049_v21 = vunpack.i.h.bf16 %v4047_v10  ;;  %v4048_v46 = vunpack.i.l.bf16 %v4047_v10  ;;  %v4064_v32 = vpop.permute.xlu0 %4063 }
 0x13a   :  { %2429 = vmatprep.mubr.bf16.mxu0 %v2002_v7  ;;  %v1519_v57 = vmul.f32 %v4043_v54, %v4779_v51  ;;  %v1520_v33 = vmul.f32 %v4043_v54, %v4781_v52  ;;  %v4054_v23 = vunpack.i.h.bf16 %v4052_v50  ;;  %v4053_v5 = vunpack.i.l.bf16 %v4052_v50 }
 0x13b   :  { %v4058_v9 = vpop.permute.xlu1 %4057  ;;  %v1113_v41 = vadd.f32 %v985_v39, %v583_v3  ;;  %2430 = vmatmul.mubr.bf16.gmra.mxu0 %v2001_v4  ;;  %v1517_v27 = vmul.f32 %v4042_v38, %v4779_v51  ;;  %v1518_v31 = vmul.f32 %v4042_v38, %v4781_v52  ;;  %v588_v37 = vmul.f32 %v4049_v21, %v4761_v43 }
 0x13c   :  { %v1647_v29 = vadd.f32 %v1519_v57, %v1114_v63  ;;  %v1648_v22 = vadd.f32 %v1520_v33, %v1115_v12  ;;  %v589_v45 = vmul.f32 %v4049_v21, %v4764_v44  ;;  %v586_v30 = vmul.f32 %v4048_v46, %v4761_v43 }
 0x13d   :  { %v1645_v24 = vadd.f32 %v1517_v27, %v1112_v17  ;;  %v587_v6 = vmul.f32 %v4048_v46, %v4764_v44  ;;  %v990_v60 = vmul.f32 %v4054_v23, %v4767_v42  ;;  %v991_v20 = vmul.f32 %v4054_v23, %v4777_v48 }
 0x13e   :  { %v1646_v13 = vadd.f32 %v1518_v31, %v1113_v41  ;;  %v988_v40 = vmul.f32 %v4053_v5, %v4767_v42  ;;  %v1782_v53 = vadd.f32 %v4788_v59, %v1642_v1  ;;  %v1784_v0 = vadd.f32 %v4788_v59, %v1644_v62 }
 0x13f   :  { %v1118_v34 = vadd.f32 %v990_v60, %v588_v37  ;;  %v989_v25 = vmul.f32 %v4053_v5, %v4777_v48  ;;  %v1781_v2 = vadd.f32 %v4785_v58, %v1641_v56  ;;  %v1783_v49 = vadd.f32 %v4785_v58, %v5302_v19  ;;  %v4081_v37 = vpop.permute.xlu0 %4080 }
 0x140   :  { %v4070_v47 = vpop.permute.xlu1 %4069  ;;  %v1119_v28 = vadd.f32 %v991_v20, %v589_v45  ;;  %v1116_v11 = vadd.f32 %v988_v40, %v586_v30  ;;  %v1910_v55 = vmax.f32 %v1782_v53, 0.0  ;;  %v1912_v61 = vmax.f32 %v1784_v0, 0.0 }
 0x141   :  { %v1909_v35 = vmax.f32 %v1781_v2, 0.0  ;;  %v1911_v10 = vmax.f32 %v1783_v49, 0.0  ;;  %v4060_v8 = vunpack.i.h.bf16 %v4058_v9  ;;  %v4059_v26 = vunpack.i.l.bf16 %v4058_v9 }
 0x142   :  { %v2004_v1 = vpack.c.bf16 %v1912_v61, %v1910_v55  ;;  %v1786_v62 = vadd.f32 %v4788_v59, %v1646_v13  ;;  %v1788_v36 = vadd.f32 %v4788_v59, %v1648_v22  ;;  %v1785_v3 = vadd.f32 %v4785_v58, %v1645_v24 }
 0x143   :  { %v1117_v56 = vadd.f32 %v989_v25, %v587_v6  ;;  %v2003_v18 = vpack.c.bf16 %v1911_v10, %v1909_v35  ;;  %v1524_v19 = vmul.f32 %v4060_v8, %v4781_v52  ;;  %v1521_v16 = vmul.f32 %v4059_v26, %v4779_v51 }
 0x144   :  { %2439 = vmatprep.mubr.bf16.mxu0 %v2004_v1  ;;  %v1522_v15 = vmul.f32 %v4059_v26, %v4781_v52  ;;  %v1914_v63 = vmax.f32 %v1786_v62, 0.0  ;;  %v1916_v39 = vmax.f32 %v1788_v36, 0.0  ;;  %v1787_v14 = vadd.f32 %v4785_v58, %v1647_v29  ;;  %v4093_v1 = vpop.permute.xlu0 %4092 }
 0x145   :  { %v4076_v50 = vpop.permute.xlu1 %4075  ;;  %2440 = vmatmul.mubr.bf16.gmra.mxu0 %v2003_v18  ;;  %v1523_v12 = vmul.f32 %v4060_v8, %v4779_v51  ;;  %v1649_v17 = vadd.f32 %v1521_v16, %v1116_v11  ;;  %v1652_v7 = vadd.f32 %v1524_v19, %v1119_v28  ;;  %v1913_v54 = vmax.f32 %v1785_v3, 0.0 }
 0x146   :  { %v1650_v4 = vadd.f32 %v1522_v15, %v1117_v56  ;;  %v2006_v38 = vpack.c.bf16 %v1916_v39, %v1914_v63  ;;  %v1915_v21 = vmax.f32 %v1787_v14, 0.0  ;;  %v4072_v46 = vunpack.i.h.bf16 %v4070_v47 }
 0x147   :  { %v4071_v9 = vunpack.i.l.bf16 %v4070_v47  ;;  %v4066_v57 = vunpack.i.h.bf16 %v4064_v32  ;;  %v4065_v33 = vunpack.i.l.bf16 %v4064_v32  ;;  %v4078_v23 = vunpack.i.h.bf16 %v4076_v50 }
 0x148   :  { %2449 = vmatprep.mubr.bf16.mxu0 %v2006_v38  ;;  %v2005_v5 = vpack.c.bf16 %v1915_v21, %v1913_v54  ;;  %v994_v41 = vmul.f32 %v4072_v46, %v4767_v42  ;;  %v995_v27 = vmul.f32 %v4072_v46, %v4777_v48  ;;  %v4077_v31 = vunpack.i.l.bf16 %v4076_v50 }
 0x149   :  { %v992_v29 = vmul.f32 %v4071_v9, %v4767_v42  ;;  %v993_v22 = vmul.f32 %v4071_v9, %v4777_v48  ;;  %v592_v45 = vmul.f32 %v4066_v57, %v4761_v43  ;;  %v593_v30 = vmul.f32 %v4066_v57, %v4764_v44 }
 0x14a   :  { %v4087_v24 = vpop.permute.xlu1 %4086  ;;  %v590_v6 = vmul.f32 %v4065_v33, %v4761_v43  ;;  %v591_v60 = vmul.f32 %v4065_v33, %v4764_v44  ;;  %v1527_v20 = vmul.f32 %v4078_v23, %v4779_v51  ;;  %v1528_v13 = vmul.f32 %v4078_v23, %v4781_v52 }
 0x14b   :  { %v1651_v40 = vadd.f32 %v1523_v12, %v1118_v34  ;;  %v1122_v53 = vadd.f32 %v994_v41, %v592_v45  ;;  %v1123_v0 = vadd.f32 %v995_v27, %v593_v30  ;;  %v1526_v25 = vmul.f32 %v4077_v31, %v4781_v52 }
 0x14c   :  { %v1121_v2 = vadd.f32 %v993_v22, %v591_v60  ;;  %v1525_v49 = vmul.f32 %v4077_v31, %v4779_v51  ;;  %v4083_v47 = vunpack.i.h.bf16 %v4081_v37  ;;  %v4082_v28 = vunpack.i.l.bf16 %v4081_v37  ;;  %v4110_v22 = vpop.permute.xlu0 %4109 }
 0x14d   :  { %2450 = vmatmul.mubr.bf16.gmra.mxu0 %v2005_v5  ;;  %v1120_v11 = vadd.f32 %v992_v29, %v590_v6  ;;  %v1655_v55 = vadd.f32 %v1527_v20, %v1122_v53  ;;  %v1790_v61 = vadd.f32 %v4788_v59, %v1650_v4  ;;  %v1792_v35 = vadd.f32 %v4788_v59, %v1652_v7 }
 0x14e   :  { %v1654_v10 = vadd.f32 %v1526_v25, %v1121_v2  ;;  %v1656_v8 = vadd.f32 %v1528_v13, %v1123_v0  ;;  %v596_v34 = vmul.f32 %v4083_v47, %v4761_v43  ;;  %v597_v26 = vmul.f32 %v4083_v47, %v4764_v44 }
 0x14f   :  { %v594_v62 = vmul.f32 %v4082_v28, %v4761_v43  ;;  %v595_v36 = vmul.f32 %v4082_v28, %v4764_v44  ;;  %v1918_v3 = vmax.f32 %v1790_v61, 0.0  ;;  %v1920_v56 = vmax.f32 %v1792_v35, 0.0 }
 0x150   :  { %v4099_v18 = vpop.permute.xlu1 %4098  ;;  %v1789_v19 = vadd.f32 %v4785_v58, %v1649_v17  ;;  %v1791_v16 = vadd.f32 %v4785_v58, %v1651_v40  ;;  %v4089_v15 = vunpack.i.h.bf16 %v4087_v24  ;;  %v4088_v63 = vunpack.i.l.bf16 %v4087_v24 }
 0x151   :  { %v2008_v39 = vpack.c.bf16 %v1920_v56, %v1918_v3  ;;  %v4095_v14 = vunpack.i.h.bf16 %v4093_v1  ;;  %v4094_v32 = vunpack.i.l.bf16 %v4093_v1  ;;  %v4101_v50 = vunpack.i.h.bf16 %v4099_v18 }
 0x152   :  { %v1917_v12 = vmax.f32 %v1789_v19, 0.0  ;;  %v1919_v7 = vmax.f32 %v1791_v16, 0.0  ;;  %v998_v54 = vmul.f32 %v4089_v15, %v4767_v42  ;;  %v999_v4 = vmul.f32 %v4089_v15, %v4777_v48 }
 0x153   :  { %2459 = vmatprep.mubr.bf16.mxu0 %v2008_v39  ;;  %v996_v38 = vmul.f32 %v4088_v63, %v4767_v42  ;;  %v997_v21 = vmul.f32 %v4088_v63, %v4777_v48  ;;  %v1531_v17 = vmul.f32 %v4095_v14, %v4779_v51  ;;  %v1532_v46 = vmul.f32 %v4095_v14, %v4781_v52 }
 0x154   :  { %v1653_v9 = vadd.f32 %v1525_v49, %v1120_v11  ;;  %v2007_v57 = vpack.c.bf16 %v1919_v7, %v1917_v12  ;;  %v1126_v33 = vadd.f32 %v998_v54, %v596_v34  ;;  %v1127_v23 = vadd.f32 %v999_v4, %v597_v26 }
 0x155   :  { %v4105_v5 = vpop.permute.xlu1 %4104  ;;  %v1529_v41 = vmul.f32 %v4094_v32, %v4779_v51  ;;  %v1124_v27 = vadd.f32 %v996_v38, %v594_v62  ;;  %v1125_v31 = vadd.f32 %v997_v21, %v595_v36  ;;  %v1530_v37 = vmul.f32 %v4094_v32, %v4781_v52  ;;  %v4122_v36 = vpop.permute.xlu0 %4121 }
 0x156   :  { %2460 = vmatmul.mubr.bf16.gmra.mxu0 %v2007_v57  ;;  %v600_v29 = vmul.f32 %v4101_v50, %v4761_v43  ;;  %v1659_v45 = vadd.f32 %v1531_v17, %v1126_v33  ;;  %v1660_v30 = vadd.f32 %v1532_v46, %v1127_v23  ;;  %v1794_v24 = vadd.f32 %v4788_v59, %v1654_v10 }
 0x157   :  { %v1796_v6 = vadd.f32 %v4788_v59, %v1656_v8  ;;  %v601_v60 = vmul.f32 %v4101_v50, %v4764_v44  ;;  %v4100_v20 = vunpack.i.l.bf16 %v4099_v18  ;;  %v1793_v13 = vadd.f32 %v4785_v58, %v1653_v9 }
 0x158   :  { %v1795_v40 = vadd.f32 %v4785_v58, %v1655_v55  ;;  %v1922_v53 = vmax.f32 %v1794_v24, 0.0  ;;  %v4107_v25 = vunpack.i.h.bf16 %v4105_v5  ;;  %v4106_v2 = vunpack.i.l.bf16 %v4105_v5 }
 0x159   :  { %v1924_v0 = vmax.f32 %v1796_v6, 0.0  ;;  %v1921_v49 = vmax.f32 %v1793_v13, 0.0  ;;  %v4112_v28 = vunpack.i.h.bf16 %v4110_v22  ;;  %v4111_v11 = vunpack.i.l.bf16 %v4110_v22 }
 0x15a   :  { %v1923_v47 = vmax.f32 %v1795_v40, 0.0  ;;  %v4116_v61 = vpop.permute.xlu1 %4115  ;;  %v1002_v10 = vmul.f32 %v4107_v25, %v4767_v42  ;;  %v1003_v8 = vmul.f32 %v4107_v25, %v4777_v48  ;;  %v1000_v34 = vmul.f32 %v4106_v2, %v4767_v42 }
 0x15b   :  { %v2010_v35 = vpack.c.bf16 %v1924_v0, %v1922_v53  ;;  %v1001_v1 = vmul.f32 %v4106_v2, %v4777_v48  ;;  %v1535_v55 = vmul.f32 %v4112_v28, %v4779_v51  ;;  %v1536_v62 = vmul.f32 %v4112_v28, %v4781_v52 }
 0x15c   :  { %v2009_v26 = vpack.c.bf16 %v1923_v47, %v1921_v49  ;;  %v598_v3 = vmul.f32 %v4100_v20, %v4761_v43  ;;  %v599_v56 = vmul.f32 %v4100_v20, %v4764_v44  ;;  %v1130_v18 = vadd.f32 %v1002_v10, %v600_v29 }
 0x15d   :  { %2469 = vmatprep.mubr.bf16.mxu0 %v2010_v35  ;;  %v1131_v19 = vadd.f32 %v1003_v8, %v601_v60  ;;  %v1657_v16 = vadd.f32 %v1529_v41, %v1124_v27  ;;  %v1658_v15 = vadd.f32 %v1530_v37, %v1125_v31  ;;  %v4118_v63 = vunpack.i.h.bf16 %v4116_v61 }
 0x15e   :  { %2470 = vmatmul.mubr.bf16.gmra.mxu0 %v2009_v26  ;;  %v4117_v39 = vunpack.i.l.bf16 %v4116_v61  ;;  %v1128_v14 = vadd.f32 %v1000_v34, %v598_v3  ;;  %v1129_v32 = vadd.f32 %v1001_v1, %v599_v56  ;;  %v1533_v50 = vmul.f32 %v4111_v11, %v4779_v51  ;;  %v4139_v61 = vpop.permute.xlu0 %4138 }
 0x15f   :  { %v4124_v12 = vunpack.i.h.bf16 %v4122_v36  ;;  %v4128_v7 = vpop.permute.xlu1 %4127  ;;  %v1663_v54 = vadd.f32 %v1535_v55, %v1130_v18  ;;  %v1664_v4 = vadd.f32 %v1536_v62, %v1131_v19  ;;  %v1534_v38 = vmul.f32 %v4111_v11, %v4781_v52 }
 0x160   :  { %v604_v21 = vmul.f32 %v4118_v63, %v4761_v43  ;;  %v605_v17 = vmul.f32 %v4118_v63, %v4764_v44  ;;  %v602_v46 = vmul.f32 %v4117_v39, %v4761_v43  ;;  %v603_v9 = vmul.f32 %v4117_v39, %v4764_v44 }
 0x161   :  { %v4123_v57 = vunpack.i.l.bf16 %v4122_v36  ;;  %v1798_v33 = vadd.f32 %v4788_v59, %v1658_v15  ;;  %v1800_v23 = vadd.f32 %v4788_v59, %v1660_v30  ;;  %v1797_v5 = vadd.f32 %v4785_v58, %v1657_v16 }
 0x162   :  { %v1799_v41 = vadd.f32 %v4785_v58, %v1659_v45  ;;  %v1006_v27 = vmul.f32 %v4124_v12, %v4767_v42  ;;  %v1007_v31 = vmul.f32 %v4124_v12, %v4777_v48  ;;  %v1661_v13 = vadd.f32 %v1533_v50, %v1128_v14 }
 0x163   :  { %v1004_v37 = vmul.f32 %v4123_v57, %v4767_v42  ;;  %v1005_v29 = vmul.f32 %v4123_v57, %v4777_v48  ;;  %v1926_v22 = vmax.f32 %v1798_v33, 0.0  ;;  %v1928_v24 = vmax.f32 %v1800_v23, 0.0 }
 0x164   :  { %v1925_v6 = vmax.f32 %v1797_v5, 0.0  ;;  %v1927_v60 = vmax.f32 %v1799_v41, 0.0  ;;  %v4134_v20 = vpop.permute.xlu1 %4133  ;;  %v1662_v40 = vadd.f32 %v1534_v38, %v1129_v32  ;;  %v4130_v30 = vunpack.i.h.bf16 %v4128_v7 }
 0x165   :  { %v4129_v53 = vunpack.i.l.bf16 %v4128_v7  ;;  %v1132_v0 = vadd.f32 %v1004_v37, %v602_v46  ;;  %v2012_v25 = vpack.c.bf16 %v1928_v24, %v1926_v22  ;;  %v4136_v45 = vunpack.i.h.bf16 %v4134_v20 }
 0x166   :  { %v4135_v2 = vunpack.i.l.bf16 %v4134_v20  ;;  %v2011_v49 = vpack.c.bf16 %v1927_v60, %v1925_v6  ;;  %v1540_v47 = vmul.f32 %v4130_v30, %v4781_v52  ;;  %v1134_v35 = vadd.f32 %v1006_v27, %v604_v21  ;;  %v5949_v6 = vld [vmem:[#allocation8_spill] sm:$0xff] }
 0x167   :  { %v1537_v28 = vmul.f32 %v4129_v53, %v4779_v51  ;;  %v1538_v11 = vmul.f32 %v4129_v53, %v4781_v52  ;;  %v1135_v10 = vadd.f32 %v1007_v31, %v605_v17  ;;  %v1133_v8 = vadd.f32 %v1005_v29, %v603_v9  ;;  %2479 = vmatprep.mubr.bf16.mxu0 %v2012_v25 }
 0x168   :  { %v1539_v34 = vmul.f32 %v4130_v30, %v4779_v51  ;;  %2480 = vmatmul.mubr.bf16.gmra.mxu0 %v2011_v49  ;;  %v608_v1 = vmul.f32 %v4136_v45, %v4761_v43  ;;  %v609_v55 = vmul.f32 %v4136_v45, %v4764_v44  ;;  %v606_v62 = vmul.f32 %v4135_v2, %v4761_v43 }
 0x169   :  { %v1665_v26 = vadd.f32 %v1537_v28, %v1132_v0  ;;  %v4141_v36 = vunpack.i.h.bf16 %v4139_v61  ;;  %v4140_v3 = vunpack.i.l.bf16 %v4139_v61  ;;  %v1802_v56 = vadd.f32 %v4788_v59, %v1662_v40  ;;  %v4145_v19 = vpop.permute.xlu1 %4144  ;;  %v4151_v40 = vpop.permute.xlu0 %4150 }
 0x16a   :  { %v1804_v18 = vadd.f32 %v4788_v59, %v1664_v4  ;;  %v1666_v16 = vadd.f32 %v1538_v11, %v1133_v8  ;;  %v1668_v15 = vadd.f32 %v1540_v47, %v1135_v10  ;;  %v1801_v63 = vadd.f32 %v4785_v58, %v1661_v13 }
 0x16b   :  { %v1803_v39 = vadd.f32 %v4785_v58, %v1663_v54  ;;  %v1010_v14 = vmul.f32 %v4141_v36, %v4767_v42  ;;  %v1011_v32 = vmul.f32 %v4141_v36, %v4777_v48  ;;  %v1008_v50 = vmul.f32 %v4140_v3, %v4767_v42  ;;  %v2065_v54 = vld [vmem:[%s5933_s4] sm:$0x3] }
 0x16c   :  { %v4147_v12 = vunpack.i.h.bf16 %v4145_v19  ;;  %v1930_v7 = vmax.f32 %v1802_v56, 0.0  ;;  %v1932_v38 = vmax.f32 %v1804_v18, 0.0  ;;  %v1929_v21 = vmax.f32 %v1801_v63, 0.0 }
 0x16d   :  { %v1931_v17 = vmax.f32 %v1803_v39, 0.0  ;;  %v607_v4 = vmul.f32 %v4135_v2, %v4764_v44  ;;  %v1009_v46 = vmul.f32 %v4140_v3, %v4777_v48  ;;  %v4146_v9 = vunpack.i.l.bf16 %v4145_v19  ;;  %v5950_v39 = vld [vmem:[#allocation9_spill] sm:$0xff] }
 0x16e   :  { %v1667_v57 = vadd.f32 %v1539_v34, %v1134_v35  ;;  %v1138_v33 = vadd.f32 %v1010_v14, %v608_v1  ;;  %v2014_v23 = vpack.c.bf16 %v1932_v38, %v1930_v7  ;;  %v4157_v41 = vpop.permute.xlu1 %4156  ;;  %v1139_v27 = vadd.f32 %v1011_v32, %v609_v55 }
 0x16f   :  { %v2013_v5 = vpack.c.bf16 %v1931_v17, %v1929_v21  ;;  %v1136_v31 = vadd.f32 %v1008_v50, %v606_v62  ;;  %v1543_v37 = vmul.f32 %v4147_v12, %v4779_v51  ;;  %v1806_v22 = vadd.f32 %v4788_v59, %v1666_v16  ;;  %v4168_v21 = vpop.permute.xlu0 %4167 }
 0x170   :  { %2489 = vmatprep.mubr.bf16.mxu0 %v2014_v23  ;;  %v1544_v24 = vmul.f32 %v4147_v12, %v4781_v52  ;;  %v5422_v60 = vrot.slane %v2065_v54, %v5949_v6  ;;  %v1808_v20 = vadd.f32 %v4788_v59, %v1668_v15  ;;  %v1805_v13 = vadd.f32 %v4785_v58, %v1665_v26 }
 0x171   :  { %v1137_v30 = vadd.f32 %v1009_v46, %v607_v4  ;;  %2490 = vmatmul.mubr.bf16.gmra.mxu0 %v2013_v5  ;;  %v1541_v53 = vmul.f32 %v4146_v9, %v4779_v51  ;;  %v1542_v0 = vmul.f32 %v4146_v9, %v4781_v52  ;;  %v1934_v25 = vmax.f32 %v1806_v22, 0.0 }
 0x172   :  { %v2271_v29 = vpop.f32.mrf.mxu0  ;;  %v1936_v2 = vmax.f32 %v1808_v20, 0.0  ;;  %v1807_v49 = vadd.f32 %v4785_v58, %v1667_v57  ;;  %v1933_v47 = vmax.f32 %v1805_v13, 0.0  ;;  %v4159_v28 = vunpack.i.h.bf16 %v4157_v41 }
 0x173   :  { %v1671_v11 = vadd.f32 %v1543_v37, %v1138_v33  ;;  %v4158_v61 = vunpack.i.l.bf16 %v4157_v41  ;;  %v4153_v35 = vunpack.i.h.bf16 %v4151_v40  ;;  %v4152_v10 = vunpack.i.l.bf16 %v4151_v40 }
 0x174   :  { %v2273_v45 = vpop.f32.mrf.mxu0  ;;  %v1672_v34 = vadd.f32 %v1544_v24, %v1139_v27  ;;  %v2272_v26 = vadd.f32 %v2271_v29, %v5422_v60  ;;  %v2016_v1 = vpack.c.bf16 %v1936_v2, %v1934_v25  ;;  %v1935_v55 = vmax.f32 %v1807_v49, 0.0  ;;  %v4163_v62 = vpop.permute.xlu1 %4162 }
 0x175   :  { %v1014_v36 = vmul.f32 %v4159_v28, %v4767_v42  ;;  %v1015_v3 = vmul.f32 %v4159_v28, %v4777_v48  ;;  %v1012_v56 = vmul.f32 %v4158_v61, %v4767_v42  ;;  %v1013_v18 = vmul.f32 %v4158_v61, %v4777_v48 }
 0x176   :  { %v2275_v8 = vpop.f32.mrf.mxu0  ;;  %2499 = vmatprep.mubr.bf16.mxu0 %v2016_v1  ;;  %v2015_v16 = vpack.c.bf16 %v1935_v55, %v1933_v47  ;;  %v612_v15 = vmul.f32 %v4153_v35, %v4761_v43  ;;  %v613_v63 = vmul.f32 %v4153_v35, %v4764_v44  ;;  %v5437_v14 = vrot.slane %v2065_v54, %v5950_v39 }
 0x177   :  { %v610_v32 = vmul.f32 %v4152_v10, %v4761_v43  ;;  %v611_v50 = vmul.f32 %v4152_v10, %v4764_v44  ;;  %v2276_v12 = vadd.f32 %v2275_v8, %v5422_v60  ;;  %v4165_v7 = vunpack.i.h.bf16 %v4163_v62 }
 0x178   :  { %v2277_v19 = vpop.f32.mrf.mxu0  ;;  %v1669_v17 = vadd.f32 %v1541_v53, %v1136_v31  ;;  %v1670_v4 = vadd.f32 %v1542_v0, %v1137_v30  ;;  %v2590_v46 = vmax.f32 %v2272_v26, 0.0  ;;  %v2274_v9 = vadd.f32 %v2273_v45, %v5437_v14 }
 0x179   :  { %2500 = vmatmul.mubr.bf16.gmra.mxu0 %v2015_v16  ;;  %v2592_v57 = vmax.f32 %v2276_v12, 0.0  ;;  %v1547_v33 = vmul.f32 %v4165_v7, %v4779_v51  ;;  %v1548_v54 = vmul.f32 %v4165_v7, %v4781_v52  ;;  %v4164_v23 = vunpack.i.l.bf16 %v4163_v62  ;;  %v4174_v25 = vpop.permute.xlu1 %4173 }
 0x17a   :  { %v2281_v38 = vpop.f32.mrf.mxu0  ;;  %v1142_v41 = vadd.f32 %v1014_v36, %v612_v15  ;;  %v1143_v27 = vadd.f32 %v1015_v3, %v613_v63  ;;  %v4170_v29 = vunpack.i.h.bf16 %v4168_v21  ;;  %v1140_v22 = vadd.f32 %v1012_v56, %v610_v32 }
 0x17b   :  { %v5446_v37 = vadd.f32 %v2281_v38, %v5422_v60  ;;  %v1141_v31 = vadd.f32 %v1013_v18, %v611_v50  ;;  %v2591_v24 = vmax.f32 %v2274_v9, 0.0  ;;  %v2278_v20 = vadd.f32 %v2277_v19, %v5437_v14 }
 0x17c   :  { %v2283_v5 = vpop.f32.mrf.mxu0  ;;  %v2718_v40 = vpack.c.bf16 %v2592_v57, %v2590_v46  ;;  %v1545_v30 = vmul.f32 %v4164_v23, %v4779_v51  ;;  %v1546_v53 = vmul.f32 %v4164_v23, %v4781_v52  ;;  %v4169_v0 = vunpack.i.l.bf16 %v4168_v21 }
 0x17d   :  { %v5451_v45 = vadd.f32 %v1547_v33, %v1142_v41  ;;  %v5453_v2 = vadd.f32 %v1548_v54, %v1143_v27  ;;  %v2594_v49 = vmax.f32 %v5446_v37, 0.0  ;;  %v616_v47 = vmul.f32 %v4170_v29, %v4761_v43 }
 0x17e   :  { %v2285_v13 = vpop.f32.mrf.mxu0  ;;  %v617_v61 = vmul.f32 %v4170_v29, %v4764_v44  ;;  %v1810_v35 = vadd.f32 %v4788_v59, %v1670_v4  ;;  %v1812_v10 = vadd.f32 %v4788_v59, %v1672_v34  ;;  %v1809_v8 = vadd.f32 %v4785_v58, %v1669_v17  ;;  %v4180_v34 = vpop.permute.xlu0 %4179 }
 0x17f   :  { %v1811_v26 = vadd.f32 %v4785_v58, %v1671_v11  ;;  %v4176_v1 = vunpack.i.h.bf16 %v4174_v25  ;;  %v4175_v55 = vunpack.i.l.bf16 %v4174_v25  ;;  %v2286_v62 = vadd.f32 %v2285_v13, %v5422_v60  ;;  %v4186_v38 = vpop.permute.xlu1 %4185 }
 0x180   :  { %v2287_v28 = vpop.f32.mrf.mxu0  ;;  %v1673_v36 = vadd.f32 %v1545_v30, %v1140_v22  ;;  %v1938_v3 = vmax.f32 %v1810_v35, 0.0  ;;  %v1940_v56 = vmax.f32 %v1812_v10, 0.0  ;;  %v1937_v18 = vmax.f32 %v1809_v8, 0.0 }
 0x181   :  { %v614_v19 = vmul.f32 %v4169_v0, %v4761_v43  ;;  %v1939_v16 = vmax.f32 %v1811_v26, 0.0  ;;  %v1018_v15 = vmul.f32 %v4176_v1, %v4767_v42  ;;  %v1019_v63 = vmul.f32 %v4176_v1, %v4777_v48 }
 0x182   :  { %v615_v50 = vmul.f32 %v4169_v0, %v4764_v44  ;;  %v2018_v11 = vpack.c.bf16 %v1940_v56, %v1938_v3  ;;  %v1016_v12 = vmul.f32 %v4175_v55, %v4767_v42  ;;  %v2593_v7 = vmax.f32 %v2278_v20, 0.0 }
 0x183   :  { %v2291_v32 = vpop.f32.mrf.mxu0  ;;  %v2284_v21 = vadd.f32 %v2283_v5, %v5437_v14  ;;  %v2017_v17 = vpack.c.bf16 %v1939_v16, %v1937_v18  ;;  %v1017_v4 = vmul.f32 %v4175_v55, %v4777_v48  ;;  %v2596_v46 = vmax.f32 %v2286_v62, 0.0  ;;  %v4192_v55 = vpop.permute.xlu1 %4191 }
 0x184   :  { %2509 = vmatprep.mubr.bf16.mxu0 %v2018_v11  ;;  %v1146_v57 = vadd.f32 %v1018_v15, %v616_v47  ;;  %v1147_v33 = vadd.f32 %v1019_v63, %v617_v61  ;;  %v2719_v54 = vpack.c.bf16 %v2593_v7, %v2591_v24  ;;  %v4182_v23 = vunpack.i.h.bf16 %v4180_v34  ;;  %v4197_v61 = vpop.permute.xlu0 %4196 }
 0x185   :  { %v2293_v9 = vpop.f32.mrf.mxu0  ;;  %2510 = vmatmul.mubr.bf16.gmra.mxu0 %v2017_v17  ;;  %v4181_v41 = vunpack.i.l.bf16 %v4180_v34  ;;  %v2288_v27 = vadd.f32 %v2287_v28, %v5437_v14  ;;  %v5472_v37 = vadd.f32 %v2291_v32, %v5422_v60  ;;  %v4188_v29 = vunpack.i.h.bf16 %v4186_v38 }
 0x186   :  { %v1674_v5 = vadd.f32 %v1546_v53, %v1141_v31  ;;  %v1144_v20 = vadd.f32 %v1016_v12, %v614_v19  ;;  %3018 = vmatprep.mubr.bf16.mxu1 %v2719_v54  ;;  %v1551_v13 = vmul.f32 %v4182_v23, %v4779_v51  ;;  %v1552_v30 = vmul.f32 %v4182_v23, %v4781_v52 }
 0x187   :  { %v2295_v22 = vpop.f32.mrf.mxu0  ;;  %v2595_v0 = vmax.f32 %v2284_v21, 0.0  ;;  %v1145_v25 = vadd.f32 %v1017_v4, %v615_v50  ;;  %v2720_v24 = vpack.c.bf16 %v2596_v46, %v2594_v49  ;;  %v1549_v47 = vmul.f32 %v4181_v41, %v4779_v51  ;;  %3019 = vmatmul.mubr.bf16.vlgmr.msra.gmra.mxu1 %v2718_v40 }
 0x188   :  { %v1550_v35 = vmul.f32 %v4181_v41, %v4781_v52  ;;  %v2597_v10 = vmax.f32 %v2288_v27, 0.0  ;;  %v4187_v8 = vunpack.i.l.bf16 %v4186_v38  ;;  %v5479_v31 = vadd.f32 %v2293_v9, %v5437_v14  ;;  %v4203_v23 = vpop.permute.xlu1 %4202 }
 0x189   :  { %v2297_v28 = vpop.f32.mrf.mxu0  ;;  %v5481_v53 = vadd.f32 %v1551_v13, %v1146_v57  ;;  %v5483_v26 = vadd.f32 %v1552_v30, %v1147_v33  ;;  %v2598_v1 = vmax.f32 %v5472_v37, 0.0  ;;  %v620_v49 = vmul.f32 %v4188_v29, %v4761_v43 }
 0x18a   :  { %v5487_v40 = vadd.f32 %v1549_v47, %v1144_v20  ;;  %v621_v3 = vmul.f32 %v4188_v29, %v4764_v44  ;;  %v4199_v56 = vunpack.i.h.bf16 %v4197_v61  ;;  %v2296_v18 = vadd.f32 %v2295_v22, %v5422_v60 }
 0x18b   :  { %v2301_v62 = vpop.f32.mrf.mxu0  ;;  %v1814_v19 = vadd.f32 %v4788_v59, %v1674_v5  ;;  %v1816_v16 = vadd.f32 %v4788_v59, %v5453_v2  ;;  %v1813_v15 = vadd.f32 %v4785_v58, %v1673_v36  ;;  %v1815_v63 = vadd.f32 %v4785_v58, %v5451_v45  ;;  %v4209_v5 = vpop.permute.xlu0 %4208 }
 0x18c   :  { %v1678_v32 = vadd.f32 %v1550_v35, %v1145_v25  ;;  %v618_v50 = vmul.f32 %v4187_v8, %v4761_v43  ;;  %v619_v11 = vmul.f32 %v4187_v8, %v4764_v44  ;;  %v4198_v12 = vunpack.i.l.bf16 %v4197_v61 }
 0x18d   :  { %v2303_v34 = vpop.f32.mrf.mxu0  ;;  %v1555_v7 = vmul.f32 %v4199_v56, %v4779_v51  ;;  %v1942_v38 = vmax.f32 %v1814_v19, 0.0  ;;  %v1944_v21 = vmax.f32 %v1816_v16, 0.0  ;;  %v1941_v17 = vmax.f32 %v1813_v15, 0.0 }
 0x18e   :  { %v1943_v46 = vmax.f32 %v1815_v63, 0.0  ;;  %v2721_v2 = vpack.c.bf16 %v2597_v10, %v2595_v0  ;;  %v4194_v9 = vunpack.i.h.bf16 %v4192_v55  ;;  %v4193_v36 = vunpack.i.l.bf16 %v4192_v55 }
 0x18f   :  { %v2305_v4 = vpop.f32.mrf.mxu0  ;;  %v2600_v57 = vmax.f32 %v2296_v18, 0.0  ;;  %v2020_v33 = vpack.c.bf16 %v1944_v21, %v1942_v38  ;;  %v2298_v45 = vadd.f32 %v2297_v28, %v5437_v14  ;;  %v5502_v54 = vadd.f32 %v2301_v62, %v5422_v60 }
 0x190   :  { %v2019_v27 = vpack.c.bf16 %v1943_v46, %v1941_v17  ;;  %3028 = vmatprep.mubr.bf16.mxu1 %v2721_v2  ;;  %v1022_v37 = vmul.f32 %v4194_v9, %v4767_v42  ;;  %v1023_v29 = vmul.f32 %v4194_v9, %v4777_v48  ;;  %v1020_v22 = vmul.f32 %v4193_v36, %v4767_v42 }
 0x191   :  { %v2307_v41 = vpop.f32.mrf.mxu0  ;;  %v2599_v20 = vmax.f32 %v5479_v31, 0.0  ;;  %v1556_v13 = vmul.f32 %v4199_v56, %v4781_v52  ;;  %v1553_v30 = vmul.f32 %v4198_v12, %v4779_v51  ;;  %2519 = vmatprep.mubr.bf16.mxu0 %v2020_v33  ;;  %v1021_v0 = vmul.f32 %v4193_v36, %v4777_v48  ;;  %3029 = vmatmul.mubr.bf16.gmra.mxu1 %v2720_v24 }
 0x192   :  { %2520 = vmatmul.mubr.bf16.gmra.mxu0 %v2019_v27  ;;  %v1148_v47 = vadd.f32 %v1020_v22, %v618_v50  ;;  %v1150_v61 = vadd.f32 %v1022_v37, %v620_v49  ;;  %v1151_v28 = vadd.f32 %v1023_v29, %v621_v3  ;;  %v4205_v35 = vunpack.i.h.bf16 %v4203_v23 }
 0x193   :  { %v2311_v25 = vpop.f32.mrf.mxu0  ;;  %v1554_v10 = vmul.f32 %v4198_v12, %v4781_v52  ;;  %v2722_v8 = vpack.c.bf16 %v2600_v57, %v2598_v1  ;;  %v1149_v55 = vadd.f32 %v1021_v0, %v619_v11  ;;  %v4211_v62 = vunpack.i.h.bf16 %v4209_v5 }
 0x194   :  { %v2601_v56 = vmax.f32 %v2298_v45, 0.0  ;;  %v2602_v18 = vmax.f32 %v5502_v54, 0.0  ;;  %v5516_v19 = vadd.f32 %v2303_v34, %v5437_v14  ;;  %v4204_v24 = vunpack.i.l.bf16 %v4203_v23 }
 0x195   :  { %v5512_v31 = vpop.f32.mrf.mxu0  ;;  %v5518_v16 = vadd.f32 %v1553_v30, %v1148_v47  ;;  %v5520_v15 = vadd.f32 %v1555_v7, %v1150_v61  ;;  %v5522_v49 = vadd.f32 %v1556_v13, %v1151_v28  ;;  %v624_v3 = vmul.f32 %v4205_v35, %v4761_v43 }
 0x196   :  { %v1682_v63 = vadd.f32 %v1554_v10, %v1149_v55  ;;  %v1026_v50 = vmul.f32 %v4211_v62, %v4767_v42  ;;  %v4210_v11 = vunpack.i.l.bf16 %v4209_v5  ;;  %v1818_v12 = vadd.f32 %v4788_v59, %v1678_v32  ;;  %v4215_v32 = vpop.permute.xlu1 %4214 }
 0x197   :  { %v2315_v1 = vpop.f32.mrf.mxu0  ;;  %v1820_v34 = vadd.f32 %v4788_v59, %v5483_v26  ;;  %v2306_v38 = vadd.f32 %v2305_v4, %v5422_v60  ;;  %v1817_v7 = vadd.f32 %v4785_v58, %v5487_v40  ;;  %v1819_v21 = vadd.f32 %v4785_v58, %v5481_v53  ;;  %v4226_v40 = vpop.permute.xlu0 %4225 }
 0x198   :  { %v625_v17 = vmul.f32 %v4205_v35, %v4764_v44  ;;  %v622_v46 = vmul.f32 %v4204_v24, %v4761_v43  ;;  %v623_v2 = vmul.f32 %v4204_v24, %v4764_v44  ;;  %v1027_v9 = vmul.f32 %v4211_v62, %v4777_v48 }
 0x199   :  { %v5538_v36 = vpop.f32.mrf.mxu0  ;;  %v1024_v26 = vmul.f32 %v4210_v11, %v4767_v42  ;;  %v1946_v4 = vmax.f32 %v1818_v12, 0.0  ;;  %v1948_v57 = vmax.f32 %v1820_v34, 0.0  ;;  %v1945_v33 = vmax.f32 %v1817_v7, 0.0 }
 0x19a   :  { %v1025_v45 = vmul.f32 %v4210_v11, %v4777_v48  ;;  %v2604_v53 = vmax.f32 %v2306_v38, 0.0  ;;  %v1947_v54 = vmax.f32 %v1819_v21, 0.0  ;;  %v2723_v23 = vpack.c.bf16 %v2601_v56, %v2599_v20  ;;  %v4221_v56 = vpop.permute.xlu1 %4220 }
 0x19b   :  { %v1154_v27 = vadd.f32 %v1026_v50, %v624_v3  ;;  %v2022_v37 = vpack.c.bf16 %v1948_v57, %v1946_v4  ;;  %v2308_v29 = vadd.f32 %v2307_v41, %v5437_v14  ;;  %v4217_v22 = vunpack.i.h.bf16 %v4215_v32 }
 0x19c   :  { %v2021_v5 = vpack.c.bf16 %v1947_v54, %v1945_v33  ;;  %3038 = vmatprep.mubr.bf16.mxu1 %v2723_v23  ;;  %v4216_v13 = vunpack.i.l.bf16 %v4215_v32  ;;  %v5544_v30 = vadd.f32 %v2311_v25, %v5422_v60  ;;  %v4228_v0 = vunpack.i.h.bf16 %v4226_v40 }
 0x19d   :  { %v2603_v61 = vmax.f32 %v5516_v19, 0.0  ;;  %v1155_v28 = vadd.f32 %v1027_v9, %v625_v17  ;;  %v1152_v35 = vadd.f32 %v1024_v26, %v622_v46  ;;  %2529 = vmatprep.mubr.bf16.mxu0 %v2022_v37  ;;  %3039 = vmatmul.mubr.bf16.gmra.mxu1 %v2722_v8  ;;  %v1559_v20 = vmul.f32 %v4217_v22, %v4779_v51 }
 0x19e   :  { %v1153_v10 = vadd.f32 %v1025_v45, %v623_v2  ;;  %v2724_v55 = vpack.c.bf16 %v2604_v53, %v2602_v18  ;;  %2530 = vmatmul.mubr.bf16.gmra.mxu0 %v2021_v5  ;;  %v1560_v41 = vmul.f32 %v4217_v22, %v4781_v52  ;;  %v1557_v62 = vmul.f32 %v4216_v13, %v4779_v51  ;;  %v4232_v37 = vpop.permute.xlu1 %4231 }
 0x19f   :  { %v2321_v47 = vpop.f32.mrf.mxu0  ;;  %v2605_v24 = vmax.f32 %v2308_v29, 0.0  ;;  %v1558_v3 = vmul.f32 %v4216_v13, %v4781_v52  ;;  %v1687_v50 = vadd.f32 %v1559_v20, %v1154_v27  ;;  %v4227_v19 = vunpack.i.l.bf16 %v4226_v40 }
 0x1a0   :  { %v1685_v11 = vadd.f32 %v1557_v62, %v1152_v35  ;;  %v2606_v12 = vmax.f32 %v5544_v30, 0.0  ;;  %v1030_v8 = vmul.f32 %v4228_v0, %v4767_v42  ;;  %v2314_v18 = vadd.f32 %v5512_v31, %v5437_v14 }
 0x1a1   :  { %v2323_v25 = vpop.f32.mrf.mxu0  ;;  %v5556_v38 = vadd.f32 %v4785_v58, %v1687_v50  ;;  %v2316_v7 = vadd.f32 %v2315_v1, %v5422_v60  ;;  %v4223_v21 = vunpack.i.h.bf16 %v4221_v56  ;;  %v4222_v17 = vunpack.i.l.bf16 %v4221_v56 }
 0x1a2   :  { %v1688_v46 = vadd.f32 %v1560_v41, %v1155_v28  ;;  %v1031_v2 = vmul.f32 %v4228_v0, %v4777_v48  ;;  %v1822_v9 = vadd.f32 %v4788_v59, %v1682_v63  ;;  %v1824_v32 = vadd.f32 %v4788_v59, %v5522_v49 }
 0x1a3   :  { %v2325_v34 = vpop.f32.mrf.mxu0  ;;  %v1686_v4 = vadd.f32 %v1558_v3, %v1153_v10  ;;  %v1028_v31 = vmul.f32 %v4227_v19, %v4767_v42  ;;  %v1029_v57 = vmul.f32 %v4227_v19, %v4777_v48  ;;  %v628_v33 = vmul.f32 %v4223_v21, %v4761_v43 }
 0x1a4   :  { %v5569_v1 = vadd.f32 %v4785_v58, %v1685_v11  ;;  %v2607_v40 = vmax.f32 %v2314_v18, 0.0  ;;  %v626_v45 = vmul.f32 %v4222_v17, %v4761_v43  ;;  %v1950_v53 = vmax.f32 %v1822_v9, 0.0 }
 0x1a5   :  { %v5563_v26 = vpop.f32.mrf.mxu0  ;;  %v1955_v49 = vmax.f32 %v5556_v38, 0.0  ;;  %v2608_v54 = vmax.f32 %v2316_v7, 0.0  ;;  %v629_v23 = vmul.f32 %v4223_v21, %v4764_v44  ;;  %v1952_v27 = vmax.f32 %v1824_v32, 0.0 }
 0x1a6   :  { %v627_v29 = vmul.f32 %v4222_v17, %v4764_v44  ;;  %v1158_v22 = vadd.f32 %v1030_v8, %v628_v33  ;;  %v2725_v5 = vpack.c.bf16 %v2605_v24, %v2603_v61  ;;  %v2318_v13 = vadd.f32 %v5538_v36, %v5437_v14 }
 0x1a7   :  { %v5572_v63 = vpop.f32.mrf.mxu0  ;;  %v1156_v28 = vadd.f32 %v1028_v31, %v626_v45  ;;  %v2024_v35 = vpack.c.bf16 %v1952_v27, %v1950_v53  ;;  %v1821_v20 = vadd.f32 %v4785_v58, %v5518_v16  ;;  %v1823_v10 = vadd.f32 %v4785_v58, %v5520_v15  ;;  %v4238_v16 = vpop.permute.xlu0 %4237 }
 0x1a8   :  { %3048 = vmatprep.mubr.bf16.mxu1 %v2725_v5  ;;  %v2609_v41 = vmax.f32 %v2318_v13, 0.0  ;;  %v2322_v62 = vadd.f32 %v2321_v47, %v5422_v60  ;;  %v4234_v56 = vunpack.i.h.bf16 %v4232_v37  ;;  %v4233_v3 = vunpack.i.l.bf16 %v4232_v37  ;;  %v4244_v37 = vpop.permute.xlu1 %4243 }
 0x1a9   :  { %v5579_v0 = vpop.f32.mrf.mxu0  ;;  %2539 = vmatprep.mubr.bf16.mxu0 %v2024_v35  ;;  %v1949_v36 = vmax.f32 %v1821_v20, 0.0  ;;  %v1951_v24 = vmax.f32 %v1823_v10, 0.0  ;;  %3049 = vmatmul.mubr.bf16.gmra.mxu1 %v2724_v55  ;;  %v2324_v50 = vadd.f32 %v2323_v25, %v5437_v14  ;;  %v2326_v19 = vadd.f32 %v2325_v34, %v5422_v60 }
 0x1aa   :  { %v2727_v11 = vpack.c.bf16 %v2609_v41, %v2607_v40  ;;  %v1563_v15 = vmul.f32 %v4234_v56, %v4779_v51  ;;  %v1564_v8 = vmul.f32 %v4234_v56, %v4781_v52  ;;  %v1561_v47 = vmul.f32 %v4233_v3, %v4779_v51 }
 0x1ab   :  { %v5586_v61 = vpop.f32.mrf.mxu0  ;;  %v1953_v7 = vmax.f32 %v5569_v1, 0.0  ;;  %v1159_v21 = vadd.f32 %v1031_v2, %v629_v23  ;;  %v2023_v17 = vpack.c.bf16 %v1951_v24, %v1949_v36  ;;  %v1562_v55 = vmul.f32 %v4233_v3, %v4781_v52 }
 0x1ac   :  { %v1689_v9 = vadd.f32 %v1561_v47, %v1156_v28  ;;  %v1691_v25 = vadd.f32 %v1563_v15, %v1158_v22  ;;  %v2612_v32 = vmax.f32 %v2326_v19, 0.0  ;;  %v1826_v34 = vadd.f32 %v4788_v59, %v1686_v4  ;;  %3058 = vmatprep.mubr.bf16.mxu1 %v2727_v11 }
 0x1ad   :  { %v5593_v18 = vpop.f32.mrf.mxu0  ;;  %v2726_v33 = vpack.c.bf16 %v2608_v54, %v2606_v12  ;;  %v1157_v40 = vadd.f32 %v1029_v57, %v627_v29  ;;  %2540 = vmatmul.mubr.bf16.gmra.mxu0 %v2023_v17  ;;  %v1828_v45 = vadd.f32 %v4788_v59, %v1688_v46  ;;  %v4240_v1 = vunpack.i.h.bf16 %v4238_v16  ;;  %v5610_v12 = vpop.permute.xlu0 %4254 }
 0x1ae   :  { %v2610_v2 = vmax.f32 %v2322_v62, 0.0  ;;  %v1692_v53 = vadd.f32 %v1564_v8, %v1159_v21  ;;  %v2611_v23 = vmax.f32 %v2324_v50, 0.0  ;;  %v1954_v27 = vmax.f32 %v1826_v34, 0.0 }
 0x1af   :  { %v5598_v31 = vpop.f32.mrf.mxu0  ;;  %v1690_v5 = vadd.f32 %v1562_v55, %v1157_v40  ;;  %v5606_v4 = vadd.f32 %v4785_v58, %v1689_v9  ;;  %v1956_v13 = vmax.f32 %v1828_v45, 0.0  ;;  %v2328_v30 = vadd.f32 %v5563_v26, %v5437_v14 }
 0x1b0   :  { %v1831_v46 = vadd.f32 %v4785_v58, %v1691_v25  ;;  %v2728_v57 = vpack.c.bf16 %v2612_v32, %v2610_v2  ;;  %v632_v54 = vmul.f32 %v4240_v1, %v4761_v43  ;;  %v4239_v29 = vunpack.i.l.bf16 %v4238_v16 }
 0x1b1   :  { %v5603_v22 = vpop.f32.mrf.mxu0  ;;  %v2026_v35 = vpack.c.bf16 %v1956_v13, %v1954_v27  ;;  %v2613_v20 = vmax.f32 %v2328_v30, 0.0  ;;  %v2025_v10 = vpack.c.bf16 %v1955_v49, %v1953_v7  ;;  %3059 = vmatmul.mubr.bf16.gmra.mxu1 %v2726_v33  ;;  %v4246_v41 = vunpack.i.h.bf16 %v4244_v37 }
 0x1b2   :  { %v633_v62 = vmul.f32 %v4240_v1, %v4764_v44  ;;  %v4245_v26 = vunpack.i.l.bf16 %v4244_v37  ;;  %v2332_v56 = vadd.f32 %v5572_v63, %v5422_v60  ;;  %v4257_v3 = vunpack.i.h.bf16 %v5610_v12  ;;  %v4250_v63 = vpop.permute.xlu1 %4249 }
 0x1b3   :  { %v5614_v28 = vpop.f32.mrf.mxu0  ;;  %v1957_v24 = vmax.f32 %v5606_v4, 0.0  ;;  %2549 = vmatprep.mubr.bf16.mxu0 %v2026_v35  ;;  %v2729_v50 = vpack.c.bf16 %v2613_v20, %v2611_v23  ;;  %v1034_v19 = vmul.f32 %v4246_v41, %v4767_v42  ;;  %v1035_v38 = vmul.f32 %v4246_v41, %v4777_v48 }
 0x1b4   :  { %v1959_v49 = vmax.f32 %v1831_v46, 0.0  ;;  %v630_v16 = vmul.f32 %v4239_v29, %v4761_v43  ;;  %v1032_v11 = vmul.f32 %v4245_v26, %v4767_v42  ;;  %v4256_v15 = vunpack.i.l.bf16 %v5610_v12 }
 0x1b5   :  { %v5622_v36 = vpop.f32.mrf.mxu0  ;;  %v631_v47 = vmul.f32 %v4239_v29, %v4764_v44  ;;  %2550 = vmatmul.mubr.bf16.gmra.mxu0 %v2025_v10  ;;  %v1033_v7 = vmul.f32 %v4245_v26, %v4777_v48  ;;  %v2614_v21 = vmax.f32 %v2332_v56, 0.0  ;;  %v2334_v17 = vadd.f32 %v5579_v0, %v5437_v14  ;;  %3068 = vmatprep.mubr.bf16.mxu1 %v2729_v50  ;;  %v4267_v10 = vpop.permute.xlu0 %4266 }
 0x1b6   :  { %v1162_v55 = vadd.f32 %v1034_v19, %v632_v54  ;;  %v1163_v9 = vadd.f32 %v1035_v38, %v633_v62  ;;  %v636_v25 = vmul.f32 %v4257_v3, %v4761_v43  ;;  %v637_v32 = vmul.f32 %v4257_v3, %v4764_v44  ;;  %v4261_v29 = vpop.permute.xlu1 %4260 }
 0x1b7   :  { %v5630_v8 = vpop.f32.mrf.mxu0  ;;  %v4252_v33 = vunpack.i.h.bf16 %v4250_v63  ;;  %v4251_v40 = vunpack.i.l.bf16 %v4250_v63  ;;  %v2336_v45 = vadd.f32 %v5586_v61, %v5422_v60  ;;  %v2338_v1 = vadd.f32 %v5593_v18, %v5437_v14 }
 0x1b8   :  { %v1160_v2 = vadd.f32 %v1032_v11, %v630_v16  ;;  %v634_v0 = vmul.f32 %v4256_v15, %v4761_v43  ;;  %v1830_v23 = vadd.f32 %v4788_v59, %v1690_v5  ;;  %v1832_v27 = vadd.f32 %v4788_v59, %v1692_v53 }
 0x1b9   :  { %v5638_v34 = vpop.f32.mrf.mxu0  ;;  %v2615_v4 = vmax.f32 %v2334_v17, 0.0  ;;  %v1567_v13 = vmul.f32 %v4252_v33, %v4779_v51  ;;  %v1565_v30 = vmul.f32 %v4251_v40, %v4779_v51  ;;  %v1566_v12 = vmul.f32 %v4251_v40, %v4781_v52  ;;  %3069 = vmatmul.mubr.bf16.gmra.mxu1 %v2728_v57 }
 0x1ba   :  { %v2616_v61 = vmax.f32 %v2336_v45, 0.0  ;;  %v2617_v46 = vmax.f32 %v2338_v1, 0.0  ;;  %v1958_v18 = vmax.f32 %v1830_v23, 0.0  ;;  %v1960_v54 = vmax.f32 %v1832_v27, 0.0 }
 0x1bb   :  { %v5647_v37 = vpop.f32.mrf.mxu0  ;;  %v1161_v5 = vadd.f32 %v1033_v7, %v631_v47  ;;  %v1693_v35 = vadd.f32 %v1565_v30, %v1160_v2  ;;  %v1695_v53 = vadd.f32 %v1567_v13, %v1162_v55  ;;  %v2027_v20 = vpack.c.bf16 %v1959_v49, %v1957_v24 }
 0x1bc   :  { %v635_v41 = vmul.f32 %v4256_v15, %v4764_v44  ;;  %v2731_v62 = vpack.c.bf16 %v2617_v46, %v2615_v4  ;;  %v2028_v26 = vpack.c.bf16 %v1960_v54, %v1958_v18  ;;  %v2342_v56 = vadd.f32 %v5598_v31, %v5422_v60 }
 0x1bd   :  { %v5652_v43 = vpop.f32.mrf.mxu0  ;;  %v1568_v3 = vmul.f32 %v4252_v33, %v4781_v52  ;;  %v1694_v50 = vadd.f32 %v1566_v12, %v1161_v5  ;;  %v4263_v19 = vunpack.i.h.bf16 %v4261_v29  ;;  %v4262_v38 = vunpack.i.l.bf16 %v4261_v29 }
 0x1be   :  { %v1833_v16 = vadd.f32 %v4785_v58, %v1693_v35  ;;  %v2730_v11 = vpack.c.bf16 %v2616_v61, %v2614_v21  ;;  %2559 = vmatprep.mubr.bf16.mxu0 %v2028_v26  ;;  %v4269_v24 = vunpack.i.h.bf16 %v4267_v10  ;;  %v4268_v49 = vunpack.i.l.bf16 %v4267_v10  ;;  %3078 = vmatprep.mubr.bf16.mxu1 %v2731_v62 }
 0x1bf   :  { %v5657_v57 = vpop.f32.mrf.mxu0  ;;  %v1835_v15 = vadd.f32 %v4785_v58, %v1695_v53  ;;  %2560 = vmatmul.mubr.bf16.gmra.mxu0 %v2027_v20  ;;  %v1038_v31 = vmul.f32 %v4263_v19, %v4767_v42  ;;  %v1039_v63 = vmul.f32 %v4263_v19, %v4777_v48  ;;  %v2344_v47 = vadd.f32 %v5603_v22, %v5437_v14 }
 0x1c0   :  { %v1036_v7 = vmul.f32 %v4262_v38, %v4767_v42  ;;  %v1037_v17 = vmul.f32 %v4262_v38, %v4777_v48  ;;  %v1571_v21 = vmul.f32 %v4269_v24, %v4779_v51  ;;  %v2346_v55 = vadd.f32 %v5614_v28, %v5422_v60 }
 0x1c1   :  { %v2363_v44 = vpop.f32.mrf.mxu0  ;;  %v1696_v40 = vadd.f32 %v1568_v3, %v1163_v9  ;;  %v1166_v45 = vadd.f32 %v1038_v31, %v636_v25  ;;  %v1167_v1 = vadd.f32 %v1039_v63, %v637_v32  ;;  %v1572_v2 = vmul.f32 %v4269_v24, %v4781_v52  ;;  %3079 = vmatmul.mubr.bf16.gmra.mxu1 %v2730_v11 }
 0x1c2   :  { %v1164_v23 = vadd.f32 %v1036_v7, %v634_v0  ;;  %v1165_v27 = vadd.f32 %v1037_v17, %v635_v41  ;;  %v1569_v22 = vmul.f32 %v4268_v49, %v4779_v51  ;;  %v1570_v42 = vmul.f32 %v4268_v49, %v4781_v52 }
 0x1c3   :  { %v5671_v33 = vpop.f32.mrf.mxu0  ;;  %v1961_v4 = vmax.f32 %v1833_v16, 0.0  ;;  %v1963_v13 = vmax.f32 %v1835_v15, 0.0  ;;  %v2348_v28 = vadd.f32 %v5622_v36, %v5437_v14  ;;  %v2619_v30 = vmax.f32 %v2344_v47, 0.0 }
 0x1c4   :  { %v1699_v12 = vadd.f32 %v1571_v21, %v1166_v45  ;;  %v2620_v9 = vmax.f32 %v2346_v55, 0.0  ;;  %v1834_v25 = vadd.f32 %v4788_v59, %v1694_v50  ;;  %v1698_v61 = vadd.f32 %v1570_v42, %v1165_v27 }
 0x1c5   :  { %v2367_v48 = vpop.f32.mrf.mxu0  ;;  %v1700_v0 = vadd.f32 %v1572_v2, %v1167_v1  ;;  %v2621_v46 = vmax.f32 %v2348_v28, 0.0  ;;  %v1836_v51 = vadd.f32 %v4788_v59, %v1696_v40  ;;  %v2618_v18 = vmax.f32 %v2342_v56, 0.0 }
 0x1c6   :  { %v1697_v52 = vadd.f32 %v1569_v22, %v1164_v23  ;;  %v1962_v54 = vmax.f32 %v1834_v25, 0.0  ;;  %v2354_v29 = vadd.f32 %v5638_v34, %v5437_v14  ;;  %v2352_v35 = vadd.f32 %v5630_v8, %v5422_v60 }
 0x1c7   :  { %v5679_v32 = vpop.f32.mrf.mxu0  ;;  %v2733_v36 = vpack.c.bf16 %v2621_v46, %v2619_v30  ;;  %v1964_v53 = vmax.f32 %v1836_v51, 0.0  ;;  %v2732_v20 = vpack.c.bf16 %v2620_v9, %v2618_v18  ;;  %v2029_v10 = vpack.c.bf16 %v1963_v13, %v1961_v4 }
 0x1c8   :  { %v2356_v41 = vadd.f32 %v5647_v37, %v5422_v60  ;;  %v2358_v62 = vadd.f32 %v5652_v43, %v5437_v14  ;;  %v1839_v56 = vadd.f32 %v4785_v58, %v1699_v12  ;;  %v1838_v34 = vadd.f32 %v4788_v59, %v1698_v61 }
 0x1c9   :  { %v2373_v5 = vpop.f32.mrf.mxu0  ;;  %v2030_v3 = vpack.c.bf16 %v1964_v53, %v1962_v54  ;;  %3088 = vmatprep.mubr.bf16.mxu1 %v2733_v36  ;;  %v1840_v50 = vadd.f32 %v4788_v59, %v1700_v0  ;;  %v1837_v8 = vadd.f32 %v4785_v58, %v1697_v52  ;;  %v2623_v19 = vmax.f32 %v2354_v29, 0.0 }
 0x1ca   :  { %v2625_v38 = vmax.f32 %v2358_v62, 0.0  ;;  %3089 = vmatmul.mubr.bf16.gmra.mxu1 %v2732_v20  ;;  %v2364_v16 = vadd.f32 %v2363_v44, %v5437_v14  ;;  %v1966_v11 = vmax.f32 %v1838_v34, 0.0  ;;  %v2624_v24 = vmax.f32 %v2356_v41, 0.0 }
 0x1cb   :  { %v2375_v26 = vpop.f32.mrf.mxu0  ;;  %2569 = vmatprep.mubr.bf16.mxu0 %v2030_v3  ;;  %v1968_v43 = vmax.f32 %v1840_v50, 0.0  ;;  %v2368_v15 = vadd.f32 %v2367_v48, %v5437_v14  ;;  %v2622_v63 = vmax.f32 %v2352_v35, 0.0  ;;  %v1965_v59 = vmax.f32 %v1837_v8, 0.0 }
 0x1cc   :  { %2570 = vmatmul.mubr.bf16.gmra.mxu0 %v2029_v10  ;;  %v2735_v49 = vpack.c.bf16 %v2625_v38, %v2623_v19  ;;  %v1967_v7 = vmax.f32 %v1839_v56, 0.0  ;;  %v2627_v58 = vmax.f32 %v2364_v16, 0.0  ;;  %v2366_v40 = vadd.f32 %v5671_v33, %v5422_v60 }
 0x1cd   :  { %v2377_v37 = vpop.f32.mrf.mxu0  ;;  %v2032_v47 = vpack.c.bf16 %v1968_v43, %v1966_v11  ;;  %v2629_v17 = vmax.f32 %v2368_v15, 0.0  ;;  %v2734_v55 = vpack.c.bf16 %v2624_v24, %v2622_v63  ;;  %v2374_v2 = vadd.f32 %v2373_v5, %v5437_v14 }
 0x1ce   :  { %3098 = vmatprep.mubr.bf16.mxu1 %v2735_v49  ;;  %v2378_v44 = vadd.f32 %v2377_v37, %v5437_v14  ;;  %v2362_v23 = vadd.f32 %v5657_v57, %v5422_v60  ;;  %v2031_v27 = vpack.c.bf16 %v1967_v7, %v1965_v59  ;;  %v2628_v48 = vmax.f32 %v2366_v40, 0.0 }
 0x1cf   :  { %v2381_v31 = vpop.f32.mrf.mxu0  ;;  %2579 = vmatprep.mubr.bf16.mxu0 %v2032_v47  ;;  %v2737_v45 = vpack.c.bf16 %v2629_v17, %v2627_v58  ;;  %v2631_v13 = vmax.f32 %v2374_v2, 0.0  ;;  %v2376_v25 = vadd.f32 %v2375_v26, %v5422_v60  ;;  %v2372_v0 = vadd.f32 %v5679_v32, %v5422_v60 }
 0x1d0   :  { %v2633_v42 = vmax.f32 %v2378_v44, 0.0  ;;  %v2626_v28 = vmax.f32 %v2362_v23, 0.0  ;;  %v2382_v32 = vadd.f32 %v2381_v31, %v5422_v60 }
 0x1d1   :  { %v2383_v21 = vpop.f32.mrf.mxu0  ;;  %v2632_v18 = vmax.f32 %v2376_v25, 0.0  ;;  %v2630_v29 = vmax.f32 %v2372_v0, 0.0 }
 0x1d2   :  { %3099 = vmatmul.mubr.bf16.gmra.mxu1 %v2734_v55  ;;  %v2739_v12 = vpack.c.bf16 %v2633_v42, %v2631_v13  ;;  %v2736_v9 = vpack.c.bf16 %v2628_v48, %v2626_v28  ;;  %v2384_v57 = vadd.f32 %v2383_v21, %v5437_v14  ;;  %v2634_v50 = vmax.f32 %v2382_v32, 0.0 }
 0x1d3   :  { %v2385_v1 = vpop.f32.mrf.mxu0  ;;  %3108 = vmatprep.mubr.bf16.mxu1 %v2737_v45  ;;  %v2738_v53 = vpack.c.bf16 %v2632_v18, %v2630_v29 }
 0x1d4   :  { %2580 = vmatmul.mubr.bf16.gmra.mxu0 %v2031_v27  ;;  %v2635_v54 = vmax.f32 %v2384_v57, 0.0  ;;  %v2386_v20 = vadd.f32 %v2385_v1, %v5422_v60 }
 0x1d5   :  { %v2387_v22 = vpop.f32.mrf.mxu0 }
 0x1d6   :  { %v2388_v33 = vadd.f32 %v2387_v22, %v5437_v14  ;;  %v2636_v56 = vmax.f32 %v2386_v20, 0.0 }
 0x1d7   :  { %v2391_v4 = vpop.f32.mrf.mxu0 }
 0x1d8   :  { %v2637_v51 = vmax.f32 %v2388_v33, 0.0  ;;  %v2740_v16 = vpack.c.bf16 %v2636_v56, %v2634_v50  ;;  %v2392_v24 = vadd.f32 %v2391_v4, %v5422_v60 }
 0x1d9   :  { %v2393_v30 = vpop.f32.mrf.mxu0 }
 0x1da   :  { %3109 = vmatmul.mubr.bf16.gmra.mxu1 %v2736_v9  ;;  %v2741_v36 = vpack.c.bf16 %v2637_v51, %v2635_v54  ;;  %v2394_v41 = vadd.f32 %v2393_v30, %v5437_v14  ;;  %v2638_v47 = vmax.f32 %v2392_v24, 0.0 }
 0x1db   :  { %v2395_v61 = vpop.f32.mrf.mxu0  ;;  %3118 = vmatprep.mubr.bf16.mxu1 %v2739_v12 }
 0x1dc   :  { %v2639_v3 = vmax.f32 %v2394_v41, 0.0  ;;  %v2396_v37 = vadd.f32 %v2395_v61, %v5422_v60 }
 0x1dd   :  { %v2397_v46 = vpop.f32.mrf.mxu0 }
 0x1de   :  { %v2398_v35 = vadd.f32 %v2397_v46, %v5437_v14  ;;  %v2640_v15 = vmax.f32 %v2396_v37, 0.0 }
 0x1df   :  { %v2401_v52 = vpop.f32.mrf.mxu0 }
 0x1e0   :  { %v2641_v26 = vmax.f32 %v2398_v35, 0.0  ;;  %v2742_v58 = vpack.c.bf16 %v2640_v15, %v2638_v47  ;;  %v2402_v55 = vadd.f32 %v2401_v52, %v5422_v60 }
 0x1e1   :  { %v2403_v5 = vpop.f32.mrf.mxu0 }
 0x1e2   :  { %3119 = vmatmul.mubr.bf16.gmra.mxu1 %v2738_v53  ;;  %v2743_v8 = vpack.c.bf16 %v2641_v26, %v2639_v3  ;;  %v2404_v11 = vadd.f32 %v2403_v5, %v5437_v14  ;;  %v2642_v27 = vmax.f32 %v2402_v55, 0.0 }
 0x1e3   :  { %v2405_v10 = vpop.f32.mrf.mxu0  ;;  %3128 = vmatprep.mubr.bf16.mxu1 %v2741_v36 }
 0x1e4   :  { %v2643_v63 = vmax.f32 %v2404_v11, 0.0  ;;  %v2406_v17 = vadd.f32 %v2405_v10, %v5422_v60 }
 0x1e5   :  { %v2407_v62 = vpop.f32.mrf.mxu0 }
 0x1e6   :  { %v2408_v19 = vadd.f32 %v2407_v62, %v5437_v14  ;;  %v2644_v1 = vmax.f32 %v2406_v17, 0.0 }
 0x1e7   :  { %v2411_v34 = vpop.f32.mrf.mxu0 }
 0x1e8   :  { %v2645_v49 = vmax.f32 %v2408_v19, 0.0  ;;  %v2744_v4 = vpack.c.bf16 %v2644_v1, %v2642_v27  ;;  %v2412_v30 = vadd.f32 %v2411_v34, %v5422_v60 }
 0x1e9   :  { %v2413_v38 = vpop.f32.mrf.mxu0 }
 0x1ea   :  { %3129 = vmatmul.mubr.bf16.gmra.mxu1 %v2740_v16  ;;  %v2745_v59 = vpack.c.bf16 %v2645_v49, %v2643_v63  ;;  %v2414_v44 = vadd.f32 %v2413_v38, %v5437_v14  ;;  %v2646_v57 = vmax.f32 %v2412_v30, 0.0 }
 0x1eb   :  { %v2415_v43 = vpop.f32.mrf.mxu0  ;;  %3138 = vmatprep.mubr.bf16.mxu1 %v2743_v8 }
 0x1ec   :  { %v2647_v23 = vmax.f32 %v2414_v44, 0.0  ;;  %v2416_v13 = vadd.f32 %v2415_v43, %v5422_v60 }
 0x1ed   :  { %v2417_v31 = vpop.f32.mrf.mxu0 }
 0x1ee   :  { %v2418_v7 = vadd.f32 %v2417_v31, %v5437_v14  ;;  %v2648_v9 = vmax.f32 %v2416_v13, 0.0 }
 0x1f0   :  { %v2649_v45 = vmax.f32 %v2418_v7, 0.0  ;;  %v2746_v51 = vpack.c.bf16 %v2648_v9, %v2646_v57 }
 0x1f2   :  { %v2421_v21 = vpop.f32.mrf.mxu0  ;;  %3139 = vmatmul.mubr.bf16.gmra.mxu1 %v2742_v58  ;;  %v2747_v42 = vpack.c.bf16 %v2649_v45, %v2647_v23 }
 0x1f3   :  { %3148 = vmatprep.mubr.bf16.mxu1 %v2745_v59  ;;  %v2422_v5 = vadd.f32 %v2421_v21, %v5422_v60 }
 0x1f4   :  { %v2423_v40 = vpop.f32.mrf.mxu0 }
 0x1f5   :  { %v2424_v28 = vadd.f32 %v2423_v40, %v5437_v14  ;;  %v2650_v10 = vmax.f32 %v2422_v5, 0.0 }
 0x1f6   :  { %v2425_v2 = vpop.f32.mrf.mxu0 }
 0x1f7   :  { %v2651_v61 = vmax.f32 %v2424_v28, 0.0  ;;  %v2426_v18 = vadd.f32 %v2425_v2, %v5422_v60 }
 0x1f8   :  { %v2427_v22 = vpop.f32.mrf.mxu0 }
 0x1f9   :  { %v2428_v48 = vadd.f32 %v2427_v22, %v5437_v14  ;;  %v2652_v35 = vmax.f32 %v2426_v18, 0.0 }
 0x1fa   :  { %3149 = vmatmul.mubr.bf16.gmra.mxu1 %v2744_v4 }
 0x1fb   :  { %v2431_v12 = vpop.f32.mrf.mxu0  ;;  %3158 = vmatprep.mubr.bf16.mxu1 %v2747_v42  ;;  %v2653_v33 = vmax.f32 %v2428_v48, 0.0  ;;  %v2748_v62 = vpack.c.bf16 %v2652_v35, %v2650_v10 }
 0x1fc   :  { %v2432_v34 = vadd.f32 %v2431_v12, %v5422_v60 }
 0x1fd   :  { %v2433_v25 = vpop.f32.mrf.mxu0  ;;  %v2749_v46 = vpack.c.bf16 %v2653_v33, %v2651_v61 }
 0x1fe   :  { %v2434_v54 = vadd.f32 %v2433_v25, %v5437_v14  ;;  %v2654_v11 = vmax.f32 %v2432_v34, 0.0 }
 0x1ff   :  { %v2435_v0 = vpop.f32.mrf.mxu0 }
 0x200   :  { %v2655_v20 = vmax.f32 %v2434_v54, 0.0  ;;  %v2436_v26 = vadd.f32 %v2435_v0, %v5422_v60 }
 0x201   :  { %v2437_v52 = vpop.f32.mrf.mxu0 }
 0x202   :  { %v2438_v29 = vadd.f32 %v2437_v52, %v5437_v14  ;;  %3159 = vmatmul.mubr.bf16.gmra.mxu1 %v2746_v51  ;;  %v2656_v19 = vmax.f32 %v2436_v26, 0.0 }
 0x203   :  { %3168 = vmatprep.mubr.bf16.mxu1 %v2749_v46 }
 0x204   :  { %v2657_v36 = vmax.f32 %v2438_v29, 0.0  ;;  %v2750_v49 = vpack.c.bf16 %v2656_v19, %v2654_v11 }
 0x205   :  { %v2441_v53 = vpop.f32.mrf.mxu0 }
 0x206   :  { %v2751_v32 = vpack.c.bf16 %v2657_v36, %v2655_v20  ;;  %v2442_v47 = vadd.f32 %v2441_v53, %v5422_v60 }
 0x207   :  { %v2443_v41 = vpop.f32.mrf.mxu0 }
 0x208   :  { %v2444_v3 = vadd.f32 %v2443_v41, %v5437_v14  ;;  %v2658_v55 = vmax.f32 %v2442_v47, 0.0 }
 0x209   :  { %v2445_v56 = vpop.f32.mrf.mxu0 }
 0x20a   :  { %3169 = vmatmul.mubr.bf16.gmra.mxu1 %v2748_v62  ;;  %v2659_v16 = vmax.f32 %v2444_v3, 0.0  ;;  %v2446_v15 = vadd.f32 %v2445_v56, %v5422_v60 }
 0x20b   :  { %v2447_v50 = vpop.f32.mrf.mxu0  ;;  %3178 = vmatprep.mubr.bf16.mxu1 %v2751_v32 }
 0x20c   :  { %v2448_v8 = vadd.f32 %v2447_v50, %v5437_v14  ;;  %v2660_v58 = vmax.f32 %v2446_v15, 0.0 }
 0x20d   :  { %v2451_v38 = vpop.f32.mrf.mxu0 }
 0x20e   :  { %v2661_v37 = vmax.f32 %v2448_v8, 0.0  ;;  %v2752_v1 = vpack.c.bf16 %v2660_v58, %v2658_v55  ;;  %v2452_v27 = vadd.f32 %v2451_v38, %v5422_v60 }
 0x20f   :  { %v2453_v43 = vpop.f32.mrf.mxu0 }
 0x210   :  { %v2753_v24 = vpack.c.bf16 %v2661_v37, %v2659_v16  ;;  %v2454_v63 = vadd.f32 %v2453_v43, %v5437_v14  ;;  %v2662_v28 = vmax.f32 %v2452_v27, 0.0 }
 0x211   :  { %v2455_v31 = vpop.f32.mrf.mxu0 }
 0x212   :  { %3179 = vmatmul.mubr.bf16.gmra.mxu1 %v2750_v49  ;;  %v2663_v17 = vmax.f32 %v2454_v63, 0.0  ;;  %v2456_v2 = vadd.f32 %v2455_v31, %v5422_v60 }
 0x213   :  { %v2457_v59 = vpop.f32.mrf.mxu0  ;;  %3188 = vmatprep.mubr.bf16.mxu1 %v2753_v24 }
 0x214   :  { %v2458_v7 = vadd.f32 %v2457_v59, %v5437_v14  ;;  %v2664_v48 = vmax.f32 %v2456_v2, 0.0 }
 0x216   :  { %v2665_v21 = vmax.f32 %v2458_v7, 0.0  ;;  %v2461_v44 = vpop.f32.mrf.mxu0  ;;  %v2754_v9 = vpack.c.bf16 %v2664_v48, %v2662_v28 }
 0x217   :  { %v2462_v0 = vadd.f32 %v2461_v44, %v5422_v60 }
 0x218   :  { %v2755_v40 = vpack.c.bf16 %v2665_v21, %v2663_v17  ;;  %v2463_v45 = vpop.f32.mrf.mxu0 }
 0x219   :  { %v2464_v22 = vadd.f32 %v2463_v45, %v5437_v14  ;;  %v2666_v54 = vmax.f32 %v2462_v0, 0.0 }
 0x21a   :  { %v2465_v23 = vpop.f32.mrf.mxu0  ;;  %3189 = vmatmul.mubr.bf16.gmra.mxu1 %v2752_v1 }
 0x21b   :  { %3198 = vmatprep.mubr.bf16.mxu1 %v2755_v40  ;;  %v2667_v30 = vmax.f32 %v2464_v22, 0.0  ;;  %v2466_v25 = vadd.f32 %v2465_v23, %v5422_v60 }
 0x21c   :  { %v2467_v42 = vpop.f32.mrf.mxu0 }
 0x21d   :  { %v2468_v4 = vadd.f32 %v2467_v42, %v5437_v14  ;;  %v2668_v18 = vmax.f32 %v2466_v25, 0.0 }
 0x21e   :  { %v2471_v13 = vpop.f32.mrf.mxu0 }
 0x21f   :  { %v2669_v12 = vmax.f32 %v2468_v4, 0.0  ;;  %v2756_v36 = vpack.c.bf16 %v2668_v18, %v2666_v54  ;;  %v2472_v10 = vadd.f32 %v2471_v13, %v5422_v60  ;;  %v2814_v4 = vld [vmem:[%s5935_s6] sm:$0x3]  ;;  %s4417_s6 = smov [#allocation5]  }
 0x220   :  { %v2473_v33 = vpop.f32.mrf.mxu0  ;;  %s3472_s21 = sshll.u32 %s4417_s6, 4  ;;  %s3473_s21 = int_to_ptr.vmem [resolvable:$true] %s3472_s21 }
 0x221   :  { %v2757_v61 = vpack.c.bf16 %v2669_v12, %v2667_v30  ;;  %v2474_v46 = vadd.f32 %v2473_v33, %v5437_v14  ;;  %v2670_v56 = vmax.f32 %v2472_v10, 0.0  ;;  %s4387_s22 = scalar_lea.vmem %s3473_s21, 16384  ;;  %p4392_p6 = scmp.lt.s32.totalorder %s3473_s21, %s3473_s21 }
 0x222   :  { %v2475_v57 = vpop.f32.mrf.mxu0  ;;  %3199 = vmatmul.mubr.bf16.gmra.mxu1 %v2754_v9  ;;  %v5761_v9 = vrot.slane %v2814_v4, %v5949_v6  ;;  %p4388_p5 = scmp.ne.s32.totalorder %s3473_s21, %s4387_s22  ;;  %p4393_p7 = scmp.lt.s32.totalorder %s4387_s22, %s4387_s22 }
 0x223   :  { %3208 = vmatprep.mubr.bf16.mxu1 %v2757_v61  ;;  %v2671_v29 = vmax.f32 %v2474_v46, 0.0  ;;  %v2476_v35 = vadd.f32 %v2475_v57, %v5422_v60  ;;  %v5764_v57 = vrot.slane %v2814_v4, %v5950_v39 }
 0x224   :  { %v2477_v51 = vpop.f32.mrf.mxu0  ;;  %p4394_p8 = por %p4393_p7, %p4392_p6 }
 0x225   :  { %v2478_v52 = vadd.f32 %v2477_v51, %v5437_v14  ;;  %v2672_v32 = vmax.f32 %v2476_v35, 0.0 }
 0x226   :  { %p4395_p9 = pnand %p4394_p8, %p4388_p5 }
 0x227   :  { %v2673_v5 = vmax.f32 %v2478_v52, 0.0  ;;  %v2758_v50 = vpack.c.bf16 %v2672_v32, %v2670_v56 }
 0x228   :  { %v2481_v20 = vpop.f32.mrf.mxu0 }
 0x229   :  { %v2759_v53 = vpack.c.bf16 %v2673_v5, %v2671_v29  ;;  %v2482_v37 = vadd.f32 %v2481_v20, %v5422_v60 }
 0x22a   :  { %3209 = vmatmul.mubr.bf16.gmra.mxu1 %v2756_v36  ;;  %v2483_v41 = vpop.f32.mrf.mxu0 }
 0x22b   :  { %3218 = vmatprep.mubr.bf16.mxu1 %v2759_v53  ;;  %v2484_v26 = vadd.f32 %v2483_v41, %v5437_v14  ;;  %v2674_v15 = vmax.f32 %v2482_v37, 0.0 }
 0x22c   :  { %v2485_v62 = vpop.f32.mrf.mxu0 }
 0x22d   :  { %v2486_v8 = vadd.f32 %v2485_v62, %v5422_v60  ;;  %v2675_v19 = vmax.f32 %v2484_v26, 0.0 }
 0x22e   :  { %v2487_v3 = vpop.f32.mrf.mxu0 }
 0x22f   :  { %v2488_v34 = vadd.f32 %v2487_v3, %v5437_v14  ;;  %v2676_v24 = vmax.f32 %v2486_v8, 0.0 }
 0x231   :  { %v2677_v38 = vmax.f32 %v2488_v34, 0.0  ;;  %v2491_v16 = vpop.f32.mrf.mxu0  ;;  %v2760_v47 = vpack.c.bf16 %v2676_v24, %v2674_v15 }
 0x232   :  { %3219 = vmatmul.mubr.bf16.gmra.mxu1 %v2758_v50  ;;  %v2492_v17 = vadd.f32 %v2491_v16, %v5422_v60 }
 0x233   :  { %v2761_v11 = vpack.c.bf16 %v2677_v38, %v2675_v19  ;;  %v2493_v43 = vpop.f32.mrf.mxu0 }
 0x234   :  { %v2494_v31 = vadd.f32 %v2493_v43, %v5437_v14  ;;  %v2678_v2 = vmax.f32 %v2492_v17, 0.0 }
 0x235   :  { %v2495_v49 = vpop.f32.mrf.mxu0  ;;  %3228 = vmatprep.mubr.bf16.mxu1 %v2761_v11 }
 0x236   :  { %v2496_v59 = vadd.f32 %v2495_v49, %v5422_v60  ;;  %v2679_v21 = vmax.f32 %v2494_v31, 0.0 }
 0x237   :  { %v2497_v63 = vpop.f32.mrf.mxu0 }
 0x238   :  { %v2498_v7 = vadd.f32 %v2497_v63, %v5437_v14  ;;  %v2680_v40 = vmax.f32 %v2496_v59, 0.0 }
 0x239   :  { %v2501_v58 = vpop.f32.mrf.mxu0 }
 0x23a   :  { %3229 = vmatmul.mubr.bf16.gmra.mxu1 %v2760_v47  ;;  %v2681_v44 = vmax.f32 %v2498_v7, 0.0  ;;  %v2762_v22 = vpack.c.bf16 %v2680_v40, %v2678_v2  ;;  %v2502_v13 = vadd.f32 %v2501_v58, %v5422_v60 }
 0x23b   :  { %v2503_v55 = vpop.f32.mrf.mxu0 }
 0x23c   :  { %v2763_v45 = vpack.c.bf16 %v2681_v44, %v2679_v21  ;;  %v2504_v23 = vadd.f32 %v2503_v55, %v5437_v14  ;;  %v2682_v61 = vmax.f32 %v2502_v13, 0.0 }
 0x23d   :  { %v2505_v1 = vpop.f32.mrf.mxu0 }
 0x23e   :  { %3238 = vmatprep.mubr.bf16.mxu1 %v2763_v45  ;;  %v2506_v42 = vadd.f32 %v2505_v1, %v5422_v60  ;;  %v2683_v28 = vmax.f32 %v2504_v23, 0.0 }
 0x23f   :  { %v2507_v27 = vpop.f32.mrf.mxu0 }
 0x240   :  { %v2508_v48 = vadd.f32 %v2507_v27, %v5437_v14  ;;  %v2684_v12 = vmax.f32 %v2506_v42, 0.0 }
 0x242   :  { %v2685_v30 = vmax.f32 %v2508_v48, 0.0  ;;  %3239 = vmatmul.mubr.bf16.gmra.mxu1 %v2762_v22  ;;  %v2764_v51 = vpack.c.bf16 %v2684_v12, %v2682_v61 }
 0x244   :  { %v2765_v33 = vpack.c.bf16 %v2685_v30, %v2683_v28 }
 0x245   :  { %v2511_v25 = vpop.f32.mrf.mxu0 }
 0x246   :  { %3248 = vmatprep.mubr.bf16.mxu1 %v2765_v33  ;;  %v2512_v36 = vadd.f32 %v2511_v25, %v5422_v60 }
 0x247   :  { %v2513_v0 = vpop.f32.mrf.mxu0  ;;  %v3020_v46 = vpop.f32.mrf.mxu1 }
 0x248   :  { %v3021_v18 = vadd.f32 %v3020_v46, %v5761_v9  ;;  %v2514_v29 = vadd.f32 %v2513_v0, %v5437_v14  ;;  %v2686_v56 = vmax.f32 %v2512_v36, 0.0 }
 0x249   :  { %v2515_v52 = vpop.f32.mrf.mxu0  ;;  %v3022_v54 = vpop.f32.mrf.mxu1 }
 0x24a   :  { %3339 = vst [vmem:[#allocation5] sm:$0xff] %v3021_v18  ;;  %v2516_v5 = vadd.f32 %v2515_v52, %v5422_v60  ;;  %3249 = vmatmul.mubr.bf16.gmra.mxu1 %v2764_v51  ;;  %v3023_v6 = vadd.f32 %v3022_v54, %v5764_v57  ;;  %v2687_v32 = vmax.f32 %v2514_v29, 0.0 }
 0x24b   :  { %v2517_v35 = vpop.f32.mrf.mxu0  ;;  %v3024_v39 = vpop.f32.mrf.mxu1 }
 0x24c   :  { %3340 = vst [vmem:[#allocation5 + $0x8] sm:$0xff] %v3023_v6  ;;  %v2518_v53 = vadd.f32 %v2517_v35, %v5437_v14  ;;  %v3025_v20 = vadd.f32 %v3024_v39, %v5761_v9  ;;  %v2688_v10 = vmax.f32 %v2516_v5, 0.0 }
 0x24d   :  { %v3026_v41 = vpop.f32.mrf.mxu1 }
 0x24e   :  { %v2689_v62 = vmax.f32 %v2518_v53, 0.0  ;;  %3341 = vst [vmem:[#allocation5 + $0x10] sm:$0xff] %v3025_v20  ;;  %v3027_v26 = vadd.f32 %v3026_v41, %v5764_v57  ;;  %v2766_v34 = vpack.c.bf16 %v2688_v10, %v2686_v56 }
 0x250   :  { %v2767_v3 = vpack.c.bf16 %v2689_v62, %v2687_v32  ;;  %3342 = vst [vmem:[#allocation5 + $0x18] sm:$0xff] %v3027_v26 }
 0x251   :  { %v3030_v50 = vpop.f32.mrf.mxu1 }
 0x252   :  { %v2521_v8 = vpop.f32.mrf.mxu0  ;;  %v3031_v19 = vadd.f32 %v3030_v50, %v5761_v9  ;;  %3258 = vmatprep.mubr.bf16.mxu1 %v2767_v3 }
 0x253   :  { %v3032_v38 = vpop.f32.mrf.mxu1  ;;  %3259 = vmatmul.mubr.bf16.gmra.mxu1 %v2766_v34  ;;  %v2522_v63 = vadd.f32 %v2521_v8, %v5422_v60 }
 0x254   :  { %3343 = vst [vmem:[#allocation5 + $0x20] sm:$0xff] %v3031_v19  ;;  %v2523_v16 = vpop.f32.mrf.mxu0  ;;  %v3033_v37 = vadd.f32 %v3032_v38, %v5764_v57 }
 0x255   :  { %v3034_v11 = vpop.f32.mrf.mxu1  ;;  %v2524_v49 = vadd.f32 %v2523_v16, %v5437_v14  ;;  %v2690_v44 = vmax.f32 %v2522_v63, 0.0 }
 0x256   :  { %3344 = vst [vmem:[#allocation5 + $0x28] sm:$0xff] %v3033_v37  ;;  %v2525_v43 = vpop.f32.mrf.mxu0  ;;  %v3035_v24 = vadd.f32 %v3034_v11, %v5761_v9 }
 0x257   :  { %v2526_v15 = vadd.f32 %v2525_v43, %v5422_v60  ;;  %v3036_v31 = vpop.f32.mrf.mxu1  ;;  %v2691_v17 = vmax.f32 %v2524_v49, 0.0 }
 0x258   :  { %3345 = vst [vmem:[#allocation5 + $0x30] sm:$0xff] %v3035_v24  ;;  %v2527_v47 = vpop.f32.mrf.mxu0  ;;  %v3037_v59 = vadd.f32 %v3036_v31, %v5764_v57 }
 0x259   :  { %v2528_v7 = vadd.f32 %v2527_v47, %v5437_v14  ;;  %v2692_v58 = vmax.f32 %v2526_v15, 0.0 }
 0x25a   :  { %3346 = vst [vmem:[#allocation5 + $0x38] sm:$0xff] %v3037_v59 }
 0x25b   :  { %v2693_v21 = vmax.f32 %v2528_v7, 0.0  ;;  %v2768_v45 = vpack.c.bf16 %v2692_v58, %v2690_v44 }
 0x25d   :  { %v2769_v55 = vpack.c.bf16 %v2693_v21, %v2691_v17  ;;  %v3040_v40 = vpop.f32.mrf.mxu1 }
 0x25e   :  { %v2531_v1 = vpop.f32.mrf.mxu0  ;;  %v3041_v2 = vadd.f32 %v3040_v40, %v5761_v9 }
 0x25f   :  { %v3042_v23 = vpop.f32.mrf.mxu1  ;;  %3268 = vmatprep.mubr.bf16.mxu1 %v2769_v55  ;;  %v2532_v12 = vadd.f32 %v2531_v1, %v5422_v60 }
 0x260   :  { %3347 = vst [vmem:[#allocation5 + $0x40] sm:$0xff] %v3041_v2  ;;  %v2533_v27 = vpop.f32.mrf.mxu0  ;;  %v3043_v22 = vadd.f32 %v3042_v23, %v5764_v57  ;;  %3269 = vmatmul.mubr.bf16.gmra.mxu1 %v2768_v45 }
 0x261   :  { %v3044_v42 = vpop.f32.mrf.mxu1  ;;  %v2534_v13 = vadd.f32 %v2533_v27, %v5437_v14  ;;  %v2694_v18 = vmax.f32 %v2532_v12, 0.0 }
 0x262   :  { %3348 = vst [vmem:[#allocation5 + $0x48] sm:$0xff] %v3043_v22  ;;  %v2535_v48 = vpop.f32.mrf.mxu0  ;;  %v3045_v4 = vadd.f32 %v3044_v42, %v5761_v9 }
 0x263   :  { %v2536_v28 = vadd.f32 %v2535_v48, %v5422_v60  ;;  %v3046_v30 = vpop.f32.mrf.mxu1  ;;  %v2695_v46 = vmax.f32 %v2534_v13, 0.0 }
 0x264   :  { %3349 = vst [vmem:[#allocation5 + $0x50] sm:$0xff] %v3045_v4  ;;  %v2537_v33 = vpop.f32.mrf.mxu0  ;;  %v3047_v25 = vadd.f32 %v3046_v30, %v5764_v57 }
 0x265   :  { %v2538_v61 = vadd.f32 %v2537_v33, %v5437_v14  ;;  %v2696_v0 = vmax.f32 %v2536_v28, 0.0 }
 0x266   :  { %3350 = vst [vmem:[#allocation5 + $0x58] sm:$0xff] %v3047_v25 }
 0x267   :  { %v2697_v51 = vmax.f32 %v2538_v61, 0.0  ;;  %v2770_v29 = vpack.c.bf16 %v2696_v0, %v2694_v18 }
 0x269   :  { %v2771_v52 = vpack.c.bf16 %v2697_v51, %v2695_v46  ;;  %v3050_v54 = vpop.f32.mrf.mxu1 }
 0x26a   :  { %v3051_v5 = vadd.f32 %v3050_v54, %v5761_v9 }
 0x26b   :  { %v3052_v6 = vpop.f32.mrf.mxu1  ;;  %3278 = vmatprep.mubr.bf16.mxu1 %v2771_v52 }
 0x26c   :  { %3351 = vst [vmem:[#allocation5 + $0x60] sm:$0xff] %v3051_v5  ;;  %v3053_v36 = vadd.f32 %v3052_v6, %v5764_v57  ;;  %3279 = vmatmul.mubr.bf16.gmra.mxu1 %v2770_v29 }
 0x26d   :  { %v2541_v35 = vpop.f32.mrf.mxu0  ;;  %v3054_v39 = vpop.f32.mrf.mxu1 }
 0x26e   :  { %3352 = vst [vmem:[#allocation5 + $0x68] sm:$0xff] %v3053_v36  ;;  %v3055_v53 = vadd.f32 %v3054_v39, %v5761_v9  ;;  %v2542_v34 = vadd.f32 %v2541_v35, %v5422_v60 }
 0x26f   :  { %v2543_v20 = vpop.f32.mrf.mxu0  ;;  %v3056_v10 = vpop.f32.mrf.mxu1 }
 0x270   :  { %3353 = vst [vmem:[#allocation5 + $0x70] sm:$0xff] %v3055_v53  ;;  %v3057_v41 = vadd.f32 %v3056_v10, %v5764_v57  ;;  %v2544_v26 = vadd.f32 %v2543_v20, %v5437_v14  ;;  %v2698_v15 = vmax.f32 %v2542_v34, 0.0 }
 0x271   :  { %v2545_v32 = vpop.f32.mrf.mxu0  ;;  %v3060_v62 = vpop.f32.mrf.mxu1 }
 0x272   :  { %v2546_v56 = vadd.f32 %v2545_v32, %v5422_v60  ;;  %3354 = vst [vmem:[#allocation5 + $0x78] sm:$0xff] %v3057_v41  ;;  %v3061_v3 = vadd.f32 %v3060_v62, %v5761_v9  ;;  %v2699_v43 = vmax.f32 %v2544_v26, 0.0 }
 0x273   :  { %v2547_v50 = vpop.f32.mrf.mxu0  ;;  %v3062_v8 = vpop.f32.mrf.mxu1 }
 0x274   :  { %v2548_v19 = vadd.f32 %v2547_v50, %v5437_v14  ;;  %3355 = vst [vmem:[#allocation5 + $0x80] sm:$0xff] %v3061_v3  ;;  %v3063_v38 = vadd.f32 %v3062_v8, %v5764_v57  ;;  %v2700_v16 = vmax.f32 %v2546_v56, 0.0 }
 0x275   :  { %v2551_v37 = vpop.f32.mrf.mxu0  ;;  %v3064_v11 = vpop.f32.mrf.mxu1 }
 0x276   :  { %v2701_v24 = vmax.f32 %v2548_v19, 0.0  ;;  %3356 = vst [vmem:[#allocation5 + $0x88] sm:$0xff] %v3063_v38  ;;  %v3065_v49 = vadd.f32 %v3064_v11, %v5761_v9  ;;  %v2772_v7 = vpack.c.bf16 %v2700_v16, %v2698_v15  ;;  %v2552_v40 = vadd.f32 %v2551_v37, %v5422_v60 }
 0x277   :  { %v2553_v31 = vpop.f32.mrf.mxu0  ;;  %v3066_v63 = vpop.f32.mrf.mxu1 }
 0x278   :  { %v2773_v47 = vpack.c.bf16 %v2701_v24, %v2699_v43  ;;  %3357 = vst [vmem:[#allocation5 + $0x90] sm:$0xff] %v3065_v49  ;;  %v3067_v59 = vadd.f32 %v3066_v63, %v5764_v57  ;;  %v2554_v21 = vadd.f32 %v2553_v31, %v5437_v14  ;;  %v2702_v13 = vmax.f32 %v2552_v40, 0.0 }
 0x279   :  { %v2555_v58 = vpop.f32.mrf.mxu0  ;;  %v3070_v17 = vpop.f32.mrf.mxu1 }
 0x27a   :  { %v2556_v44 = vadd.f32 %v2555_v58, %v5422_v60  ;;  %3288 = vmatprep.mubr.bf16.mxu1 %v2773_v47  ;;  %3358 = vst [vmem:[#allocation5 + $0x98] sm:$0xff] %v3067_v59  ;;  %v3071_v55 = vadd.f32 %v3070_v17, %v5761_v9  ;;  %v2703_v42 = vmax.f32 %v2554_v21, 0.0 }
 0x27b   :  { %v2557_v45 = vpop.f32.mrf.mxu0  ;;  %3289 = vmatmul.mubr.bf16.gmra.mxu1 %v2772_v7  ;;  %v3072_v1 = vpop.f32.mrf.mxu1 }
 0x27c   :  { %v2558_v2 = vadd.f32 %v2557_v45, %v5437_v14  ;;  %3359 = vst [vmem:[#allocation5 + $0xa0] sm:$0xff] %v3071_v55  ;;  %v3073_v23 = vadd.f32 %v3072_v1, %v5764_v57  ;;  %v2704_v27 = vmax.f32 %v2556_v44, 0.0 }
 0x27d   :  { %v3074_v22 = vpop.f32.mrf.mxu1 }
 0x27e   :  { %v2705_v48 = vmax.f32 %v2558_v2, 0.0  ;;  %3360 = vst [vmem:[#allocation5 + $0xa8] sm:$0xff] %v3073_v23  ;;  %v3075_v4 = vadd.f32 %v3074_v22, %v5761_v9  ;;  %v2774_v25 = vpack.c.bf16 %v2704_v27, %v2702_v13 }
 0x27f   :  { %v2561_v28 = vpop.f32.mrf.mxu0  ;;  %v3076_v30 = vpop.f32.mrf.mxu1 }
 0x280   :  { %v2775_v12 = vpack.c.bf16 %v2705_v48, %v2703_v42  ;;  %3361 = vst [vmem:[#allocation5 + $0xb0] sm:$0xff] %v3075_v4  ;;  %v3077_v33 = vadd.f32 %v3076_v30, %v5764_v57  ;;  %v2562_v5 = vadd.f32 %v2561_v28, %v5422_v60 }
 0x281   :  { %v2563_v61 = vpop.f32.mrf.mxu0  ;;  %v3080_v0 = vpop.f32.mrf.mxu1 }
 0x282   :  { %3298 = vmatprep.mubr.bf16.mxu1 %v2775_v12  ;;  %3362 = vst [vmem:[#allocation5 + $0xb8] sm:$0xff] %v3077_v33  ;;  %v3081_v46 = vadd.f32 %v3080_v0, %v5761_v9  ;;  %v2564_v52 = vadd.f32 %v2563_v61, %v5437_v14  ;;  %v2706_v62 = vmax.f32 %v2562_v5, 0.0 }
 0x283   :  { %v2565_v51 = vpop.f32.mrf.mxu0  ;;  %3299 = vmatmul.mubr.bf16.gmra.mxu1 %v2774_v25  ;;  %v3082_v18 = vpop.f32.mrf.mxu1 }
 0x284   :  { %v2566_v54 = vadd.f32 %v2565_v51, %v5422_v60  ;;  %3363 = vst [vmem:[#allocation5 + $0xc0] sm:$0xff] %v3081_v46  ;;  %v3083_v29 = vadd.f32 %v3082_v18, %v5764_v57  ;;  %v2707_v10 = vmax.f32 %v2564_v52, 0.0 }
 0x285   :  { %v2567_v6 = vpop.f32.mrf.mxu0  ;;  %v3084_v36 = vpop.f32.mrf.mxu1 }
 0x286   :  { %v2568_v35 = vadd.f32 %v2567_v6, %v5437_v14  ;;  %3364 = vst [vmem:[#allocation5 + $0xc8] sm:$0xff] %v3083_v29  ;;  %v3085_v39 = vadd.f32 %v3084_v36, %v5761_v9  ;;  %v2708_v53 = vmax.f32 %v2566_v54, 0.0 }
 0x287   :  { %v3086_v20 = vpop.f32.mrf.mxu1 }
 0x288   :  { %v2709_v41 = vmax.f32 %v2568_v35, 0.0  ;;  %3365 = vst [vmem:[#allocation5 + $0xd0] sm:$0xff] %v3085_v39  ;;  %v3087_v32 = vadd.f32 %v3086_v20, %v5764_v57  ;;  %v2776_v3 = vpack.c.bf16 %v2708_v53, %v2706_v62 }
 0x28a   :  { %v2777_v26 = vpack.c.bf16 %v2709_v41, %v2707_v10  ;;  %3366 = vst [vmem:[#allocation5 + $0xd8] sm:$0xff] %v3087_v32  ;;  %v3090_v56 = vpop.f32.mrf.mxu1 }
 0x28b   :  { %v3091_v34 = vadd.f32 %v3090_v56, %v5761_v9 }
 0x28c   :  { %v2571_v50 = vpop.f32.mrf.mxu0  ;;  %3308 = vmatprep.mubr.bf16.mxu1 %v2777_v26  ;;  %v3092_v8 = vpop.f32.mrf.mxu1 }
 0x28d   :  { %3367 = vst [vmem:[#allocation5 + $0xe0] sm:$0xff] %v3091_v34  ;;  %3309 = vmatmul.mubr.bf16.gmra.mxu1 %v2776_v3  ;;  %v3093_v19 = vadd.f32 %v3092_v8, %v5764_v57  ;;  %v2572_v31 = vadd.f32 %v2571_v50, %v5422_v60 }
 0x28e   :  { %v2573_v38 = vpop.f32.mrf.mxu0  ;;  %v3094_v16 = vpop.f32.mrf.mxu1 }
 0x28f   :  { %3368 = vst [vmem:[#allocation5 + $0xe8] sm:$0xff] %v3093_v19  ;;  %v3095_v37 = vadd.f32 %v3094_v16, %v5761_v9  ;;  %v2574_v24 = vadd.f32 %v2573_v38, %v5437_v14  ;;  %v2710_v45 = vmax.f32 %v2572_v31, 0.0 }
 0x290   :  { %v2575_v11 = vpop.f32.mrf.mxu0  ;;  %v3096_v43 = vpop.f32.mrf.mxu1 }
 0x291   :  { %v2576_v49 = vadd.f32 %v2575_v11, %v5422_v60  ;;  %3369 = vst [vmem:[#allocation5 + $0xf0] sm:$0xff] %v3095_v37  ;;  %v3097_v15 = vadd.f32 %v3096_v43, %v5764_v57  ;;  %v2711_v44 = vmax.f32 %v2574_v24, 0.0 }
 0x292   :  { %v2577_v63 = vpop.f32.mrf.mxu0  ;;  %v3100_v47 = vpop.f32.mrf.mxu1 }
 0x293   :  { %v2578_v59 = vadd.f32 %v2577_v63, %v5437_v14  ;;  %3370 = vst [vmem:[#allocation5 + $0xf8] sm:$0xff] %v3097_v15  ;;  %v3101_v7 = vadd.f32 %v3100_v47, %v5761_v9  ;;  %v2712_v58 = vmax.f32 %v2576_v49, 0.0 }
 0x294   :  { %v2581_v17 = vpop.f32.mrf.mxu0  ;;  %v3102_v21 = vpop.f32.mrf.mxu1 }
 0x295   :  { %v2713_v55 = vmax.f32 %v2578_v59, 0.0  ;;  %3371 = vst [vmem:[#allocation5 + $0x100] sm:$0xff] %v3101_v7  ;;  %v3103_v40 = vadd.f32 %v3102_v21, %v5764_v57  ;;  %v2778_v22 = vpack.c.bf16 %v2712_v58, %v2710_v45  ;;  %v2582_v30 = vadd.f32 %v2581_v17, %v5422_v60 }
 0x296   :  { %v2583_v1 = vpop.f32.mrf.mxu0  ;;  %v3104_v2 = vpop.f32.mrf.mxu1 }
 0x297   :  { %v2779_v23 = vpack.c.bf16 %v2713_v55, %v2711_v44  ;;  %3372 = vst [vmem:[#allocation5 + $0x108] sm:$0xff] %v3103_v40  ;;  %v3105_v27 = vadd.f32 %v3104_v2, %v5761_v9  ;;  %v2584_v4 = vadd.f32 %v2583_v1, %v5437_v14  ;;  %v2714_v54 = vmax.f32 %v2582_v30, 0.0 }
 0x298   :  { %v2585_v42 = vpop.f32.mrf.mxu0  ;;  %v3106_v48 = vpop.f32.mrf.mxu1 }
 0x299   :  { %v2586_v13 = vadd.f32 %v2585_v42, %v5422_v60  ;;  %3318 = vmatprep.mubr.bf16.mxu1 %v2779_v23  ;;  %3373 = vst [vmem:[#allocation5 + $0x110] sm:$0xff] %v3105_v27  ;;  %v3107_v28 = vadd.f32 %v3106_v48, %v5764_v57  ;;  %v2715_v51 = vmax.f32 %v2584_v4, 0.0 }
 0x29a   :  { %v2587_v12 = vpop.f32.mrf.mxu0  ;;  %3319 = vmatmul.mubr.bf16.gmra.mxu1 %v2778_v22  ;;  %v3110_v33 = vpop.f32.mrf.mxu1 }
 0x29b   :  { %v2588_v25 = vadd.f32 %v2587_v12, %v5437_v14  ;;  %3374 = vst [vmem:[#allocation5 + $0x118] sm:$0xff] %v3107_v28  ;;  %v3111_v61 = vadd.f32 %v3110_v33, %v5761_v9  ;;  %v2716_v0 = vmax.f32 %v2586_v13, 0.0 }
 0x29c   :  { %v3112_v46 = vpop.f32.mrf.mxu1 }
 0x29d   :  { %v2717_v18 = vmax.f32 %v2588_v25, 0.0  ;;  %3375 = vst [vmem:[#allocation5 + $0x120] sm:$0xff] %v3111_v61  ;;  %v3113_v52 = vadd.f32 %v3112_v46, %v5764_v57  ;;  %v2780_v6 = vpack.c.bf16 %v2716_v0, %v2714_v54 }
 0x29e   :  { %v3114_v29 = vpop.f32.mrf.mxu1 }
 0x29f   :  { %v2781_v5 = vpack.c.bf16 %v2717_v18, %v2715_v51  ;;  %3376 = vst [vmem:[#allocation5 + $0x128] sm:$0xff] %v3113_v52  ;;  %v3115_v60 = vadd.f32 %v3114_v29, %v5761_v9 }
 0x2a0   :  { %v3116_v36 = vpop.f32.mrf.mxu1 }
 0x2a1   :  { %3328 = vmatprep.mubr.bf16.mxu1 %v2781_v5  ;;  %3377 = vst [vmem:[#allocation5 + $0x130] sm:$0xff] %v3115_v60  ;;  %v3117_v14 = vadd.f32 %v3116_v36, %v5764_v57 }
 0x2a2   :  { %3329 = vmatmul.mubr.bf16.gmra.mxu1 %v2780_v6  ;;  %v3120_v35 = vpop.f32.mrf.mxu1 }
 0x2a3   :  { %3378 = vst [vmem:[#allocation5 + $0x138] sm:$0xff] %v3117_v14  ;;  %v3121_v39 = vadd.f32 %v3120_v35, %v5761_v9 }
 0x2a4   :  { %v3122_v53 = vpop.f32.mrf.mxu1 }
 0x2a5   :  { %3379 = vst [vmem:[#allocation5 + $0x140] sm:$0xff] %v3121_v39  ;;  %v3123_v20 = vadd.f32 %v3122_v53, %v5764_v57 }
 0x2a6   :  { %v3124_v10 = vpop.f32.mrf.mxu1 }
 0x2a7   :  { %3380 = vst [vmem:[#allocation5 + $0x148] sm:$0xff] %v3123_v20  ;;  %v3125_v41 = vadd.f32 %v3124_v10, %v5761_v9 }
 0x2a8   :  { %v3126_v32 = vpop.f32.mrf.mxu1 }
 0x2a9   :  { %3381 = vst [vmem:[#allocation5 + $0x150] sm:$0xff] %v3125_v41  ;;  %v3127_v62 = vadd.f32 %v3126_v32, %v5764_v57 }
 0x2aa   :  { %v3130_v26 = vpop.f32.mrf.mxu1 }
 0x2ab   :  { %3382 = vst [vmem:[#allocation5 + $0x158] sm:$0xff] %v3127_v62  ;;  %v3131_v56 = vadd.f32 %v3130_v26, %v5761_v9 }
 0x2ac   :  { %v3132_v3 = vpop.f32.mrf.mxu1 }
 0x2ad   :  { %3383 = vst [vmem:[#allocation5 + $0x160] sm:$0xff] %v3131_v56  ;;  %v3133_v34 = vadd.f32 %v3132_v3, %v5764_v57 }
 0x2ae   :  { %v3134_v50 = vpop.f32.mrf.mxu1 }
 0x2af   :  { %3384 = vst [vmem:[#allocation5 + $0x168] sm:$0xff] %v3133_v34  ;;  %v3135_v8 = vadd.f32 %v3134_v50, %v5761_v9 }
 0x2b0   :  { %v3136_v19 = vpop.f32.mrf.mxu1 }
 0x2b1   :  { %3385 = vst [vmem:[#allocation5 + $0x170] sm:$0xff] %v3135_v8  ;;  %v3137_v38 = vadd.f32 %v3136_v19, %v5764_v57 }
 0x2b2   :  { %v3140_v16 = vpop.f32.mrf.mxu1 }
 0x2b3   :  { %3386 = vst [vmem:[#allocation5 + $0x178] sm:$0xff] %v3137_v38  ;;  %v3141_v37 = vadd.f32 %v3140_v16, %v5761_v9 }
 0x2b4   :  { %v3142_v11 = vpop.f32.mrf.mxu1 }
 0x2b5   :  { %3387 = vst [vmem:[#allocation5 + $0x180] sm:$0xff] %v3141_v37  ;;  %v3143_v43 = vadd.f32 %v3142_v11, %v5764_v57 }
 0x2b6   :  { %v3144_v24 = vpop.f32.mrf.mxu1 }
 0x2b7   :  { %3388 = vst [vmem:[#allocation5 + $0x188] sm:$0xff] %v3143_v43  ;;  %v3145_v49 = vadd.f32 %v3144_v24, %v5761_v9 }
 0x2b8   :  { %v3146_v15 = vpop.f32.mrf.mxu1 }
 0x2b9   :  { %3389 = vst [vmem:[#allocation5 + $0x190] sm:$0xff] %v3145_v49  ;;  %v3147_v31 = vadd.f32 %v3146_v15, %v5764_v57 }
 0x2ba   :  { %v3150_v63 = vpop.f32.mrf.mxu1 }
 0x2bb   :  { %3390 = vst [vmem:[#allocation5 + $0x198] sm:$0xff] %v3147_v31  ;;  %v3151_v47 = vadd.f32 %v3150_v63, %v5761_v9 }
 0x2bc   :  { %v3152_v59 = vpop.f32.mrf.mxu1 }
 0x2bd   :  { %3391 = vst [vmem:[#allocation5 + $0x1a0] sm:$0xff] %v3151_v47  ;;  %v3153_v7 = vadd.f32 %v3152_v59, %v5764_v57 }
 0x2be   :  { %v3154_v58 = vpop.f32.mrf.mxu1 }
 0x2bf   :  { %3392 = vst [vmem:[#allocation5 + $0x1a8] sm:$0xff] %v3153_v7  ;;  %v3155_v17 = vadd.f32 %v3154_v58, %v5761_v9 }
 0x2c0   :  { %v3156_v21 = vpop.f32.mrf.mxu1 }
 0x2c1   :  { %3393 = vst [vmem:[#allocation5 + $0x1b0] sm:$0xff] %v3155_v17  ;;  %v3157_v44 = vadd.f32 %v3156_v21, %v5764_v57 }
 0x2c2   :  { %v3160_v55 = vpop.f32.mrf.mxu1 }
 0x2c3   :  { %3394 = vst [vmem:[#allocation5 + $0x1b8] sm:$0xff] %v3157_v44  ;;  %v3161_v40 = vadd.f32 %v3160_v55, %v5761_v9 }
 0x2c4   :  { %v3162_v45 = vpop.f32.mrf.mxu1 }
 0x2c5   :  { %3395 = vst [vmem:[#allocation5 + $0x1c0] sm:$0xff] %v3161_v40  ;;  %v3163_v1 = vadd.f32 %v3162_v45, %v5764_v57 }
 0x2c6   :  { %v3164_v2 = vpop.f32.mrf.mxu1 }
 0x2c7   :  { %3396 = vst [vmem:[#allocation5 + $0x1c8] sm:$0xff] %v3163_v1  ;;  %v3165_v23 = vadd.f32 %v3164_v2, %v5761_v9 }
 0x2c8   :  { %v3166_v27 = vpop.f32.mrf.mxu1 }
 0x2c9   :  { %3397 = vst [vmem:[#allocation5 + $0x1d0] sm:$0xff] %v3165_v23  ;;  %v3167_v22 = vadd.f32 %v3166_v27, %v5764_v57 }
 0x2ca   :  { %v3170_v42 = vpop.f32.mrf.mxu1 }
 0x2cb   :  { %3398 = vst [vmem:[#allocation5 + $0x1d8] sm:$0xff] %v3167_v22  ;;  %v3171_v48 = vadd.f32 %v3170_v42, %v5761_v9 }
 0x2cc   :  { %v3172_v4 = vpop.f32.mrf.mxu1 }
 0x2cd   :  { %3399 = vst [vmem:[#allocation5 + $0x1e0] sm:$0xff] %v3171_v48  ;;  %v3173_v13 = vadd.f32 %v3172_v4, %v5764_v57 }
 0x2ce   :  { %v3174_v28 = vpop.f32.mrf.mxu1 }
 0x2cf   :  { %3400 = vst [vmem:[#allocation5 + $0x1e8] sm:$0xff] %v3173_v13  ;;  %v3175_v30 = vadd.f32 %v3174_v28, %v5761_v9 }
 0x2d0   :  { %v3176_v12 = vpop.f32.mrf.mxu1 }
 0x2d1   :  { %3401 = vst [vmem:[#allocation5 + $0x1f0] sm:$0xff] %v3175_v30  ;;  %v3177_v33 = vadd.f32 %v3176_v12, %v5764_v57 }
 0x2d2   :  { %v3180_v25 = vpop.f32.mrf.mxu1 }
 0x2d3   :  { %3402 = vst [vmem:[#allocation5 + $0x1f8] sm:$0xff] %v3177_v33  ;;  %v3181_v61 = vadd.f32 %v3180_v25, %v5761_v9 }
 0x2d4   :  { %v3182_v0 = vpop.f32.mrf.mxu1 }
 0x2d5   :  { %3403 = vst [vmem:[#allocation5 + $0x200] sm:$0xff] %v3181_v61  ;;  %v3183_v46 = vadd.f32 %v3182_v0, %v5764_v57 }
 0x2d6   :  { %v3184_v51 = vpop.f32.mrf.mxu1 }
 0x2d7   :  { %3404 = vst [vmem:[#allocation5 + $0x208] sm:$0xff] %v3183_v46  ;;  %v3185_v18 = vadd.f32 %v3184_v51, %v5761_v9 }
 0x2d8   :  { %v3186_v52 = vpop.f32.mrf.mxu1 }
 0x2d9   :  { %3405 = vst [vmem:[#allocation5 + $0x210] sm:$0xff] %v3185_v18  ;;  %v3187_v54 = vadd.f32 %v3186_v52, %v5764_v57 }
 0x2da   :  { %v3190_v29 = vpop.f32.mrf.mxu1 }
 0x2db   :  { %3406 = vst [vmem:[#allocation5 + $0x218] sm:$0xff] %v3187_v54  ;;  %v3191_v5 = vadd.f32 %v3190_v29, %v5761_v9 }
 0x2dc   :  { %v3192_v60 = vpop.f32.mrf.mxu1 }
 0x2dd   :  { %3407 = vst [vmem:[#allocation5 + $0x220] sm:$0xff] %v3191_v5  ;;  %v3193_v6 = vadd.f32 %v3192_v60, %v5764_v57 }
 0x2de   :  { %v3194_v36 = vpop.f32.mrf.mxu1 }
 0x2df   :  { %3408 = vst [vmem:[#allocation5 + $0x228] sm:$0xff] %v3193_v6  ;;  %v3195_v14 = vadd.f32 %v3194_v36, %v5761_v9 }
 0x2e0   :  { %v3196_v35 = vpop.f32.mrf.mxu1 }
 0x2e1   :  { %3409 = vst [vmem:[#allocation5 + $0x230] sm:$0xff] %v3195_v14  ;;  %v3197_v39 = vadd.f32 %v3196_v35, %v5764_v57 }
 0x2e2   :  { %v3200_v53 = vpop.f32.mrf.mxu1 }
 0x2e3   :  { %3410 = vst [vmem:[#allocation5 + $0x238] sm:$0xff] %v3197_v39  ;;  %v3201_v20 = vadd.f32 %v3200_v53, %v5761_v9 }
 0x2e4   :  { %v3202_v10 = vpop.f32.mrf.mxu1 }
 0x2e5   :  { %3411 = vst [vmem:[#allocation5 + $0x240] sm:$0xff] %v3201_v20  ;;  %v3203_v41 = vadd.f32 %v3202_v10, %v5764_v57 }
 0x2e6   :  { %v3204_v32 = vpop.f32.mrf.mxu1 }
 0x2e7   :  { %3412 = vst [vmem:[#allocation5 + $0x248] sm:$0xff] %v3203_v41  ;;  %v3205_v62 = vadd.f32 %v3204_v32, %v5761_v9 }
 0x2e8   :  { %v3206_v26 = vpop.f32.mrf.mxu1 }
 0x2e9   :  { %3413 = vst [vmem:[#allocation5 + $0x250] sm:$0xff] %v3205_v62  ;;  %v3207_v56 = vadd.f32 %v3206_v26, %v5764_v57 }
 0x2ea   :  { %v3210_v3 = vpop.f32.mrf.mxu1 }
 0x2eb   :  { %3414 = vst [vmem:[#allocation5 + $0x258] sm:$0xff] %v3207_v56  ;;  %v3211_v34 = vadd.f32 %v3210_v3, %v5761_v9 }
 0x2ec   :  { %v3212_v50 = vpop.f32.mrf.mxu1 }
 0x2ed   :  { %3415 = vst [vmem:[#allocation5 + $0x260] sm:$0xff] %v3211_v34  ;;  %v3213_v8 = vadd.f32 %v3212_v50, %v5764_v57 }
 0x2ee   :  { %v3214_v19 = vpop.f32.mrf.mxu1 }
 0x2ef   :  { %3416 = vst [vmem:[#allocation5 + $0x268] sm:$0xff] %v3213_v8  ;;  %v3215_v38 = vadd.f32 %v3214_v19, %v5761_v9 }
 0x2f0   :  { %v3216_v16 = vpop.f32.mrf.mxu1 }
 0x2f1   :  { %3417 = vst [vmem:[#allocation5 + $0x270] sm:$0xff] %v3215_v38  ;;  %v3217_v37 = vadd.f32 %v3216_v16, %v5764_v57 }
 0x2f2   :  { %v3220_v11 = vpop.f32.mrf.mxu1 }
 0x2f3   :  { %3418 = vst [vmem:[#allocation5 + $0x278] sm:$0xff] %v3217_v37  ;;  %v3221_v43 = vadd.f32 %v3220_v11, %v5761_v9 }
 0x2f4   :  { %v3222_v24 = vpop.f32.mrf.mxu1 }
 0x2f5   :  { %3419 = vst [vmem:[#allocation5 + $0x280] sm:$0xff] %v3221_v43  ;;  %v3223_v49 = vadd.f32 %v3222_v24, %v5764_v57 }
 0x2f6   :  { %v3224_v15 = vpop.f32.mrf.mxu1 }
 0x2f7   :  { %3420 = vst [vmem:[#allocation5 + $0x288] sm:$0xff] %v3223_v49  ;;  %v3225_v31 = vadd.f32 %v3224_v15, %v5761_v9 }
 0x2f8   :  { %v3226_v63 = vpop.f32.mrf.mxu1 }
 0x2f9   :  { %3421 = vst [vmem:[#allocation5 + $0x290] sm:$0xff] %v3225_v31  ;;  %v3227_v47 = vadd.f32 %v3226_v63, %v5764_v57 }
 0x2fa   :  { %v3230_v59 = vpop.f32.mrf.mxu1 }
 0x2fb   :  { %3422 = vst [vmem:[#allocation5 + $0x298] sm:$0xff] %v3227_v47  ;;  %v3231_v7 = vadd.f32 %v3230_v59, %v5761_v9 }
 0x2fc   :  { %v3232_v58 = vpop.f32.mrf.mxu1 }
 0x2fd   :  { %3423 = vst [vmem:[#allocation5 + $0x2a0] sm:$0xff] %v3231_v7  ;;  %v3233_v17 = vadd.f32 %v3232_v58, %v5764_v57 }
 0x2fe   :  { %v3234_v21 = vpop.f32.mrf.mxu1 }
 0x2ff   :  { %3424 = vst [vmem:[#allocation5 + $0x2a8] sm:$0xff] %v3233_v17  ;;  %v3235_v44 = vadd.f32 %v3234_v21, %v5761_v9 }
 0x300   :  { %v3236_v55 = vpop.f32.mrf.mxu1 }
 0x301   :  { %3425 = vst [vmem:[#allocation5 + $0x2b0] sm:$0xff] %v3235_v44  ;;  %v3237_v40 = vadd.f32 %v3236_v55, %v5764_v57 }
 0x302   :  { %v3240_v45 = vpop.f32.mrf.mxu1 }
 0x303   :  { %3426 = vst [vmem:[#allocation5 + $0x2b8] sm:$0xff] %v3237_v40  ;;  %v3241_v1 = vadd.f32 %v3240_v45, %v5761_v9 }
 0x304   :  { %v3242_v2 = vpop.f32.mrf.mxu1 }
 0x305   :  { %3427 = vst [vmem:[#allocation5 + $0x2c0] sm:$0xff] %v3241_v1  ;;  %v3243_v23 = vadd.f32 %v3242_v2, %v5764_v57 }
 0x306   :  { %v3244_v27 = vpop.f32.mrf.mxu1 }
 0x307   :  { %3428 = vst [vmem:[#allocation5 + $0x2c8] sm:$0xff] %v3243_v23  ;;  %v3245_v22 = vadd.f32 %v3244_v27, %v5761_v9 }
 0x308   :  { %v3246_v42 = vpop.f32.mrf.mxu1 }
 0x309   :  { %3429 = vst [vmem:[#allocation5 + $0x2d0] sm:$0xff] %v3245_v22  ;;  %v3247_v48 = vadd.f32 %v3246_v42, %v5764_v57 }
 0x30a   :  { %v3250_v4 = vpop.f32.mrf.mxu1 }
 0x30b   :  { %3430 = vst [vmem:[#allocation5 + $0x2d8] sm:$0xff] %v3247_v48  ;;  %v3251_v13 = vadd.f32 %v3250_v4, %v5761_v9 }
 0x30c   :  { %v3252_v28 = vpop.f32.mrf.mxu1 }
 0x30d   :  { %3431 = vst [vmem:[#allocation5 + $0x2e0] sm:$0xff] %v3251_v13  ;;  %v3253_v30 = vadd.f32 %v3252_v28, %v5764_v57 }
 0x30e   :  { %v3254_v12 = vpop.f32.mrf.mxu1 }
 0x30f   :  { %3432 = vst [vmem:[#allocation5 + $0x2e8] sm:$0xff] %v3253_v30  ;;  %v3255_v33 = vadd.f32 %v3254_v12, %v5761_v9 }
 0x310   :  { %v3256_v25 = vpop.f32.mrf.mxu1 }
 0x311   :  { %3433 = vst [vmem:[#allocation5 + $0x2f0] sm:$0xff] %v3255_v33  ;;  %v3257_v61 = vadd.f32 %v3256_v25, %v5764_v57 }
 0x313   :  { %3434 = vst [vmem:[#allocation5 + $0x2f8] sm:$0xff] %v3257_v61  ;;  %v3260_v0 = vpop.f32.mrf.mxu1 }
 0x314   :  { %v3261_v46 = vadd.f32 %v3260_v0, %v5761_v9 }
 0x315   :  { %v3262_v51 = vpop.f32.mrf.mxu1 }
 0x316   :  { %3435 = vst [vmem:[#allocation5 + $0x300] sm:$0xff] %v3261_v46  ;;  %v3263_v18 = vadd.f32 %v3262_v51, %v5764_v57 }
 0x317   :  { %v3264_v52 = vpop.f32.mrf.mxu1 }
 0x318   :  { %3436 = vst [vmem:[#allocation5 + $0x308] sm:$0xff] %v3263_v18  ;;  %v3265_v54 = vadd.f32 %v3264_v52, %v5761_v9 }
 0x319   :  { %v3266_v29 = vpop.f32.mrf.mxu1 }
 0x31a   :  { %3437 = vst [vmem:[#allocation5 + $0x310] sm:$0xff] %v3265_v54  ;;  %v3267_v5 = vadd.f32 %v3266_v29, %v5764_v57 }
 0x31c   :  { %3438 = vst [vmem:[#allocation5 + $0x318] sm:$0xff] %v3267_v5 }
 0x320   :  { %v3270_v60 = vpop.f32.mrf.mxu1 }
 0x321   :  { %v3271_v6 = vadd.f32 %v3270_v60, %v5761_v9 }
 0x322   :  { %v3272_v36 = vpop.f32.mrf.mxu1 }
 0x323   :  { %3439 = vst [vmem:[#allocation5 + $0x320] sm:$0xff] %v3271_v6  ;;  %v3273_v14 = vadd.f32 %v3272_v36, %v5764_v57 }
 0x324   :  { %v3274_v35 = vpop.f32.mrf.mxu1 }
 0x325   :  { %3440 = vst [vmem:[#allocation5 + $0x328] sm:$0xff] %v3273_v14  ;;  %v3275_v39 = vadd.f32 %v3274_v35, %v5761_v9 }
 0x326   :  { %v3276_v53 = vpop.f32.mrf.mxu1 }
 0x327   :  { %3441 = vst [vmem:[#allocation5 + $0x330] sm:$0xff] %v3275_v39  ;;  %v3277_v20 = vadd.f32 %v3276_v53, %v5764_v57 }
 0x329   :  { %3442 = vst [vmem:[#allocation5 + $0x338] sm:$0xff] %v3277_v20 }
 0x32c   :  { %v3280_v10 = vpop.f32.mrf.mxu1 }
 0x32d   :  { %v3281_v41 = vadd.f32 %v3280_v10, %v5761_v9 }
 0x32e   :  { %v3282_v32 = vpop.f32.mrf.mxu1 }
 0x32f   :  { %3443 = vst [vmem:[#allocation5 + $0x340] sm:$0xff] %v3281_v41  ;;  %v3283_v62 = vadd.f32 %v3282_v32, %v5764_v57 }
 0x330   :  { %v3284_v26 = vpop.f32.mrf.mxu1 }
 0x331   :  { %3444 = vst [vmem:[#allocation5 + $0x348] sm:$0xff] %v3283_v62  ;;  %v3285_v56 = vadd.f32 %v3284_v26, %v5761_v9 }
 0x332   :  { %v3286_v3 = vpop.f32.mrf.mxu1 }
 0x333   :  { %3445 = vst [vmem:[#allocation5 + $0x350] sm:$0xff] %v3285_v56  ;;  %v3287_v34 = vadd.f32 %v3286_v3, %v5764_v57 }
 0x335   :  { %3446 = vst [vmem:[#allocation5 + $0x358] sm:$0xff] %v3287_v34 }
 0x33b   :  { %v3290_v50 = vpop.f32.mrf.mxu1 }
 0x33c   :  { %v3291_v8 = vadd.f32 %v3290_v50, %v5761_v9 }
 0x33d   :  { %v3292_v19 = vpop.f32.mrf.mxu1 }
 0x33e   :  { %3447 = vst [vmem:[#allocation5 + $0x360] sm:$0xff] %v3291_v8  ;;  %v3293_v38 = vadd.f32 %v3292_v19, %v5764_v57 }
 0x33f   :  { %v3294_v16 = vpop.f32.mrf.mxu1 }
 0x340   :  { %3448 = vst [vmem:[#allocation5 + $0x368] sm:$0xff] %v3293_v38  ;;  %v3295_v37 = vadd.f32 %v3294_v16, %v5761_v9 }
 0x341   :  { %v3296_v11 = vpop.f32.mrf.mxu1 }
 0x342   :  { %3449 = vst [vmem:[#allocation5 + $0x370] sm:$0xff] %v3295_v37  ;;  %v3297_v43 = vadd.f32 %v3296_v11, %v5764_v57 }
 0x343   :  { %v3300_v24 = vpop.f32.mrf.mxu1 }
 0x344   :  { %3450 = vst [vmem:[#allocation5 + $0x378] sm:$0xff] %v3297_v43  ;;  %v3301_v49 = vadd.f32 %v3300_v24, %v5761_v9 }
 0x345   :  { %v3302_v15 = vpop.f32.mrf.mxu1 }
 0x346   :  { %3451 = vst [vmem:[#allocation5 + $0x380] sm:$0xff] %v3301_v49  ;;  %v3303_v31 = vadd.f32 %v3302_v15, %v5764_v57 }
 0x347   :  { %v3304_v63 = vpop.f32.mrf.mxu1 }
 0x348   :  { %3452 = vst [vmem:[#allocation5 + $0x388] sm:$0xff] %v3303_v31  ;;  %v3305_v47 = vadd.f32 %v3304_v63, %v5761_v9 }
 0x349   :  { %v3306_v59 = vpop.f32.mrf.mxu1 }
 0x34a   :  { %3453 = vst [vmem:[#allocation5 + $0x390] sm:$0xff] %v3305_v47  ;;  %v3307_v7 = vadd.f32 %v3306_v59, %v5764_v57 }
 0x34c   :  { %3454 = vst [vmem:[#allocation5 + $0x398] sm:$0xff] %v3307_v7 }
 0x34d   :  { %v3310_v58 = vpop.f32.mrf.mxu1 }
 0x34e   :  { %v3311_v17 = vadd.f32 %v3310_v58, %v5761_v9 }
 0x34f   :  { %v3312_v21 = vpop.f32.mrf.mxu1 }
 0x350   :  { %3455 = vst [vmem:[#allocation5 + $0x3a0] sm:$0xff] %v3311_v17  ;;  %v3313_v44 = vadd.f32 %v3312_v21, %v5764_v57 }
 0x351   :  { %v3314_v55 = vpop.f32.mrf.mxu1 }
 0x352   :  { %3456 = vst [vmem:[#allocation5 + $0x3a8] sm:$0xff] %v3313_v44  ;;  %v3315_v40 = vadd.f32 %v3314_v55, %v5761_v9 }
 0x353   :  { %v3316_v45 = vpop.f32.mrf.mxu1 }
 0x354   :  { %3457 = vst [vmem:[#allocation5 + $0x3b0] sm:$0xff] %v3315_v40  ;;  %v3317_v1 = vadd.f32 %v3316_v45, %v5764_v57 }
 0x356   :  { %3458 = vst [vmem:[#allocation5 + $0x3b8] sm:$0xff] %v3317_v1 }
 0x35a   :  { %v3320_v2 = vpop.f32.mrf.mxu1 }
 0x35b   :  { %v3321_v23 = vadd.f32 %v3320_v2, %v5761_v9 }
 0x35c   :  { %v3322_v27 = vpop.f32.mrf.mxu1 }
 0x35d   :  { %3459 = vst [vmem:[#allocation5 + $0x3c0] sm:$0xff] %v3321_v23  ;;  %v3323_v22 = vadd.f32 %v3322_v27, %v5764_v57 }
 0x35e   :  { %v3324_v42 = vpop.f32.mrf.mxu1 }
 0x35f   :  { %3460 = vst [vmem:[#allocation5 + $0x3c8] sm:$0xff] %v3323_v22  ;;  %v3325_v48 = vadd.f32 %v3324_v42, %v5761_v9 }
 0x360   :  { %v3326_v4 = vpop.f32.mrf.mxu1 }
 0x361   :  { %3461 = vst [vmem:[#allocation5 + $0x3d0] sm:$0xff] %v3325_v48  ;;  %v3327_v13 = vadd.f32 %v3326_v4, %v5764_v57 }
 0x362   :  { %v3330_v28 = vpop.f32.mrf.mxu1 }
 0x363   :  { %3462 = vst [vmem:[#allocation5 + $0x3d8] sm:$0xff] %v3327_v13  ;;  %v3331_v30 = vadd.f32 %v3330_v28, %v5761_v9 }
 0x364   :  { %v3332_v12 = vpop.f32.mrf.mxu1 }
 0x365   :  { %3463 = vst [vmem:[#allocation5 + $0x3e0] sm:$0xff] %v3331_v30  ;;  %v3333_v33 = vadd.f32 %v3332_v12, %v5764_v57 }
 0x366   :  { %v3334_v25 = vpop.f32.mrf.mxu1 }
 0x367   :  { %3464 = vst [vmem:[#allocation5 + $0x3e8] sm:$0xff] %v3333_v33  ;;  %v3335_v61 = vadd.f32 %v3334_v25, %v5761_v9 }
 0x368   :  { %v3336_v0 = vpop.f32.mrf.mxu1 }
 0x369   :  { %3465 = vst [vmem:[#allocation5 + $0x3f0] sm:$0xff] %v3335_v61  ;;  %v3337_v46 = vadd.f32 %v3336_v0, %v5764_v57 }
 0x36b   :  { %3466 = vst [vmem:[#allocation5 + $0x3f8] sm:$0xff] %v3337_v46 }
 0x36c   :  { %4398 = shalt.err (!%p4395_p9)
}
 0x36d   :  { %s4418_s23 = smov 256   ;;  %s4419_s24 = smov 16  }
 0x36e   :  { %3478 = dma.vmem_to_hbm [thread:$0]  %s3473_s21, 16384, %s5936_s7, [#allocation4], %s4418_s23, %s4418_s23, %s4419_s24  }
 0x36f   :  { %4409 = dma.done.wait [#allocation4], 16384  }
 0x370   :  { %4410 = vsyncadd [#allocation4], 4294950912 }
 0x371   :  { %3482 = vsyncpa [#allocation3], 1 }
 0x372   :  { %3483 = vsyncpa [#allocation4], 1 }

</bundles_post_ra>
